<compile_context>
chip_gen: v7x
topology: tpu7x:2x2x1
jax: 0.10.0
libtpu: 0.0.40
codegen_flags: <defaults>
</compile_context>

<pallas_src>
import functools

import jax
import jax.numpy as jnp
import numpy as np
from jax.experimental import pallas as pl
from jax.experimental.pallas import tpu as pltpu


# --------------------------------------------------------------------------- #
# Shared math helpers (used by both kernel and reference)
# --------------------------------------------------------------------------- #
def _layer_norm(x, gamma, beta, eps=1e-5):
    mu = jnp.mean(x, axis=-1, keepdims=True)
    xc = x - mu
    var = jnp.mean(xc * xc, axis=-1, keepdims=True)
    return xc * jax.lax.rsqrt(var + eps) * gamma + beta


def _gelu(x):
    # tanh approximation of GELU (RT-DETR encoder uses activation='gelu')
    c = 0.7978845608028654  # sqrt(2/pi)
    return 0.5 * x * (1.0 + jnp.tanh(c * (x + 0.044715 * x * x * x)))


# --------------------------------------------------------------------------- #
# Pallas kernel: one grid step = one (batch element, encoder layer)
# --------------------------------------------------------------------------- #
def encoder_kernel(x_ref, pos_ref, wqk_ref, bqk_ref, wv_ref, bv_ref,
                   wo_ref, bo_ref, w1_ref, b1_ref, w2_ref, b2_ref,
                   ln1_ref, ln2_ref, o_ref, act_ref, *, nhead):
    layer = pl.program_id(1)
    n_layers = pl.num_programs(1)
    L, D = act_ref.shape
    hd = D // nhead
    scale = 1.0 / float(np.sqrt(hd))

    # Load the input once per batch element; afterwards the running activation
    # stays resident in the VMEM scratch across the (arbitrary) layer axis.
    @pl.when(layer == 0)
    def _():
        act_ref[...] = x_ref[0].astype(jnp.float32)

    x = act_ref[...]                                    # (L, D) f32
    pos = pos_ref[0].astype(jnp.float32)                # (L, D) f32

    # ---------------- self-attention (q/k get pos_embed, v does not) --------
    qk_in = (x + pos).astype(jnp.bfloat16)
    v_in = x.astype(jnp.bfloat16)

    qk = jnp.dot(qk_in, wqk_ref[0],
                 preferred_element_type=jnp.float32) + bqk_ref[0]   # (L, 2D)
    v = jnp.dot(v_in, wv_ref[0],
                preferred_element_type=jnp.float32) + bv_ref[0]     # (L, D)
    # Fold the 1/sqrt(hd) scale into Q: (L, D) muls instead of (L, L).
    q = qk[:, :D] * scale
    k = qk[:, D:]

    heads = []
    for h in range(nhead):                              # static (unrolled) loop
        qh = q[:, h * hd:(h + 1) * hd].astype(jnp.bfloat16)
        kh = k[:, h * hd:(h + 1) * hd].astype(jnp.bfloat16)
        vh = v[:, h * hd:(h + 1) * hd].astype(jnp.bfloat16)
        s = jax.lax.dot_general(qh, kh, (((1,), (1,)), ((), ())),
                                preferred_element_type=jnp.float32)  # (L, L)
        m = jnp.max(s, axis=-1, keepdims=True)
        p = jnp.exp(s - m)
        denom = jnp.sum(p, axis=-1, keepdims=True)
        p = p * pl.reciprocal(denom, approx=True)       # EUP, not VPU divide
        heads.append(jnp.dot(p.astype(jnp.bfloat16), vh,
                             preferred_element_type=jnp.float32))
    attn = jnp.concatenate(heads, axis=-1)              # (L, D) f32

    attn = jnp.dot(attn.astype(jnp.bfloat16), wo_ref[0],
                   preferred_element_type=jnp.float32) + bo_ref[0]

    ln1 = ln1_ref[0]                                    # (2, D): [gamma; beta]
    x = _layer_norm(x + attn, ln1[0:1], ln1[1:2])

    # ---------------- feed-forward ------------------------------------------
    h1 = jnp.dot(x.astype(jnp.bfloat16), w1_ref[0],
                 preferred_element_type=jnp.float32) + b1_ref[0]
    h1 = _gelu(h1)
    ff = jnp.dot(h1.astype(jnp.bfloat16), w2_ref[0],
                 preferred_element_type=jnp.float32) + b2_ref[0]

    ln2 = ln2_ref[0]
    x = _layer_norm(x + ff, ln2[0:1], ln2[1:2])

    act_ref[...] = x

    # Store the output only after the last layer; the output block index is
    # constant across the layer axis, so it is written back to HBM once per b.
    @pl.when(layer == n_layers - 1)
    def _():
        o_ref[0] = x.astype(o_ref.dtype)


# --------------------------------------------------------------------------- #
# Wrapper
# --------------------------------------------------------------------------- #
def _estimate_vmem_limit(L, D, dff, in_dtype):
    b = lambda shape, dt: int(np.prod(shape)) * jnp.dtype(dt).itemsize
    act_blk = b((1, L, D), in_dtype)
    w_blk = (b((D, 2 * D), jnp.bfloat16) + 2 * b((D, D), jnp.bfloat16)
             + b((D, dff), jnp.bfloat16) + b((dff, D), jnp.bfloat16))
    small_blk = (b((1, 2 * D), jnp.float32) + 3 * b((1, D), jnp.float32)
                 + b((1, dff), jnp.float32) + 2 * b((2, D), jnp.float32))
    blocks = 2 * (2 * act_blk + w_blk + small_blk) + 2 * act_blk  # double-buffered
    scratch = b((L, D), jnp.float32)
    live = 4 * (3 * L * D + 2 * L * L + L * dff + 4 * L * D)      # f32 intermediates
    need = blocks + scratch + live
    # generous headroom, but stay well under the 64 MiB physical VMEM of v7x
    return int(min(max(2 * need, 32 << 20), 48 << 20))


def transformer_encoder(src, pos_embed, params):
    """src: (B, L, D) f32, pos_embed: (1, L, D) f32 -> (B, L, D) f32."""
    B, L, D = src.shape
    nh = params["nhead"]
    nl = params["num_layers"]
    dff = params["w1"].shape[-1]

    per_batch = lambda b, l: (b, 0, 0)
    per_layer = lambda b, l: (l, 0, 0)
    const = lambda b, l: (0, 0, 0)

    in_specs = [
        pl.BlockSpec((1, L, D), per_batch),            # src
        pl.BlockSpec((1, L, D), const),                # pos_embed
        pl.BlockSpec((1, D, 2 * D), per_layer),        # w_qk  (bf16)
        pl.BlockSpec((1, 1, 2 * D), per_layer),        # b_qk
        pl.BlockSpec((1, D, D), per_layer),            # w_v   (bf16)
        pl.BlockSpec((1, 1, D), per_layer),            # b_v
        pl.BlockSpec((1, D, D), per_layer),            # w_o   (bf16)
        pl.BlockSpec((1, 1, D), per_layer),            # b_o
        pl.BlockSpec((1, D, dff), per_layer),          # w1    (bf16)
        pl.BlockSpec((1, 1, dff), per_layer),          # b1
        pl.BlockSpec((1, dff, D), per_layer),          # w2    (bf16)
        pl.BlockSpec((1, 1, D), per_layer),            # b2
        pl.BlockSpec((1, 2, D), per_layer),            # ln1 (gamma, beta)
        pl.BlockSpec((1, 2, D), per_layer),            # ln2 (gamma, beta)
    ]
    out_specs = pl.BlockSpec((1, L, D), per_batch)

    return pl.pallas_call(
        functools.partial(encoder_kernel, nhead=nh),
        out_shape=jax.ShapeDtypeStruct((B, L, D), src.dtype),
        grid_spec=pltpu.PrefetchScalarGridSpec(
            num_scalar_prefetch=0,
            grid=(B, nl),
            in_specs=in_specs,
            out_specs=out_specs,
            scratch_shapes=[pltpu.VMEM((L, D), jnp.float32)],
        ),
        compiler_params=pltpu.CompilerParams(
            dimension_semantics=("parallel", "arbitrary"),
            vmem_limit_bytes=_estimate_vmem_limit(L, D, dff, src.dtype),
        ),
    )(src, pos_embed,
      params["w_qk"], params["b_qk"], params["w_v"], params["b_v"],
      params["w_o"], params["b_o"], params["w1"], params["b1"],
      params["w2"], params["b2"], params["ln1"], params["ln2"])


# --------------------------------------------------------------------------- #
# Deterministic parameter construction (weights shipped in bf16 for the MXU)
# --------------------------------------------------------------------------- #
def make_encoder_params(key, d_model, nhead, dim_feedforward, num_layers):
    def dense(k, fan_in, shape):
        return jax.random.normal(k, shape, jnp.float32) / np.sqrt(fan_in)

    keys = jax.random.split(key, num_layers)
    cols = {n: [] for n in ("w_qk", "b_qk", "w_v", "b_v", "w_o", "b_o",
                            "w1", "b1", "w2", "b2", "ln1", "ln2")}
    for i in range(num_layers):
        ks = jax.random.split(keys[i], 14)
        cols["w_qk"].append(dense(ks[0], d_model, (d_model, 2 * d_model)))
        cols["b_qk"].append(jax.random.normal(ks[1], (1, 2 * d_model)) * 0.02)
        cols["w_v"].append(dense(ks[2], d_model, (d_model, d_model)))
        cols["b_v"].append(jax.random.normal(ks[3], (1, d_model)) * 0.02)
        cols["w_o"].append(dense(ks[4], d_model, (d_model, d_model)))
        cols["b_o"].append(jax.random.normal(ks[5], (1, d_model)) * 0.02)
        cols["w1"].append(dense(ks[6], d_model, (d_model, dim_feedforward)))
        cols["b1"].append(jax.random.normal(ks[7], (1, dim_feedforward)) * 0.02)
        cols["w2"].append(dense(ks[8], dim_feedforward, (dim_feedforward, d_model)))
        cols["b2"].append(jax.random.normal(ks[9], (1, d_model)) * 0.02)
        cols["ln1"].append(jnp.stack([
            1.0 + 0.1 * jax.random.normal(ks[10], (d_model,)),
            0.1 * jax.random.normal(ks[11], (d_model,))]))
        cols["ln2"].append(jnp.stack([
            1.0 + 0.1 * jax.random.normal(ks[12], (d_model,)),
            0.1 * jax.random.normal(ks[13], (d_model,))]))

    params = {n: jnp.stack(v) for n, v in cols.items()}
    for n in ("w_qk", "w_v", "w_o", "w1", "w2"):
        params[n] = params[n].astype(jnp.bfloat16)
    params["nhead"] = nhead
    params["num_layers"] = num_layers
    return params


# --------------------------------------------------------------------------- #
# Pure-JAX reference (same bf16 matmul operands, f32 accumulation)
# --------------------------------------------------------------------------- #
def transformer_encoder_reference(src, pos_embed, params):
    nh = params["nhead"]
    nl = params["num_layers"]
    B, L, D = src.shape
    hd = D // nh
    scale = 1.0 / float(np.sqrt(hd))

    x = src.astype(jnp.float32)
    pos = pos_embed.astype(jnp.float32)

    for l in range(nl):
        wqk, bqk = params["w_qk"][l], params["b_qk"][l]
        wv, bv = params["w_v"][l], params["b_v"][l]
        wo, bo = params["w_o"][l], params["b_o"][l]
        w1, b1 = params["w1"][l], params["b1"][l]
        w2, b2 = params["w2"][l], params["b2"][l]
        g1, be1 = params["ln1"][l][0], params["ln1"][l][1]
        g2, be2 = params["ln2"][l][0], params["ln2"][l][1]

        qk_in = (x + pos).astype(jnp.bfloat16)
        v_in = x.astype(jnp.bfloat16)
        qk = jnp.einsum("bld,de->ble", qk_in, wqk,
                        preferred_element_type=jnp.float32) + bqk
        v = jnp.einsum("bld,de->ble", v_in, wv,
                       preferred_element_type=jnp.float32) + bv
        q3 = qk[..., :D].reshape(B, L, nh, hd).astype(jnp.bfloat16)
        k3 = qk[..., D:].reshape(B, L, nh, hd).astype(jnp.bfloat16)
        v3 = v.reshape(B, L, nh, hd).astype(jnp.bfloat16)
        s = jnp.einsum("bqhd,bkhd->bhqk", q3, k3,
                       preferred_element_type=jnp.float32) * scale
        p = jax.nn.softmax(s, axis=-1)
        attn = jnp.einsum("bhqk,bkhd->bqhd", p.astype(jnp.bfloat16), v3,
                          preferred_element_type=jnp.float32).reshape(B, L, D)
        attn = jnp.einsum("bld,de->ble", attn.astype(jnp.bfloat16), wo,
                          preferred_element_type=jnp.float32) + bo
        x = _layer_norm(x + attn, g1, be1)

        h1 = jnp.einsum("bld,de->ble", x.astype(jnp.bfloat16), w1,
                        preferred_element_type=jnp.float32) + b1
        h1 = _gelu(h1)
        ff = jnp.einsum("bld,de->ble", h1.astype(jnp.bfloat16), w2,
                        preferred_element_type=jnp.float32) + b2
        x = _layer_norm(x + ff, g2, be2)
    return x


# --------------------------------------------------------------------------- #
if __name__ == "__main__":
    key = jax.random.PRNGKey(0)
    k_x, k_pos, k_p = jax.random.split(key, 3)

    # Small but lane-aligned shapes (D = 128 -> one full lane group; hd = 16).
    B, L, D, NHEAD, DFF, NLAYERS = 2, 64, 128, 8, 256, 2
    src = jax.random.normal(k_x, (B, L, D), jnp.float32)
    pos_embed = jax.random.normal(k_pos, (1, L, D), jnp.float32) * 0.1
    params = make_encoder_params(k_p, D, NHEAD, DFF, NLAYERS)

    out = jax.block_until_ready(transformer_encoder(src, pos_embed, params))
    ref = jax.block_until_ready(transformer_encoder_reference(src, pos_embed, params))

    assert out.shape == (B, L, D)
    np.testing.assert_allclose(np.asarray(out), np.asarray(ref),
                               rtol=2e-2, atol=2e-2)
    print("KERNEL_OK")
</pallas_src>

<mosaic_0001>
module attributes {stable_mosaic.version = 11 : i64} {
  func.func @encoder_kernel(%arg0: i32, %arg1: i32, %arg2: memref<1x64x128xf32, #tpu.memory_space<vmem>>, %arg3: memref<1x64x128xf32, #tpu.memory_space<vmem>>, %arg4: memref<1x128x256xbf16, #tpu.memory_space<vmem>>, %arg5: memref<1x1x256xf32, #tpu.memory_space<vmem>>, %arg6: memref<1x128x128xbf16, #tpu.memory_space<vmem>>, %arg7: memref<1x1x128xf32, #tpu.memory_space<vmem>>, %arg8: memref<1x128x128xbf16, #tpu.memory_space<vmem>>, %arg9: memref<1x1x128xf32, #tpu.memory_space<vmem>>, %arg10: memref<1x128x256xbf16, #tpu.memory_space<vmem>>, %arg11: memref<1x1x256xf32, #tpu.memory_space<vmem>>, %arg12: memref<1x256x128xbf16, #tpu.memory_space<vmem>>, %arg13: memref<1x1x128xf32, #tpu.memory_space<vmem>>, %arg14: memref<1x2x128xf32, #tpu.memory_space<vmem>>, %arg15: memref<1x2x128xf32, #tpu.memory_space<vmem>>, %arg16: memref<1x64x128xf32, #tpu.memory_space<vmem>>, %arg17: memref<64x128xf32, #tpu.memory_space<vmem>>) attributes {dimension_semantics = [#tpu.dimension_semantics<parallel>, #tpu.dimension_semantics<arbitrary>], iteration_bounds = array<i64: 2, 2>, scalar_prefetch = 0 : i64, scratch_operands = 1 : i64, tpu.core_type = #tpu.core_type<tc>, window_params = [{transform_indices = @transform_0, window_bounds = array<i64: 1, 64, 128>}, {pipeline_mode = #tpu.pipeline_mode<synchronous>, transform_indices = @transform_1, window_bounds = array<i64: 1, 64, 128>}, {transform_indices = @transform_2, window_bounds = array<i64: 1, 128, 256>}, {transform_indices = @transform_3, window_bounds = array<i64: 1, 1, 256>}, {transform_indices = @transform_4, window_bounds = array<i64: 1, 128, 128>}, {transform_indices = @transform_5, window_bounds = array<i64: 1, 1, 128>}, {transform_indices = @transform_6, window_bounds = array<i64: 1, 128, 128>}, {transform_indices = @transform_7, window_bounds = array<i64: 1, 1, 128>}, {transform_indices = @transform_8, window_bounds = array<i64: 1, 128, 256>}, {transform_indices = @transform_9, window_bounds = array<i64: 1, 1, 256>}, {transform_indices = @transform_10, window_bounds = array<i64: 1, 256, 128>}, {transform_indices = @transform_11, window_bounds = array<i64: 1, 1, 128>}, {transform_indices = @transform_12, window_bounds = array<i64: 1, 2, 128>}, {transform_indices = @transform_13, window_bounds = array<i64: 1, 2, 128>}, {transform_indices = @transform_14, window_bounds = array<i64: 1, 64, 128>}]} {
    %c0_i32 = arith.constant 0 : i32
    %0 = arith.cmpi eq, %arg1, %c0_i32 : i32
    %1 = arith.extui %0 : i1 to i32
    %c0_i32_0 = arith.constant 0 : i32
    %2 = arith.cmpi ne, %1, %c0_i32_0 : i32
    scf.if %2 {
      %c0_95 = arith.constant 0 : index
      %c0_96 = arith.constant 0 : index
      %c0_97 = arith.constant 0 : index
      %271 = vector.load %arg2[%c0_95, %c0_96, %c0_97] : memref<1x64x128xf32, #tpu.memory_space<vmem>>, vector<1x64x128xf32>
      %272 = vector.shape_cast %271 : vector<1x64x128xf32> to vector<64x128xf32>
      %c0_98 = arith.constant 0 : index
      %c0_99 = arith.constant 0 : index
      %273 = vector.load %arg17[%c0_98, %c0_99] : memref<64x128xf32, #tpu.memory_space<vmem>>, vector<64x128xf32>
      tpu.vector_store %arg17[%c0_98, %c0_99], %272 {strides = array<i32>} : memref<64x128xf32, #tpu.memory_space<vmem>>, vector<64x128xf32>,
    } else {
    }
    %c0 = arith.constant 0 : index
    %c0_1 = arith.constant 0 : index
    %3 = vector.load %arg17[%c0, %c0_1] : memref<64x128xf32, #tpu.memory_space<vmem>>, vector<64x128xf32>
    %c0_2 = arith.constant 0 : index
    %c0_3 = arith.constant 0 : index
    %c0_4 = arith.constant 0 : index
    %4 = vector.load %arg3[%c0_2, %c0_3, %c0_4] : memref<1x64x128xf32, #tpu.memory_space<vmem>>, vector<1x64x128xf32>
    %5 = vector.shape_cast %4 : vector<1x64x128xf32> to vector<64x128xf32>
    %6 = arith.addf %3, %5 : vector<64x128xf32>
    %7 = arith.truncf %6 : vector<64x128xf32> to vector<64x128xbf16>
    %8 = arith.truncf %3 : vector<64x128xf32> to vector<64x128xbf16>
    %c0_5 = arith.constant 0 : index
    %c0_6 = arith.constant 0 : index
    %c0_7 = arith.constant 0 : index
    %9 = vector.load %arg4[%c0_5, %c0_6, %c0_7] : memref<1x128x256xbf16, #tpu.memory_space<vmem>>, vector<1x128x256xbf16>
    %10 = vector.shape_cast %9 : vector<1x128x256xbf16> to vector<128x256xbf16>
    %cst = arith.constant dense<0.000000e+00> : vector<64x256xf32>
    %11 = tpu.matmul %7, %10, %cst {dimension_numbers = #tpu.dot_dimension_numbers<[1], [0], [0], [1], [0, 0, 1, 1], [], []>} : vector<64x128xbf16>, vector<128x256xbf16>, vector<64x256xf32> -> vector<64x256xf32>
    %c0_8 = arith.constant 0 : index
    %c0_9 = arith.constant 0 : index
    %c0_10 = arith.constant 0 : index
    %12 = vector.load %arg5[%c0_8, %c0_9, %c0_10] : memref<1x1x256xf32, #tpu.memory_space<vmem>>, vector<1x1x256xf32>
    %13 = vector.shape_cast %12 : vector<1x1x256xf32> to vector<1x256xf32>
    %14 = vector.broadcast %13 : vector<1x256xf32> to vector<64x256xf32>
    %15 = arith.addf %11, %14 : vector<64x256xf32>
    %c0_11 = arith.constant 0 : index
    %c0_12 = arith.constant 0 : index
    %c0_13 = arith.constant 0 : index
    %16 = vector.load %arg6[%c0_11, %c0_12, %c0_13] : memref<1x128x128xbf16, #tpu.memory_space<vmem>>, vector<1x128x128xbf16>
    %17 = vector.shape_cast %16 : vector<1x128x128xbf16> to vector<128x128xbf16>
    %cst_14 = arith.constant dense<0.000000e+00> : vector<64x128xf32>
    %18 = tpu.matmul %8, %17, %cst_14 {dimension_numbers = #tpu.dot_dimension_numbers<[1], [0], [0], [1], [0, 0, 1, 1], [], []>} : vector<64x128xbf16>, vector<128x128xbf16>, vector<64x128xf32> -> vector<64x128xf32>
    %c0_15 = arith.constant 0 : index
    %c0_16 = arith.constant 0 : index
    %c0_17 = arith.constant 0 : index
    %19 = vector.load %arg7[%c0_15, %c0_16, %c0_17] : memref<1x1x128xf32, #tpu.memory_space<vmem>>, vector<1x1x128xf32>
    %20 = vector.shape_cast %19 : vector<1x1x128xf32> to vector<1x128xf32>
    %21 = vector.broadcast %20 : vector<1x128xf32> to vector<64x128xf32>
    %22 = arith.addf %18, %21 : vector<64x128xf32>
    %23 = vector.extract_strided_slice %15 {offsets = [0, 0], sizes = [64, 128], strides = [1, 1]} : vector<64x256xf32> to vector<64x128xf32>
    %cst_18 = arith.constant 2.500000e-01 : f32
    %24 = vector.broadcast %cst_18 : f32 to vector<64x128xf32>
    %25 = arith.mulf %23, %24 : vector<64x128xf32>
    %26 = vector.extract_strided_slice %15 {offsets = [0, 128], sizes = [64, 128], strides = [1, 1]} : vector<64x256xf32> to vector<64x128xf32>
    %27 = vector.extract_strided_slice %25 {offsets = [0, 0], sizes = [64, 16], strides = [1, 1]} : vector<64x128xf32> to vector<64x16xf32>
    %28 = arith.truncf %27 : vector<64x16xf32> to vector<64x16xbf16>
    %29 = vector.extract_strided_slice %26 {offsets = [0, 0], sizes = [64, 16], strides = [1, 1]} : vector<64x128xf32> to vector<64x16xf32>
    %30 = arith.truncf %29 : vector<64x16xf32> to vector<64x16xbf16>
    %31 = vector.extract_strided_slice %22 {offsets = [0, 0], sizes = [64, 16], strides = [1, 1]} : vector<64x128xf32> to vector<64x16xf32>
    %32 = arith.truncf %31 : vector<64x16xf32> to vector<64x16xbf16>
    %cst_19 = arith.constant dense<0.000000e+00> : vector<64x64xf32>
    %33 = tpu.matmul %28, %30, %cst_19 {dimension_numbers = #tpu.dot_dimension_numbers<[1], [1], [0], [0], [0, 0, 1, 0], [], []>} : vector<64x16xbf16>, vector<64x16xbf16>, vector<64x64xf32> -> vector<64x64xf32>
    %cst_20 = arith.constant dense<0xFF800000> : vector<64xf32>
    %34 = vector.multi_reduction <maximumf>, %33, %cst_20 [1] : vector<64x64xf32> to vector<64xf32>
    %35 = vector.shape_cast %34 : vector<64xf32> to vector<64x1xf32>
    %36 = vector.broadcast %35 : vector<64x1xf32> to vector<64x64xf32>
    %37 = arith.subf %33, %36 : vector<64x64xf32>
    %38 = math.exp %37 : vector<64x64xf32>
    %cst_21 = arith.constant dense<0.000000e+00> : vector<64xf32>
    %39 = vector.multi_reduction <add>, %38, %cst_21 [1] : vector<64x64xf32> to vector<64xf32>
    %40 = vector.shape_cast %39 : vector<64xf32> to vector<64x1xf32>
    %41 = tpu.reciprocal %40 {approx = true} : vector<64x1xf32> -> vector<64x1xf32>
    %42 = vector.broadcast %41 : vector<64x1xf32> to vector<64x64xf32>
    %43 = arith.mulf %38, %42 : vector<64x64xf32>
    %44 = arith.truncf %43 : vector<64x64xf32> to vector<64x64xbf16>
    %cst_22 = arith.constant dense<0.000000e+00> : vector<64x16xf32>
    %45 = tpu.matmul %44, %32, %cst_22 {dimension_numbers = #tpu.dot_dimension_numbers<[1], [0], [0], [1], [0, 0, 1, 1], [], []>} : vector<64x64xbf16>, vector<64x16xbf16>, vector<64x16xf32> -> vector<64x16xf32>
    %46 = vector.extract_strided_slice %25 {offsets = [0, 16], sizes = [64, 16], strides = [1, 1]} : vector<64x128xf32> to vector<64x16xf32>
    %47 = arith.truncf %46 : vector<64x16xf32> to vector<64x16xbf16>
    %48 = vector.extract_strided_slice %26 {offsets = [0, 16], sizes = [64, 16], strides = [1, 1]} : vector<64x128xf32> to vector<64x16xf32>
    %49 = arith.truncf %48 : vector<64x16xf32> to vector<64x16xbf16>
    %50 = vector.extract_strided_slice %22 {offsets = [0, 16], sizes = [64, 16], strides = [1, 1]} : vector<64x128xf32> to vector<64x16xf32>
    %51 = arith.truncf %50 : vector<64x16xf32> to vector<64x16xbf16>
    %cst_23 = arith.constant dense<0.000000e+00> : vector<64x64xf32>
    %52 = tpu.matmul %47, %49, %cst_23 {dimension_numbers = #tpu.dot_dimension_numbers<[1], [1], [0], [0], [0, 0, 1, 0], [], []>} : vector<64x16xbf16>, vector<64x16xbf16>, vector<64x64xf32> -> vector<64x64xf32>
    %cst_24 = arith.constant dense<0xFF800000> : vector<64xf32>
    %53 = vector.multi_reduction <maximumf>, %52, %cst_24 [1] : vector<64x64xf32> to vector<64xf32>
    %54 = vector.shape_cast %53 : vector<64xf32> to vector<64x1xf32>
    %55 = vector.broadcast %54 : vector<64x1xf32> to vector<64x64xf32>
    %56 = arith.subf %52, %55 : vector<64x64xf32>
    %57 = math.exp %56 : vector<64x64xf32>
    %cst_25 = arith.constant dense<0.000000e+00> : vector<64xf32>
    %58 = vector.multi_reduction <add>, %57, %cst_25 [1] : vector<64x64xf32> to vector<64xf32>
    %59 = vector.shape_cast %58 : vector<64xf32> to vector<64x1xf32>
    %60 = tpu.reciprocal %59 {approx = true} : vector<64x1xf32> -> vector<64x1xf32>
    %61 = vector.broadcast %60 : vector<64x1xf32> to vector<64x64xf32>
    %62 = arith.mulf %57, %61 : vector<64x64xf32>
    %63 = arith.truncf %62 : vector<64x64xf32> to vector<64x64xbf16>
    %cst_26 = arith.constant dense<0.000000e+00> : vector<64x16xf32>
    %64 = tpu.matmul %63, %51, %cst_26 {dimension_numbers = #tpu.dot_dimension_numbers<[1], [0], [0], [1], [0, 0, 1, 1], [], []>} : vector<64x64xbf16>, vector<64x16xbf16>, vector<64x16xf32> -> vector<64x16xf32>
    %65 = vector.extract_strided_slice %25 {offsets = [0, 32], sizes = [64, 16], strides = [1, 1]} : vector<64x128xf32> to vector<64x16xf32>
    %66 = arith.truncf %65 : vector<64x16xf32> to vector<64x16xbf16>
    %67 = vector.extract_strided_slice %26 {offsets = [0, 32], sizes = [64, 16], strides = [1, 1]} : vector<64x128xf32> to vector<64x16xf32>
    %68 = arith.truncf %67 : vector<64x16xf32> to vector<64x16xbf16>
    %69 = vector.extract_strided_slice %22 {offsets = [0, 32], sizes = [64, 16], strides = [1, 1]} : vector<64x128xf32> to vector<64x16xf32>
    %70 = arith.truncf %69 : vector<64x16xf32> to vector<64x16xbf16>
    %cst_27 = arith.constant dense<0.000000e+00> : vector<64x64xf32>
    %71 = tpu.matmul %66, %68, %cst_27 {dimension_numbers = #tpu.dot_dimension_numbers<[1], [1], [0], [0], [0, 0, 1, 0], [], []>} : vector<64x16xbf16>, vector<64x16xbf16>, vector<64x64xf32> -> vector<64x64xf32>
    %cst_28 = arith.constant dense<0xFF800000> : vector<64xf32>
    %72 = vector.multi_reduction <maximumf>, %71, %cst_28 [1] : vector<64x64xf32> to vector<64xf32>
    %73 = vector.shape_cast %72 : vector<64xf32> to vector<64x1xf32>
    %74 = vector.broadcast %73 : vector<64x1xf32> to vector<64x64xf32>
    %75 = arith.subf %71, %74 : vector<64x64xf32>
    %76 = math.exp %75 : vector<64x64xf32>
    %cst_29 = arith.constant dense<0.000000e+00> : vector<64xf32>
    %77 = vector.multi_reduction <add>, %76, %cst_29 [1] : vector<64x64xf32> to vector<64xf32>
    %78 = vector.shape_cast %77 : vector<64xf32> to vector<64x1xf32>
    %79 = tpu.reciprocal %78 {approx = true} : vector<64x1xf32> -> vector<64x1xf32>
    %80 = vector.broadcast %79 : vector<64x1xf32> to vector<64x64xf32>
    %81 = arith.mulf %76, %80 : vector<64x64xf32>
    %82 = arith.truncf %81 : vector<64x64xf32> to vector<64x64xbf16>
    %cst_30 = arith.constant dense<0.000000e+00> : vector<64x16xf32>
    %83 = tpu.matmul %82, %70, %cst_30 {dimension_numbers = #tpu.dot_dimension_numbers<[1], [0], [0], [1], [0, 0, 1, 1], [], []>} : vector<64x64xbf16>, vector<64x16xbf16>, vector<64x16xf32> -> vector<64x16xf32>
    %84 = vector.extract_strided_slice %25 {offsets = [0, 48], sizes = [64, 16], strides = [1, 1]} : vector<64x128xf32> to vector<64x16xf32>
    %85 = arith.truncf %84 : vector<64x16xf32> to vector<64x16xbf16>
    %86 = vector.extract_strided_slice %26 {offsets = [0, 48], sizes = [64, 16], strides = [1, 1]} : vector<64x128xf32> to vector<64x16xf32>
    %87 = arith.truncf %86 : vector<64x16xf32> to vector<64x16xbf16>
    %88 = vector.extract_strided_slice %22 {offsets = [0, 48], sizes = [64, 16], strides = [1, 1]} : vector<64x128xf32> to vector<64x16xf32>
    %89 = arith.truncf %88 : vector<64x16xf32> to vector<64x16xbf16>
    %cst_31 = arith.constant dense<0.000000e+00> : vector<64x64xf32>
    %90 = tpu.matmul %85, %87, %cst_31 {dimension_numbers = #tpu.dot_dimension_numbers<[1], [1], [0], [0], [0, 0, 1, 0], [], []>} : vector<64x16xbf16>, vector<64x16xbf16>, vector<64x64xf32> -> vector<64x64xf32>
    %cst_32 = arith.constant dense<0xFF800000> : vector<64xf32>
    %91 = vector.multi_reduction <maximumf>, %90, %cst_32 [1] : vector<64x64xf32> to vector<64xf32>
    %92 = vector.shape_cast %91 : vector<64xf32> to vector<64x1xf32>
    %93 = vector.broadcast %92 : vector<64x1xf32> to vector<64x64xf32>
    %94 = arith.subf %90, %93 : vector<64x64xf32>
    %95 = math.exp %94 : vector<64x64xf32>
    %cst_33 = arith.constant dense<0.000000e+00> : vector<64xf32>
    %96 = vector.multi_reduction <add>, %95, %cst_33 [1] : vector<64x64xf32> to vector<64xf32>
    %97 = vector.shape_cast %96 : vector<64xf32> to vector<64x1xf32>
    %98 = tpu.reciprocal %97 {approx = true} : vector<64x1xf32> -> vector<64x1xf32>
    %99 = vector.broadcast %98 : vector<64x1xf32> to vector<64x64xf32>
    %100 = arith.mulf %95, %99 : vector<64x64xf32>
    %101 = arith.truncf %100 : vector<64x64xf32> to vector<64x64xbf16>
    %cst_34 = arith.constant dense<0.000000e+00> : vector<64x16xf32>
    %102 = tpu.matmul %101, %89, %cst_34 {dimension_numbers = #tpu.dot_dimension_numbers<[1], [0], [0], [1], [0, 0, 1, 1], [], []>} : vector<64x64xbf16>, vector<64x16xbf16>, vector<64x16xf32> -> vector<64x16xf32>
    %103 = vector.extract_strided_slice %25 {offsets = [0, 64], sizes = [64, 16], strides = [1, 1]} : vector<64x128xf32> to vector<64x16xf32>
    %104 = arith.truncf %103 : vector<64x16xf32> to vector<64x16xbf16>
    %105 = vector.extract_strided_slice %26 {offsets = [0, 64], sizes = [64, 16], strides = [1, 1]} : vector<64x128xf32> to vector<64x16xf32>
    %106 = arith.truncf %105 : vector<64x16xf32> to vector<64x16xbf16>
    %107 = vector.extract_strided_slice %22 {offsets = [0, 64], sizes = [64, 16], strides = [1, 1]} : vector<64x128xf32> to vector<64x16xf32>
    %108 = arith.truncf %107 : vector<64x16xf32> to vector<64x16xbf16>
    %cst_35 = arith.constant dense<0.000000e+00> : vector<64x64xf32>
    %109 = tpu.matmul %104, %106, %cst_35 {dimension_numbers = #tpu.dot_dimension_numbers<[1], [1], [0], [0], [0, 0, 1, 0], [], []>} : vector<64x16xbf16>, vector<64x16xbf16>, vector<64x64xf32> -> vector<64x64xf32>
    %cst_36 = arith.constant dense<0xFF800000> : vector<64xf32>
    %110 = vector.multi_reduction <maximumf>, %109, %cst_36 [1] : vector<64x64xf32> to vector<64xf32>
    %111 = vector.shape_cast %110 : vector<64xf32> to vector<64x1xf32>
    %112 = vector.broadcast %111 : vector<64x1xf32> to vector<64x64xf32>
    %113 = arith.subf %109, %112 : vector<64x64xf32>
    %114 = math.exp %113 : vector<64x64xf32>
    %cst_37 = arith.constant dense<0.000000e+00> : vector<64xf32>
    %115 = vector.multi_reduction <add>, %114, %cst_37 [1] : vector<64x64xf32> to vector<64xf32>
    %116 = vector.shape_cast %115 : vector<64xf32> to vector<64x1xf32>
    %117 = tpu.reciprocal %116 {approx = true} : vector<64x1xf32> -> vector<64x1xf32>
    %118 = vector.broadcast %117 : vector<64x1xf32> to vector<64x64xf32>
    %119 = arith.mulf %114, %118 : vector<64x64xf32>
    %120 = arith.truncf %119 : vector<64x64xf32> to vector<64x64xbf16>
    %cst_38 = arith.constant dense<0.000000e+00> : vector<64x16xf32>
    %121 = tpu.matmul %120, %108, %cst_38 {dimension_numbers = #tpu.dot_dimension_numbers<[1], [0], [0], [1], [0, 0, 1, 1], [], []>} : vector<64x64xbf16>, vector<64x16xbf16>, vector<64x16xf32> -> vector<64x16xf32>
    %122 = vector.extract_strided_slice %25 {offsets = [0, 80], sizes = [64, 16], strides = [1, 1]} : vector<64x128xf32> to vector<64x16xf32>
    %123 = arith.truncf %122 : vector<64x16xf32> to vector<64x16xbf16>
    %124 = vector.extract_strided_slice %26 {offsets = [0, 80], sizes = [64, 16], strides = [1, 1]} : vector<64x128xf32> to vector<64x16xf32>
    %125 = arith.truncf %124 : vector<64x16xf32> to vector<64x16xbf16>
    %126 = vector.extract_strided_slice %22 {offsets = [0, 80], sizes = [64, 16], strides = [1, 1]} : vector<64x128xf32> to vector<64x16xf32>
    %127 = arith.truncf %126 : vector<64x16xf32> to vector<64x16xbf16>
    %cst_39 = arith.constant dense<0.000000e+00> : vector<64x64xf32>
    %128 = tpu.matmul %123, %125, %cst_39 {dimension_numbers = #tpu.dot_dimension_numbers<[1], [1], [0], [0], [0, 0, 1, 0], [], []>} : vector<64x16xbf16>, vector<64x16xbf16>, vector<64x64xf32> -> vector<64x64xf32>
    %cst_40 = arith.constant dense<0xFF800000> : vector<64xf32>
    %129 = vector.multi_reduction <maximumf>, %128, %cst_40 [1] : vector<64x64xf32> to vector<64xf32>
    %130 = vector.shape_cast %129 : vector<64xf32> to vector<64x1xf32>
    %131 = vector.broadcast %130 : vector<64x1xf32> to vector<64x64xf32>
    %132 = arith.subf %128, %131 : vector<64x64xf32>
    %133 = math.exp %132 : vector<64x64xf32>
    %cst_41 = arith.constant dense<0.000000e+00> : vector<64xf32>
    %134 = vector.multi_reduction <add>, %133, %cst_41 [1] : vector<64x64xf32> to vector<64xf32>
    %135 = vector.shape_cast %134 : vector<64xf32> to vector<64x1xf32>
    %136 = tpu.reciprocal %135 {approx = true} : vector<64x1xf32> -> vector<64x1xf32>
    %137 = vector.broadcast %136 : vector<64x1xf32> to vector<64x64xf32>
    %138 = arith.mulf %133, %137 : vector<64x64xf32>
    %139 = arith.truncf %138 : vector<64x64xf32> to vector<64x64xbf16>
    %cst_42 = arith.constant dense<0.000000e+00> : vector<64x16xf32>
    %140 = tpu.matmul %139, %127, %cst_42 {dimension_numbers = #tpu.dot_dimension_numbers<[1], [0], [0], [1], [0, 0, 1, 1], [], []>} : vector<64x64xbf16>, vector<64x16xbf16>, vector<64x16xf32> -> vector<64x16xf32>
    %141 = vector.extract_strided_slice %25 {offsets = [0, 96], sizes = [64, 16], strides = [1, 1]} : vector<64x128xf32> to vector<64x16xf32>
    %142 = arith.truncf %141 : vector<64x16xf32> to vector<64x16xbf16>
    %143 = vector.extract_strided_slice %26 {offsets = [0, 96], sizes = [64, 16], strides = [1, 1]} : vector<64x128xf32> to vector<64x16xf32>
    %144 = arith.truncf %143 : vector<64x16xf32> to vector<64x16xbf16>
    %145 = vector.extract_strided_slice %22 {offsets = [0, 96], sizes = [64, 16], strides = [1, 1]} : vector<64x128xf32> to vector<64x16xf32>
    %146 = arith.truncf %145 : vector<64x16xf32> to vector<64x16xbf16>
    %cst_43 = arith.constant dense<0.000000e+00> : vector<64x64xf32>
    %147 = tpu.matmul %142, %144, %cst_43 {dimension_numbers = #tpu.dot_dimension_numbers<[1], [1], [0], [0], [0, 0, 1, 0], [], []>} : vector<64x16xbf16>, vector<64x16xbf16>, vector<64x64xf32> -> vector<64x64xf32>
    %cst_44 = arith.constant dense<0xFF800000> : vector<64xf32>
    %148 = vector.multi_reduction <maximumf>, %147, %cst_44 [1] : vector<64x64xf32> to vector<64xf32>
    %149 = vector.shape_cast %148 : vector<64xf32> to vector<64x1xf32>
    %150 = vector.broadcast %149 : vector<64x1xf32> to vector<64x64xf32>
    %151 = arith.subf %147, %150 : vector<64x64xf32>
    %152 = math.exp %151 : vector<64x64xf32>
    %cst_45 = arith.constant dense<0.000000e+00> : vector<64xf32>
    %153 = vector.multi_reduction <add>, %152, %cst_45 [1] : vector<64x64xf32> to vector<64xf32>
    %154 = vector.shape_cast %153 : vector<64xf32> to vector<64x1xf32>
    %155 = tpu.reciprocal %154 {approx = true} : vector<64x1xf32> -> vector<64x1xf32>
    %156 = vector.broadcast %155 : vector<64x1xf32> to vector<64x64xf32>
    %157 = arith.mulf %152, %156 : vector<64x64xf32>
    %158 = arith.truncf %157 : vector<64x64xf32> to vector<64x64xbf16>
    %cst_46 = arith.constant dense<0.000000e+00> : vector<64x16xf32>
    %159 = tpu.matmul %158, %146, %cst_46 {dimension_numbers = #tpu.dot_dimension_numbers<[1], [0], [0], [1], [0, 0, 1, 1], [], []>} : vector<64x64xbf16>, vector<64x16xbf16>, vector<64x16xf32> -> vector<64x16xf32>
    %160 = vector.extract_strided_slice %25 {offsets = [0, 112], sizes = [64, 16], strides = [1, 1]} : vector<64x128xf32> to vector<64x16xf32>
    %161 = arith.truncf %160 : vector<64x16xf32> to vector<64x16xbf16>
    %162 = vector.extract_strided_slice %26 {offsets = [0, 112], sizes = [64, 16], strides = [1, 1]} : vector<64x128xf32> to vector<64x16xf32>
    %163 = arith.truncf %162 : vector<64x16xf32> to vector<64x16xbf16>
    %164 = vector.extract_strided_slice %22 {offsets = [0, 112], sizes = [64, 16], strides = [1, 1]} : vector<64x128xf32> to vector<64x16xf32>
    %165 = arith.truncf %164 : vector<64x16xf32> to vector<64x16xbf16>
    %cst_47 = arith.constant dense<0.000000e+00> : vector<64x64xf32>
    %166 = tpu.matmul %161, %163, %cst_47 {dimension_numbers = #tpu.dot_dimension_numbers<[1], [1], [0], [0], [0, 0, 1, 0], [], []>} : vector<64x16xbf16>, vector<64x16xbf16>, vector<64x64xf32> -> vector<64x64xf32>
    %cst_48 = arith.constant dense<0xFF800000> : vector<64xf32>
    %167 = vector.multi_reduction <maximumf>, %166, %cst_48 [1] : vector<64x64xf32> to vector<64xf32>
    %168 = vector.shape_cast %167 : vector<64xf32> to vector<64x1xf32>
    %169 = vector.broadcast %168 : vector<64x1xf32> to vector<64x64xf32>
    %170 = arith.subf %166, %169 : vector<64x64xf32>
    %171 = math.exp %170 : vector<64x64xf32>
    %cst_49 = arith.constant dense<0.000000e+00> : vector<64xf32>
    %172 = vector.multi_reduction <add>, %171, %cst_49 [1] : vector<64x64xf32> to vector<64xf32>
    %173 = vector.shape_cast %172 : vector<64xf32> to vector<64x1xf32>
    %174 = tpu.reciprocal %173 {approx = true} : vector<64x1xf32> -> vector<64x1xf32>
    %175 = vector.broadcast %174 : vector<64x1xf32> to vector<64x64xf32>
    %176 = arith.mulf %171, %175 : vector<64x64xf32>
    %177 = arith.truncf %176 : vector<64x64xf32> to vector<64x64xbf16>
    %cst_50 = arith.constant dense<0.000000e+00> : vector<64x16xf32>
    %178 = tpu.matmul %177, %165, %cst_50 {dimension_numbers = #tpu.dot_dimension_numbers<[1], [0], [0], [1], [0, 0, 1, 1], [], []>} : vector<64x64xbf16>, vector<64x16xbf16>, vector<64x16xf32> -> vector<64x16xf32>
    %179 = tpu.concatenate %45, %64, %83, %102, %121, %140, %159, %178 in 1 : vector<64x16xf32>, vector<64x16xf32>, vector<64x16xf32>, vector<64x16xf32>, vector<64x16xf32>, vector<64x16xf32>, vector<64x16xf32>, vector<64x16xf32> -> vector<64x128xf32>
    %180 = arith.truncf %179 : vector<64x128xf32> to vector<64x128xbf16>
    %c0_51 = arith.constant 0 : index
    %c0_52 = arith.constant 0 : index
    %c0_53 = arith.constant 0 : index
    %181 = vector.load %arg8[%c0_51, %c0_52, %c0_53] : memref<1x128x128xbf16, #tpu.memory_space<vmem>>, vector<1x128x128xbf16>
    %182 = vector.shape_cast %181 : vector<1x128x128xbf16> to vector<128x128xbf16>
    %cst_54 = arith.constant dense<0.000000e+00> : vector<64x128xf32>
    %183 = tpu.matmul %180, %182, %cst_54 {dimension_numbers = #tpu.dot_dimension_numbers<[1], [0], [0], [1], [0, 0, 1, 1], [], []>} : vector<64x128xbf16>, vector<128x128xbf16>, vector<64x128xf32> -> vector<64x128xf32>
    %c0_55 = arith.constant 0 : index
    %c0_56 = arith.constant 0 : index
    %c0_57 = arith.constant 0 : index
    %184 = vector.load %arg9[%c0_55, %c0_56, %c0_57] : memref<1x1x128xf32, #tpu.memory_space<vmem>>, vector<1x1x128xf32>
    %185 = vector.shape_cast %184 : vector<1x1x128xf32> to vector<1x128xf32>
    %186 = vector.broadcast %185 : vector<1x128xf32> to vector<64x128xf32>
    %187 = arith.addf %183, %186 : vector<64x128xf32>
    %c0_58 = arith.constant 0 : index
    %c0_59 = arith.constant 0 : index
    %c0_60 = arith.constant 0 : index
    %188 = vector.load %arg14[%c0_58, %c0_59, %c0_60] : memref<1x2x128xf32, #tpu.memory_space<vmem>>, vector<1x2x128xf32>
    %189 = vector.shape_cast %188 : vector<1x2x128xf32> to vector<2x128xf32>
    %190 = arith.addf %3, %187 : vector<64x128xf32>
    %191 = vector.extract_strided_slice %189 {offsets = [0, 0], sizes = [1, 128], strides = [1, 1]} : vector<2x128xf32> to vector<1x128xf32>
    %192 = vector.extract_strided_slice %189 {offsets = [1, 0], sizes = [1, 128], strides = [1, 1]} : vector<2x128xf32> to vector<1x128xf32>
    %cst_61 = arith.constant dense<0.000000e+00> : vector<64xf32>
    %193 = vector.multi_reduction <add>, %190, %cst_61 [1] : vector<64x128xf32> to vector<64xf32>
    %194 = vector.shape_cast %193 : vector<64xf32> to vector<64x1xf32>
    %cst_62 = arith.constant 1.280000e+02 : f32
    %195 = vector.broadcast %cst_62 : f32 to vector<64x1xf32>
    %196 = arith.divf %194, %195 : vector<64x1xf32>
    %197 = vector.broadcast %196 : vector<64x1xf32> to vector<64x128xf32>
    %198 = arith.subf %190, %197 : vector<64x128xf32>
    %199 = arith.mulf %198, %198 : vector<64x128xf32>
    %cst_63 = arith.constant dense<0.000000e+00> : vector<64xf32>
    %200 = vector.multi_reduction <add>, %199, %cst_63 [1] : vector<64x128xf32> to vector<64xf32>
    %201 = vector.shape_cast %200 : vector<64xf32> to vector<64x1xf32>
    %cst_64 = arith.constant 1.280000e+02 : f32
    %202 = vector.broadcast %cst_64 : f32 to vector<64x1xf32>
    %203 = arith.divf %201, %202 : vector<64x1xf32>
    %cst_65 = arith.constant 9.99999974E-6 : f32
    %204 = vector.broadcast %cst_65 : f32 to vector<64x1xf32>
    %205 = arith.addf %203, %204 : vector<64x1xf32>
    %206 = math.rsqrt %205 : vector<64x1xf32>
    %207 = vector.broadcast %206 : vector<64x1xf32> to vector<64x128xf32>
    %208 = arith.mulf %198, %207 : vector<64x128xf32>
    %209 = vector.broadcast %191 : vector<1x128xf32> to vector<64x128xf32>
    %210 = arith.mulf %208, %209 : vector<64x128xf32>
    %211 = vector.broadcast %192 : vector<1x128xf32> to vector<64x128xf32>
    %212 = arith.addf %210, %211 : vector<64x128xf32>
    %213 = arith.truncf %212 : vector<64x128xf32> to vector<64x128xbf16>
    %c0_66 = arith.constant 0 : index
    %c0_67 = arith.constant 0 : index
    %c0_68 = arith.constant 0 : index
    %214 = vector.load %arg10[%c0_66, %c0_67, %c0_68] : memref<1x128x256xbf16, #tpu.memory_space<vmem>>, vector<1x128x256xbf16>
    %215 = vector.shape_cast %214 : vector<1x128x256xbf16> to vector<128x256xbf16>
    %cst_69 = arith.constant dense<0.000000e+00> : vector<64x256xf32>
    %216 = tpu.matmul %213, %215, %cst_69 {dimension_numbers = #tpu.dot_dimension_numbers<[1], [0], [0], [1], [0, 0, 1, 1], [], []>} : vector<64x128xbf16>, vector<128x256xbf16>, vector<64x256xf32> -> vector<64x256xf32>
    %c0_70 = arith.constant 0 : index
    %c0_71 = arith.constant 0 : index
    %c0_72 = arith.constant 0 : index
    %217 = vector.load %arg11[%c0_70, %c0_71, %c0_72] : memref<1x1x256xf32, #tpu.memory_space<vmem>>, vector<1x1x256xf32>
    %218 = vector.shape_cast %217 : vector<1x1x256xf32> to vector<1x256xf32>
    %219 = vector.broadcast %218 : vector<1x256xf32> to vector<64x256xf32>
    %220 = arith.addf %216, %219 : vector<64x256xf32>
    %cst_73 = arith.constant 5.000000e-01 : f32
    %221 = vector.broadcast %cst_73 : f32 to vector<64x256xf32>
    %222 = arith.mulf %221, %220 : vector<64x256xf32>
    %cst_74 = arith.constant 4.471500e-02 : f32
    %223 = vector.broadcast %cst_74 : f32 to vector<64x256xf32>
    %224 = arith.mulf %223, %220 : vector<64x256xf32>
    %225 = arith.mulf %224, %220 : vector<64x256xf32>
    %226 = arith.mulf %225, %220 : vector<64x256xf32>
    %227 = arith.addf %220, %226 : vector<64x256xf32>
    %cst_75 = arith.constant 0.797884583 : f32
    %228 = vector.broadcast %cst_75 : f32 to vector<64x256xf32>
    %229 = arith.mulf %228, %227 : vector<64x256xf32>
    %230 = math.tanh %229 : vector<64x256xf32>
    %cst_76 = arith.constant 1.000000e+00 : f32
    %231 = vector.broadcast %cst_76 : f32 to vector<64x256xf32>
    %232 = arith.addf %231, %230 : vector<64x256xf32>
    %233 = arith.mulf %222, %232 : vector<64x256xf32>
    %234 = arith.truncf %233 : vector<64x256xf32> to vector<64x256xbf16>
    %c0_77 = arith.constant 0 : index
    %c0_78 = arith.constant 0 : index
    %c0_79 = arith.constant 0 : index
    %235 = vector.load %arg12[%c0_77, %c0_78, %c0_79] : memref<1x256x128xbf16, #tpu.memory_space<vmem>>, vector<1x256x128xbf16>
    %236 = vector.shape_cast %235 : vector<1x256x128xbf16> to vector<256x128xbf16>
    %cst_80 = arith.constant dense<0.000000e+00> : vector<64x128xf32>
    %237 = tpu.matmul %234, %236, %cst_80 {dimension_numbers = #tpu.dot_dimension_numbers<[1], [0], [0], [1], [0, 0, 1, 1], [], []>} : vector<64x256xbf16>, vector<256x128xbf16>, vector<64x128xf32> -> vector<64x128xf32>
    %c0_81 = arith.constant 0 : index
    %c0_82 = arith.constant 0 : index
    %c0_83 = arith.constant 0 : index
    %238 = vector.load %arg13[%c0_81, %c0_82, %c0_83] : memref<1x1x128xf32, #tpu.memory_space<vmem>>, vector<1x1x128xf32>
    %239 = vector.shape_cast %238 : vector<1x1x128xf32> to vector<1x128xf32>
    %240 = vector.broadcast %239 : vector<1x128xf32> to vector<64x128xf32>
    %241 = arith.addf %237, %240 : vector<64x128xf32>
    %c0_84 = arith.constant 0 : index
    %c0_85 = arith.constant 0 : index
    %c0_86 = arith.constant 0 : index
    %242 = vector.load %arg15[%c0_84, %c0_85, %c0_86] : memref<1x2x128xf32, #tpu.memory_space<vmem>>, vector<1x2x128xf32>
    %243 = vector.shape_cast %242 : vector<1x2x128xf32> to vector<2x128xf32>
    %244 = arith.addf %212, %241 : vector<64x128xf32>
    %245 = vector.extract_strided_slice %243 {offsets = [0, 0], sizes = [1, 128], strides = [1, 1]} : vector<2x128xf32> to vector<1x128xf32>
    %246 = vector.extract_strided_slice %243 {offsets = [1, 0], sizes = [1, 128], strides = [1, 1]} : vector<2x128xf32> to vector<1x128xf32>
    %cst_87 = arith.constant dense<0.000000e+00> : vector<64xf32>
    %247 = vector.multi_reduction <add>, %244, %cst_87 [1] : vector<64x128xf32> to vector<64xf32>
    %248 = vector.shape_cast %247 : vector<64xf32> to vector<64x1xf32>
    %cst_88 = arith.constant 1.280000e+02 : f32
    %249 = vector.broadcast %cst_88 : f32 to vector<64x1xf32>
    %250 = arith.divf %248, %249 : vector<64x1xf32>
    %251 = vector.broadcast %250 : vector<64x1xf32> to vector<64x128xf32>
    %252 = arith.subf %244, %251 : vector<64x128xf32>
    %253 = arith.mulf %252, %252 : vector<64x128xf32>
    %cst_89 = arith.constant dense<0.000000e+00> : vector<64xf32>
    %254 = vector.multi_reduction <add>, %253, %cst_89 [1] : vector<64x128xf32> to vector<64xf32>
    %255 = vector.shape_cast %254 : vector<64xf32> to vector<64x1xf32>
    %cst_90 = arith.constant 1.280000e+02 : f32
    %256 = vector.broadcast %cst_90 : f32 to vector<64x1xf32>
    %257 = arith.divf %255, %256 : vector<64x1xf32>
    %cst_91 = arith.constant 9.99999974E-6 : f32
    %258 = vector.broadcast %cst_91 : f32 to vector<64x1xf32>
    %259 = arith.addf %257, %258 : vector<64x1xf32>
    %260 = math.rsqrt %259 : vector<64x1xf32>
    %261 = vector.broadcast %260 : vector<64x1xf32> to vector<64x128xf32>
    %262 = arith.mulf %252, %261 : vector<64x128xf32>
    %263 = vector.broadcast %245 : vector<1x128xf32> to vector<64x128xf32>
    %264 = arith.mulf %262, %263 : vector<64x128xf32>
    %265 = vector.broadcast %246 : vector<1x128xf32> to vector<64x128xf32>
    %266 = arith.addf %264, %265 : vector<64x128xf32>
    %c0_92 = arith.constant 0 : index
    %c0_93 = arith.constant 0 : index
    %267 = vector.load %arg17[%c0_92, %c0_93] : memref<64x128xf32, #tpu.memory_space<vmem>>, vector<64x128xf32>
    tpu.vector_store %arg17[%c0_92, %c0_93], %266 {strides = array<i32>} : memref<64x128xf32, #tpu.memory_space<vmem>>, vector<64x128xf32>,
    %c1_i32 = arith.constant 1 : i32
    %268 = arith.cmpi eq, %arg1, %c1_i32 : i32
    %269 = arith.extui %268 : i1 to i32
    %c0_i32_94 = arith.constant 0 : i32
    %270 = arith.cmpi ne, %269, %c0_i32_94 : i32
    scf.if %270 {
      %c0_95 = arith.constant 0 : index
      %c0_96 = arith.constant 0 : index
      %c0_97 = arith.constant 0 : index
      %271 = vector.load %arg16[%c0_95, %c0_96, %c0_97] : memref<1x64x128xf32, #tpu.memory_space<vmem>>, vector<1x64x128xf32>
      %272 = vector.shape_cast %271 : vector<1x64x128xf32> to vector<64x128xf32>
      %273 = vector.shape_cast %266 : vector<64x128xf32> to vector<1x64x128xf32>
      tpu.vector_store %arg16[%c0_95, %c0_96, %c0_97], %273 {strides = array<i32>} : memref<1x64x128xf32, #tpu.memory_space<vmem>>, vector<1x64x128xf32>,
    } else {
    }
    return
  }
  func.func @transform_0(%arg0: i32, %arg1: i32) -> (i32, i32, i32) {
    %c0_i32 = arith.constant 0 : i32
    %c0_i32_0 = arith.constant 0 : i32
    %c0_i32_1 = arith.constant 0 : i32
    return %arg0, %c0_i32, %c0_i32_0 : i32, i32, i32
  }
  func.func @transform_1(%arg0: i32, %arg1: i32) -> (i32, i32, i32) {
    %c0_i32 = arith.constant 0 : i32
    %c0_i32_0 = arith.constant 0 : i32
    %c0_i32_1 = arith.constant 0 : i32
    %c0_i32_2 = arith.constant 0 : i32
    return %c0_i32, %c0_i32_0, %c0_i32_1 : i32, i32, i32
  }
  func.func @transform_2(%arg0: i32, %arg1: i32) -> (i32, i32, i32) {
    %c0_i32 = arith.constant 0 : i32
    %c0_i32_0 = arith.constant 0 : i32
    %c0_i32_1 = arith.constant 0 : i32
    return %arg1, %c0_i32, %c0_i32_0 : i32, i32, i32
  }
  func.func @transform_3(%arg0: i32, %arg1: i32) -> (i32, i32, i32) {
    %c0_i32 = arith.constant 0 : i32
    %c0_i32_0 = arith.constant 0 : i32
    %c0_i32_1 = arith.constant 0 : i32
    return %arg1, %c0_i32, %c0_i32_0 : i32, i32, i32
  }
  func.func @transform_4(%arg0: i32, %arg1: i32) -> (i32, i32, i32) {
    %c0_i32 = arith.constant 0 : i32
    %c0_i32_0 = arith.constant 0 : i32
    %c0_i32_1 = arith.constant 0 : i32
    return %arg1, %c0_i32, %c0_i32_0 : i32, i32, i32
  }
  func.func @transform_5(%arg0: i32, %arg1: i32) -> (i32, i32, i32) {
    %c0_i32 = arith.constant 0 : i32
    %c0_i32_0 = arith.constant 0 : i32
    %c0_i32_1 = arith.constant 0 : i32
    return %arg1, %c0_i32, %c0_i32_0 : i32, i32, i32
  }
  func.func @transform_6(%arg0: i32, %arg1: i32) -> (i32, i32, i32) {
    %c0_i32 = arith.constant 0 : i32
    %c0_i32_0 = arith.constant 0 : i32
    %c0_i32_1 = arith.constant 0 : i32
    return %arg1, %c0_i32, %c0_i32_0 : i32, i32, i32
  }
  func.func @transform_7(%arg0: i32, %arg1: i32) -> (i32, i32, i32) {
    %c0_i32 = arith.constant 0 : i32
    %c0_i32_0 = arith.constant 0 : i32
    %c0_i32_1 = arith.constant 0 : i32
    return %arg1, %c0_i32, %c0_i32_0 : i32, i32, i32
  }
  func.func @transform_8(%arg0: i32, %arg1: i32) -> (i32, i32, i32) {
    %c0_i32 = arith.constant 0 : i32
    %c0_i32_0 = arith.constant 0 : i32
    %c0_i32_1 = arith.constant 0 : i32
    return %arg1, %c0_i32, %c0_i32_0 : i32, i32, i32
  }
  func.func @transform_9(%arg0: i32, %arg1: i32) -> (i32, i32, i32) {
    %c0_i32 = arith.constant 0 : i32
    %c0_i32_0 = arith.constant 0 : i32
    %c0_i32_1 = arith.constant 0 : i32
    return %arg1, %c0_i32, %c0_i32_0 : i32, i32, i32
  }
  func.func @transform_10(%arg0: i32, %arg1: i32) -> (i32, i32, i32) {
    %c0_i32 = arith.constant 0 : i32
    %c0_i32_0 = arith.constant 0 : i32
    %c0_i32_1 = arith.constant 0 : i32
    return %arg1, %c0_i32, %c0_i32_0 : i32, i32, i32
  }
  func.func @transform_11(%arg0: i32, %arg1: i32) -> (i32, i32, i32) {
    %c0_i32 = arith.constant 0 : i32
    %c0_i32_0 = arith.constant 0 : i32
    %c0_i32_1 = arith.constant 0 : i32
    return %arg1, %c0_i32, %c0_i32_0 : i32, i32, i32
  }
  func.func @transform_12(%arg0: i32, %arg1: i32) -> (i32, i32, i32) {
    %c0_i32 = arith.constant 0 : i32
    %c0_i32_0 = arith.constant 0 : i32
    %c0_i32_1 = arith.constant 0 : i32
    return %arg1, %c0_i32, %c0_i32_0 : i32, i32, i32
  }
  func.func @transform_13(%arg0: i32, %arg1: i32) -> (i32, i32, i32) {
    %c0_i32 = arith.constant 0 : i32
    %c0_i32_0 = arith.constant 0 : i32
    %c0_i32_1 = arith.constant 0 : i32
    return %arg1, %c0_i32, %c0_i32_0 : i32, i32, i32
  }
  func.func @transform_14(%arg0: i32, %arg1: i32) -> (i32, i32, i32) {
    %c0_i32 = arith.constant 0 : i32
    %c0_i32_0 = arith.constant 0 : i32
    %c0_i32_1 = arith.constant 0 : i32
    return %arg0, %c0_i32, %c0_i32_0 : i32, i32, i32
  }
}

</mosaic_0001>

<bundles_post_ra>
// kernel: tpu_custom_call.1
= control target key start
LH: loop header
LB: loop body
LE: loop exit
PB: predicated region body
PF: predicated region fallthrough
CT: control target
= control target key end

     0   :  { %s8879_s0 = inlined_call_operand.hbm [shape: f32[2,64,128], index: 0, kind: input, shape index: {}]   ;;  %s8880_s1 = inlined_call_operand.hbm [shape: f32[1,64,128], index: 1, kind: input, shape index: {}]   ;;  %s8881_s2 = inlined_call_operand.hbm [shape: bf16[2,128,256], index: 2, kind: input, shape index: {}]   ;;  %s8882_s3 = inlined_call_operand.vmem [shape: f32[2,1,256], index: 3, kind: input, shape index: {}]   ;;  %s8883_s4 = inlined_call_operand.hbm [shape: bf16[2,128,128], index: 4, kind: input, shape index: {}]   ;;  %s8884_s5 = inlined_call_operand.vmem [shape: f32[2,1,128], index: 5, kind: input, shape index: {}]   ;;  %s8885_s6 = inlined_call_operand.hbm [shape: bf16[2,128,128], index: 6, kind: input, shape index: {}]   ;;  %s8886_s7 = inlined_call_operand.vmem [shape: f32[2,1,128], index: 7, kind: input, shape index: {}]   ;;  %s8887_s8 = inlined_call_operand.hbm [shape: bf16[2,128,256], index: 8, kind: input, shape index: {}]   ;;  %s8888_s9 = inlined_call_operand.vmem [shape: f32[2,1,256], index: 9, kind: input, shape index: {}]   ;;  %s8889_s10 = inlined_call_operand.hbm [shape: bf16[2,256,128], index: 10, kind: input, shape index: {}]   ;;  %s8890_s11 = inlined_call_operand.vmem [shape: f32[2,1,128], index: 11, kind: input, shape index: {}]   ;;  %s8891_s12 = inlined_call_operand.vmem [shape: f32[2,2,128], index: 12, kind: input, shape index: {}]   ;;  %s8892_s13 = inlined_call_operand.vmem [shape: f32[2,2,128], index: 13, kind: input, shape index: {}]   ;;  %s8893_s14 = inlined_call_operand.hbm [shape: f32[2,64,128], index: 14, kind: output, shape index: {}]  }
   0x1   :  { %8943 = sst [smem:[#allocation54_spill]] %s8879_s0 }
   0x2   :  { %8944 = sst [smem:[#allocation55_spill]] %s8880_s1 }
   0x3   :  { %8945 = sst [smem:[#allocation56_spill]] %s8881_s2 }
   0x4   :  { %8946 = sst [smem:[#allocation57_spill]] %s8882_s3 }
   0x5   :  { %8947 = sst [smem:[#allocation58_spill]] %s8883_s4 }
   0x6   :  { %8948 = sst [smem:[#allocation59_spill]] %s8884_s5 }
   0x7   :  { %8949 = sst [smem:[#allocation60_spill]] %s8885_s6 }
   0x8   :  { %8950 = sst [smem:[#allocation61_spill]] %s8886_s7 }
   0x9   :  { %8951 = sst [smem:[#allocation62_spill]] %s8887_s8 }
   0xa   :  { %8952 = sst [smem:[#allocation63_spill]] %s8888_s9 }
   0xb   :  { %8953 = sst [smem:[#allocation64_spill]] %s8889_s10 }
   0xc   :  { %8954 = sst [smem:[#allocation65_spill]] %s8890_s11 }
   0xd   :  { %8955 = sst [smem:[#allocation66_spill]] %s8891_s12 }
   0xe   :  { %8956 = sst [smem:[#allocation67_spill]] %s8892_s13 }
   0xf   :  { %8957 = sst [smem:[#allocation68_spill]] %s8893_s14 }
  0x10   :  { %19 = vsyncpa [#allocation4], 0 }
  0x11   :  { %21 = vsyncpa [#allocation4 + $0x1], 0 }
  0x12   :  { %22 = vsyncpa [#allocation7], 0 }
  0x13   :  { %23 = vsyncpa [#allocation5], 0 }
  0x14   :  { %25 = vsyncpa [#allocation5 + $0x1], 0  ;;  %s6826_s29 = smov 0   ;;  %s6828_s30 = smov 0  }
  0x15   :  { %s6830_s15 = smov 0   ;;  %s6832_s16 = smov 0  }
  0x16   :  { %s6834_s17 = smov 0   ;;  %s6836_s18 = smov 0  }
  0x17   :  { %s6838_s19 = smov 0   ;;  %s6840_s20 = smov 0  }
  0x18   :  { %s6842_s21 = smov 0   ;;  %s6844_s22 = smov 0  }
  0x19   :  { %s6846_s23 = smov 0  }
  0x1a LB: > { %8958 = sst [smem:[#allocation18_spill]] %s6691_s30  ;;  %s40_s24 = sadd.s32 1, %s6719_s21  ;;  %s6727_s23 = sphi %s6846_s23, %s31_s23   ;;  %s6723_s22 = sphi %s6844_s22, %s9106_s22   ;;  %s6719_s21 = sphi %s6842_s21, %s9105_s21   ;;  %s6715_s20 = sphi %s6840_s20, %s9104_s20   ;;  %s6711_s19 = sphi %s6838_s19, %s9103_s19   ;;  %s6707_s18 = sphi %s6836_s18, %s9102_s18   ;;  %s6703_s17 = sphi %s6834_s17, %s9108_s17   ;;  %s6699_s16 = sphi %s6832_s16, %s9107_s16   ;;  %s6695_s15 = sphi %s6830_s15, %s9100_s15   ;;  %s6691_s30 = sphi %s6828_s30, %s9099_s30   ;;  %s6687_s29 = sphi %s6826_s29, %s9098_s29  }
  0x1b   : > { %8959 = sst [smem:[#allocation19_spill]] %s6695_s15  ;;  %s43_s25 = sadd.s32 1, %s6723_s22 }
  0x1c   : > { %8960 = sst [smem:[#allocation20_spill]] %s6699_s16  ;;  %p41_p0 = scmp.ge.s32.totalorder %s40_s24, 2 }
  0x1d   : > { %8961 = sst [smem:[#allocation21_spill]] %s6707_s18  ;;  %s50_s26 = sadd.s32 1, %s6707_s18 }
  0x1e   : > { %8962 = sst [smem:[#allocation22_spill]] %s6715_s20  ;;  %p8898_p1 = scmp.ne.s32.totalorder %s6707_s18, %s6703_s17 }
  0x1f   : > { %8963 = sst [smem:[#allocation23_spill]] %s6719_s21  ;;  %p8900_p2 = scmp.eq.s32.totalorder %s6727_s23, 0 }
  0x20   : > { %8964 = sst [smem:[#allocation24_spill]] %s6723_s22  ;;  %s9110_s24 = smov (%p41_p0, %s40_s24), 0 }
  0x21   : > { %8965 = sst [smem:[#allocation25_spill]] %s6727_s23  ;;  %s9112_s25 = smov (!%p41_p0, %s43_s25), %s6723_s22 }
  0x22   : > { %8966 = sst [smem:[#allocation26_spill]] %s9110_s24  ;;  %p6895_p3 = por %p8900_p2, %p8898_p1 }
  0x23   : > { %s94_s28 = ssub.s32 %s6719_s21, %s9110_s24  ;;  %p45_p4 = scmp.ge.s32.totalorder %s9112_s25, 2 }
  0x24   : > { %p6901_p5 = scmp.eq.s32.totalorder %s94_s28, 0  ;;  %p8899_p6 = scmp.lt.s32.totalorder %s6727_s23, 4 }
  0x25   : > { %s9114_s25 = smov (%p45_p4, %s9112_s25), 0  ;;  %s459_s13 = sand.u32 1, %s6727_s23  }
  0x26   : > { %8969 = sst [smem:[#allocation27_spill]] %s9114_s25  ;;  %s47_s20 = ssub.s32 %s6723_s22, %s9114_s25 }
  0x27   : > { %p48_p7 = scmp.eq.s32.totalorder %s47_s20, 0  ;;  %s461_s12 = sand.u32 1, %s6707_s18  }
  0x28   : > { %s5154_s11 = sshll.u32 %s6723_s22, 10  ;;  %s4985_s7 = sshll.u32 %s461_s12, 6 }
  0x29   : > { %s6914_s9 = scalar_select %p48_p7, %s6707_s18, %s50_s26  }
  0x2a   : > { %s8971_s0 = sld [smem:[#allocation54_spill]]  ;;  %p6925_p8 = pnand %p8899_p6, %p6895_p3 }
  0x2b   : > { %8970 = sst [smem:[#allocation28_spill]] %s6914_s9  ;;  %s463_s20 = scalar_lea.vmem [#allocation3], %s4985_s7 }
  0x2c   : > { %s470_s26 = sshll.u32 %s463_s20, 4  ;;  %s6931_s12 = scalar_lea.sflag [#allocation4], %s459_s13  ;;  %s6929_s26 = int_to_ptr.vmem [resolvable:$true] %s470_s26 }
  0x2d   : > { %p6391_p10 = pneg %p6925_p8 }
  0x30   : > { %s6919_s24 = scalar_lea.hbm %s8971_s0, %s5154_s11  ;;  %s6394_s27 = scalar_lea.hbm %s8971_s0, 2048 }
  0x31   : > { %s6389_s3 = scalar_lea.hbm %s6919_s24, 1024  ;;  %p6395_p13 = scmp.lt.u32.totalorder %s6919_s24, %s8971_s0 }
  0x32   : > { %p6390_p9 = scmp.ne.s32.totalorder %s6919_s24, %s6389_s3  ;;  %p6396_p0 = scmp.lt.u32.totalorder %s6394_s27, %s6389_s3 }
  0x33   : > { %p6398_p4 = scmp.lt.u32.totalorder %s6389_s3, %s6919_s24 }
  0x34   : > { %p6392_p11 = pnand %p6391_p10, %p6390_p9  ;;  %p6397_p3 = por %p6396_p0, %p6395_p13 }
  0x36   : > { %p6393_p12 = pneg %p6392_p11  ;;  %p6399_p7 = por %p6398_p4, %p6397_p3 }
  0x38   : > { %p6400_p1 = pnand %p6399_p7, %p6393_p12 }
  0x3a   : > { %6403 = shalt.err (!%p6400_p1)
}
  0x3b   : > { %s6404_s7 = scalar_lea.vmem %s6929_s26, 1024  ;;  %s6729_s13 = smov [#allocation3]  }
  0x3c   : > { %p6405_p9 = scmp.ne.s32.totalorder %s6929_s26, %s6404_s7  ;;  %s6409_s20 = sshll.u32 %s6729_s13, 4  ;;  %s6410_s20 = int_to_ptr.vmem [resolvable:$false] %s6409_s20 }
  0x3d   : > { %s6411_s22 = scalar_lea.vmem %s6410_s20, 2048  ;;  %p6412_p2 = scmp.lt.s32.totalorder %s6929_s26, %s6410_s20 }
  0x3e   : > { %p6407_p11 = pnand %p6405_p9, %p6391_p10  ;;  %p6413_p13 = scmp.lt.s32.totalorder %s6411_s22, %s6404_s7 }
  0x40   : > { %p6408_p6 = pneg %p6407_p11  ;;  %p6414_p0 = por %p6413_p13, %p6412_p2 }
  0x42   : > { %p6415_p3 = pnand %p6414_p0, %p6408_p6 }
  0x44   : > { %6418 = shalt.err (!%p6415_p3)
}
  0x45   : > { %s8901_s25 = smov 128   ;;  %s8903_s3 = smov 8  }
  0x46   : > { %5714 = dma.hbm_to_vmem [thread:$0]  (!%p6925_p8), %s6919_s24, 1024, %s6929_s26, %s6931_s12, %s8901_s25, %s8901_s25, %s8903_s3  }
  0x47   : > { %s6963_s5 = sshll.u32 %s6719_s21, 11  ;;  %s97_s11 = sadd.s32 1, %s6695_s15 }
  0x48   : > { %p104_p1 = scmp.ne.s32.totalorder %s6695_s15, %s6691_s30  ;;  %p8974_p2 = scmp.eq.s32.totalorder %s6727_s23, 0 }
  0x49   : > { %s6971_s27 = scalar_select %p6901_p5, %s6695_s15, %s97_s11  }
  0x4a   : > { %p106_p6 = por %p104_p1, %p8974_p2  ;;  %s482_s7 = sand.u32 1, %s6695_s15  }
  0x4b   : > { %8973 = sst [smem:[#allocation29_spill]] %s6971_s27  ;;  %s6976_s13 = sshll.u32 %s482_s7, 7 }
  0x4c   : > { %s8975_s2 = sld [smem:[#allocation56_spill]]  ;;  %p8976_p8 = scmp.lt.s32.totalorder %s6727_s23, 4 }
  0x4d   : > { %s484_s24 = scalar_lea.vmem [#allocation8], %s6976_s13  ;;  %s6991_s11 = sshll.u32 %s482_s7, 6 }
  0x4e   : > { %p6986_p10 = pnand %p8976_p8, %p106_p6  ;;  %s491_s26 = sshll.u32 %s484_s24, 4  ;;  %s6993_s26 = int_to_ptr.vmem [resolvable:$true] %s491_s26 }
  0x50   : > { %s8977_s14 = scalar_select %p6986_p10, 1, 0 }
  0x51   : > { %p6999_p12 = pneg %p6986_p10 }
  0x52   : > { %s6982_s28 = scalar_lea.hbm %s8975_s2, %s6963_s5  ;;  %s6424_s0 = scalar_lea.hbm %s8975_s2, 4096 }
  0x53   : > { %s6419_s20 = scalar_lea.hbm %s6982_s28, 2048  ;;  %p6425_p9 = scmp.lt.u32.totalorder %s6982_s28, %s8975_s2 }
  0x54   : > { %p6420_p5 = scmp.ne.s32.totalorder %s6982_s28, %s6419_s20  ;;  %p6426_p11 = scmp.lt.u32.totalorder %s6424_s0, %s6419_s20 }
  0x55   : > { %p6428_p0 = scmp.lt.u32.totalorder %s6419_s20, %s6982_s28 }
  0x56   : > { %p6422_p4 = pnand %p6999_p12, %p6420_p5  ;;  %p6427_p13 = por %p6426_p11, %p6425_p9 }
  0x58   : > { %p6423_p7 = pneg %p6422_p4  ;;  %p6429_p3 = por %p6428_p0, %p6427_p13 }
  0x5a   : > { %p6430_p1 = pnand %p6429_p3, %p6423_p7 }
  0x5c   : > { %6433 = shalt.err (!%p6430_p1)
}
  0x5d   : > { %s6434_s9 = scalar_lea.vmem %s6993_s26, 2048  ;;  %s6732_s25 = smov [#allocation8]  }
  0x5e   : > { %p6435_p2 = scmp.ne.s32.totalorder %s6993_s26, %s6434_s9  ;;  %s6439_s3 = sshll.u32 %s6732_s25, 4  ;;  %s6440_s3 = int_to_ptr.vmem [resolvable:$false] %s6439_s3 }
  0x5f   : > { %s6441_s24 = scalar_lea.vmem %s6440_s3, 4096  ;;  %p6442_p5 = scmp.lt.s32.totalorder %s6993_s26, %s6440_s3 }
  0x60   : > { %p6437_p6 = pnand %p6435_p2, %p6999_p12  ;;  %p6443_p4 = scmp.lt.s32.totalorder %s6441_s24, %s6434_s9 }
  0x62   : > { %p6438_p8 = pneg %p6437_p6  ;;  %p6444_p9 = por %p6443_p4, %p6442_p5 }
  0x64   : > { %p6445_p11 = pnand %p6444_p9, %p6438_p8 }
  0x66   : > { %6448 = shalt.err (!%p6445_p11)
}
  0x67   : > { %s8979_s0 = smov 8   ;;  %s8980_s20 = smov 128  }
  0x68   : > { %5717 = dma.hbm_to_vmem [thread:$0]  (!%p6986_p10), %s6982_s28, 2048, %s6993_s26, %s6931_s12, %s8980_s20, %s8980_s20, %s8979_s0  }
  0x69   : > { %s5156_s7 = sshll.u32 %s6719_s21, 10  ;;  %s8981_s4 = sld [smem:[#allocation58_spill]] }
  0x6a   : > { %s512_s24 = scalar_lea.vmem [#allocation9], %s6991_s11 }
  0x6b   : > { %s519_s2 = sshll.u32 %s512_s24, 4  ;;  %s7035_s2 = int_to_ptr.vmem [resolvable:$true] %s519_s2 }
  0x6f   : > { %s7032_s3 = scalar_lea.hbm %s8981_s4, %s5156_s7  ;;  %s6454_s15 = scalar_lea.hbm %s8981_s4, 2048 }
  0x70   : > { %s6449_s27 = scalar_lea.hbm %s7032_s3, 1024  ;;  %p6455_p3 = scmp.lt.u32.totalorder %s7032_s3, %s8981_s4 }
  0x71   : > { %p6450_p7 = scmp.ne.s32.totalorder %s7032_s3, %s6449_s27  ;;  %p6456_p1 = scmp.lt.u32.totalorder %s6454_s15, %s6449_s27 }
  0x72   : > { %p6458_p6 = scmp.lt.u32.totalorder %s6449_s27, %s7032_s3 }
  0x73   : > { %p6452_p13 = pnand %p6450_p7, %p6999_p12  ;;  %p6457_p2 = por %p6456_p1, %p6455_p3 }
  0x75   : > { %p6453_p0 = pneg %p6452_p13  ;;  %p6459_p8 = por %p6458_p6, %p6457_p2 }
  0x77   : > { %p6460_p5 = pnand %p6459_p8, %p6453_p0 }
  0x79   : > { %6463 = shalt.err (!%p6460_p5)
}
  0x7a   : > { %s6464_s24 = scalar_lea.vmem %s7035_s2, 1024  ;;  %s6733_s28 = smov [#allocation9]  }
  0x7b   : > { %p6465_p4 = scmp.ne.s32.totalorder %s7035_s2, %s6464_s24  ;;  %s6469_s26 = sshll.u32 %s6733_s28, 4  ;;  %s6470_s26 = int_to_ptr.vmem [resolvable:$false] %s6469_s26 }
  0x7c   : > { %s6471_s25 = scalar_lea.vmem %s6470_s26, 2048  ;;  %p6472_p7 = scmp.lt.s32.totalorder %s7035_s2, %s6470_s26 }
  0x7d   : > { %p6467_p9 = pnand %p6465_p4, %p6999_p12  ;;  %p6473_p13 = scmp.lt.s32.totalorder %s6471_s25, %s6464_s24 }
  0x7f   : > { %p6468_p11 = pneg %p6467_p9  ;;  %p6474_p3 = por %p6473_p13, %p6472_p7 }
  0x81   : > { %p6475_p1 = pnand %p6474_p3, %p6468_p11 }
  0x83   : > { %6478 = shalt.err (!%p6475_p1)
}
  0x84   : > { %s8906_s15 = smov 64   ;;  %s8909_s27 = smov 4  }
  0x85   : > { %5720 = dma.hbm_to_vmem [thread:$0]  (!%p6986_p10), %s7032_s3, 1024, %s7035_s2, %s6931_s12, %s8906_s15, %s8906_s15, %s8909_s27  }
  0x86   : > { %s8982_s6 = sld [smem:[#allocation60_spill]]  ;;  %s539_s26 = scalar_lea.vmem [#allocation10], %s6991_s11 }
  0x87   : > { %s546_s25 = sshll.u32 %s539_s26, 4  ;;  %s7070_s25 = int_to_ptr.vmem [resolvable:$true] %s546_s25 }
  0x8c   : > { %s7067_s28 = scalar_lea.hbm %s8982_s6, %s5156_s7  ;;  %s6484_s15 = scalar_lea.hbm %s8982_s6, 2048 }
  0x8d   : > { %s6479_s4 = scalar_lea.hbm %s7067_s28, 1024  ;;  %p6485_p8 = scmp.lt.u32.totalorder %s7067_s28, %s8982_s6 }
  0x8e   : > { %p6480_p0 = scmp.ne.s32.totalorder %s7067_s28, %s6479_s4  ;;  %p6486_p5 = scmp.lt.u32.totalorder %s6484_s15, %s6479_s4 }
  0x8f   : > { %p6488_p9 = scmp.lt.u32.totalorder %s6479_s4, %s7067_s28 }
  0x90   : > { %p6482_p2 = pnand %p6480_p0, %p6999_p12  ;;  %p6487_p4 = por %p6486_p5, %p6485_p8 }
  0x92   : > { %p6483_p6 = pneg %p6482_p2  ;;  %p6489_p11 = por %p6488_p9, %p6487_p4 }
  0x94   : > { %p6490_p7 = pnand %p6489_p11, %p6483_p6 }
  0x96   : > { %6493 = shalt.err (!%p6490_p7)
}
  0x97   : > { %s6494_s11 = scalar_lea.vmem %s7070_s25, 1024  ;;  %s6736_s24 = smov [#allocation10]  }
  0x98   : > { %p6495_p13 = scmp.ne.s32.totalorder %s7070_s25, %s6494_s11  ;;  %s6499_s26 = sshll.u32 %s6736_s24, 4  ;;  %s6500_s26 = int_to_ptr.vmem [resolvable:$false] %s6499_s26 }
  0x99   : > { %s6501_s2 = scalar_lea.vmem %s6500_s26, 2048  ;;  %p6502_p0 = scmp.lt.s32.totalorder %s7070_s25, %s6500_s26 }
  0x9a   : > { %p6497_p3 = pnand %p6495_p13, %p6999_p12  ;;  %p6503_p2 = scmp.lt.s32.totalorder %s6501_s2, %s6494_s11 }
  0x9c   : > { %p6498_p1 = pneg %p6497_p3  ;;  %p6504_p8 = por %p6503_p2, %p6502_p0 }
  0x9e   : > { %p6505_p5 = pnand %p6504_p8, %p6498_p1 }
  0xa0   : > { %6508 = shalt.err (!%p6505_p5)
}
  0xa1   : > { %s8983_s4 = smov 64   ;;  %s8984_s8 = sld [smem:[#allocation62_spill]] }
  0xa2   : > { %5723 = dma.hbm_to_vmem [thread:$0]  (!%p6986_p10), %s7067_s28, 1024, %s7070_s25, %s6931_s12, %s8983_s4, %s8983_s4, %s8909_s27  }
  0xa3   : > { %s566_s7 = scalar_lea.vmem [#allocation11], %s6976_s13 }
  0xa4   : > { %s573_s11 = sshll.u32 %s566_s7, 4  ;;  %s7104_s11 = int_to_ptr.vmem [resolvable:$true] %s573_s11 }
  0xa7   : > { %s7101_s9 = scalar_lea.hbm %s8984_s8, %s6963_s5  ;;  %s6514_s25 = scalar_lea.hbm %s8984_s8, 4096 }
  0xa8   : > { %s6509_s24 = scalar_lea.hbm %s7101_s9, 2048  ;;  %p6515_p11 = scmp.lt.u32.totalorder %s7101_s9, %s8984_s8 }
  0xa9   : > { %p6510_p6 = scmp.ne.s32.totalorder %s7101_s9, %s6509_s24  ;;  %p6516_p7 = scmp.lt.u32.totalorder %s6514_s25, %s6509_s24 }
  0xaa   : > { %p6518_p3 = scmp.lt.u32.totalorder %s6509_s24, %s7101_s9 }
  0xab   : > { %p6512_p4 = pnand %p6510_p6, %p6999_p12  ;;  %p6517_p13 = por %p6516_p7, %p6515_p11 }
  0xad   : > { %p6513_p9 = pneg %p6512_p4  ;;  %p6519_p1 = por %p6518_p3, %p6517_p13 }
  0xaf   : > { %p6520_p0 = pnand %p6519_p1, %p6513_p9 }
  0xb1   : > { %6523 = shalt.err (!%p6520_p0)
}
  0xb2   : > { %s6524_s3 = scalar_lea.vmem %s7104_s11, 2048  ;;  %s6737_s7 = smov [#allocation11]  }
  0xb3   : > { %p6525_p2 = scmp.ne.s32.totalorder %s7104_s11, %s6524_s3  ;;  %s6529_s26 = sshll.u32 %s6737_s7, 4  ;;  %s6530_s26 = int_to_ptr.vmem [resolvable:$false] %s6529_s26 }
  0xb4   : > { %s6531_s28 = scalar_lea.vmem %s6530_s26, 4096  ;;  %p6532_p6 = scmp.lt.s32.totalorder %s7104_s11, %s6530_s26 }
  0xb5   : > { %p6527_p8 = pnand %p6525_p2, %p6999_p12  ;;  %p6533_p4 = scmp.lt.s32.totalorder %s6531_s28, %s6524_s3 }
  0xb7   : > { %p6528_p5 = pneg %p6527_p8  ;;  %p6534_p11 = por %p6533_p4, %p6532_p6 }
  0xb9   : > { %p6535_p7 = pnand %p6534_p11, %p6528_p5 }
  0xbb   : > { %6538 = shalt.err (!%p6535_p7)
}
  0xbc   : > { %5726 = dma.hbm_to_vmem [thread:$0]  (!%p6986_p10), %s7101_s9, 2048, %s7104_s11, %s6931_s12, %s8980_s20, %s8980_s20, %s8979_s0  }
  0xbd   : > { %s7132_s24 = sadd.s32 4294967295, %s6727_s23   ;;  %s4981_s25 = sadd.s32 4294967294, %s6727_s23  }
  0xbe   : > { %p63_p9 = scmp.ne.s32.totalorder %s6703_s17, %s6699_s16  ;;  %p8912_p13 = scmp.eq.s32.totalorder %s7132_s24, 0 }
  0xbf   : > { %p110_p3 = scmp.ne.s32.totalorder %s6691_s30, %s6687_s29  ;;  %p420_p1 = scmp.eq.s32.totalorder %s7132_s24, 3 }
  0xc0   : > { %p426_p0 = scmp.eq.s32.totalorder %s4981_s25, 3  ;;  %p7143_p2 = por %p8912_p13, %p63_p9 }
  0xc1   : > { %p7149_p8 = por %p110_p3, %p8912_p13  ;;  %p8987_p5 = scmp.ne.s32.totalorder %s6707_s18, %s6703_s17 }
  0xc2   : > { %s8985_s2 = scalar_select %p7143_p2, 1, 0 }
  0xc3   : > { %s8986_s9 = scalar_select %p7149_p8, 1, 0 }
  0xc4   : > { %p7156_p6 = por %p420_p1, %p8987_p5  ;;  %p7160_p4 = por %p426_p0, %p63_p9 }
  0xc5   : > { %p4982_p11 = scmp.ge.s32.totalorder %s6727_s23, 1  ;;  %p433_p7 = scmp.lt.s32.totalorder %s6727_s23, 5 }
  0xc6   : > { %s8988_s11 = scalar_select %p7156_p6, 1, 0 }
  0xc7   : > { %s8990_s29 = scalar_select %p7160_p4, 1, 0 }
  0xc8   : > { %8989 = sst [smem:[#allocation30_spill]] %s8988_s11  ;;  %p7166_p10 = pnand %p4982_p11, %p433_p7 }
  0xc9   : > { %8991 = sst [smem:[#allocation31_spill]] %s8990_s29  ;;  %s6738_s3 = smov [#allocation6]  }
  0xca   : > { %s8992_s15 = scalar_select %p7166_p10, 1, 0 }
  0xcb   : > { %s445_s7 = sshll.u32 %s6738_s3, 4  ;;  %p5707_p3 = pneg %p7166_p10  ;;  %s7178_s7 = int_to_ptr.vmem [resolvable:$true] %s445_s7 }
  0xcc   : > { %s8993_s10 = sld [smem:[#allocation64_spill]]  ;;  %s594_s27 = scalar_lea.vmem [#allocation12], %s6976_s13 }
  0xcd   : > { %s601_s6 = sshll.u32 %s594_s27, 4  ;;  %p7183_p9 = pnand %p5707_p3, %p8912_p13  ;;  %s7187_s6 = int_to_ptr.vmem [resolvable:$true] %s601_s6 }
  0xd2   : > { %s7176_s25 = scalar_lea.hbm %s8993_s10, %s6963_s5  ;;  %s6544_s28 = scalar_lea.hbm %s8993_s10, 4096 }
  0xd3   : > { %s6539_s3 = scalar_lea.hbm %s7176_s25, 2048  ;;  %p6545_p11 = scmp.lt.u32.totalorder %s7176_s25, %s8993_s10 }
  0xd4   : > { %p6540_p1 = scmp.ne.s32.totalorder %s7176_s25, %s6539_s3  ;;  %p6546_p7 = scmp.lt.u32.totalorder %s6544_s28, %s6539_s3 }
  0xd5   : > { %p6548_p13 = scmp.lt.u32.totalorder %s6539_s3, %s7176_s25 }
  0xd6   : > { %p6542_p0 = pnand %p6540_p1, %p6999_p12  ;;  %p6547_p3 = por %p6546_p7, %p6545_p11 }
  0xd8   : > { %p6543_p5 = pneg %p6542_p0  ;;  %p6549_p4 = por %p6548_p13, %p6547_p3 }
  0xda   : > { %p6550_p6 = pnand %p6549_p4, %p6543_p5 }
  0xdc   : > { %6553 = shalt.err (!%p6550_p6)
}
  0xdd   : > { %s6554_s13 = scalar_lea.vmem %s7187_s6, 2048  ;;  %s6739_s27 = smov [#allocation12]  }
  0xde   : > { %p6555_p1 = scmp.ne.s32.totalorder %s7187_s6, %s6554_s13  ;;  %s6559_s5 = sshll.u32 %s6739_s27, 4  ;;  %s6560_s5 = int_to_ptr.vmem [resolvable:$false] %s6559_s5 }
  0xdf   : > { %s6561_s18 = scalar_lea.vmem %s6560_s5, 4096  ;;  %p6562_p2 = scmp.lt.s32.totalorder %s7187_s6, %s6560_s5 }
  0xe0   : > { %p6557_p0 = pnand %p6555_p1, %p6999_p12  ;;  %p6563_p10 = scmp.lt.s32.totalorder %s6561_s18, %s6554_s13 }
  0xe2   : > { %p6558_p8 = pneg %p6557_p0  ;;  %p6564_p11 = por %p6563_p10, %p6562_p2 }
  0xe4   : > { %p6565_p7 = pnand %p6564_p11, %p6558_p8 }
  0xe6   : > { %6568 = shalt.err (!%p6565_p7)
}
  0xe7   : > { %p8995_p13 = scmp.ne.s32.totalorder %s8977_s14, 0  ;;  %s8996_s21 = smov 4  }
  0xe8   : > { %s8997_s1 = sld [smem:[#allocation55_spill]]  ;;  %p6571_p12 = pneg %p7183_p9 }
  0xe9   : > { %5729 = dma.hbm_to_vmem [thread:$0]  (!%p8995_p13), %s7176_s25, 2048, %s7187_s6, %s6931_s12, %s8983_s4, %s8983_s4, %s8996_s21  }
  0xee   : > { %s6569_s26 = scalar_lea.hbm %s8997_s1, 1024 }
  0xef   : > { %p6570_p10 = scmp.ne.s32.totalorder %s8997_s1, %s6569_s26  ;;  %p6576_p6 = scmp.lt.u32.totalorder %s6569_s26, %s8997_s1 }
  0xf1   : > { %p6572_p2 = pnand %p6571_p12, %p6570_p10 }
  0xf3   : > { %p6573_p8 = pneg %p6572_p2 }
  0xf5   : > { %p6578_p4 = pnand %p6576_p6, %p6573_p8 }
  0xf7   : > { %6581 = shalt.err (!%p6578_p4)
}
  0xf8   : > { %s6582_s6 = scalar_lea.vmem %s7178_s7, 1024  ;;  %p6590_p0 = scmp.lt.s32.totalorder %s7178_s7, %s7178_s7 }
  0xf9   : > { %p6583_p5 = scmp.ne.s32.totalorder %s7178_s7, %s6582_s6  ;;  %p6591_p11 = scmp.lt.s32.totalorder %s6582_s6, %s6582_s6 }
  0xfb   : > { %p6585_p3 = pnand %p6583_p5, %p6571_p12  ;;  %p6592_p7 = por %p6591_p11, %p6590_p0 }
  0xfd   : > { %p6586_p1 = pneg %p6585_p3 }
  0xff   : > { %p6593_p13 = pnand %p6592_p7, %p6586_p1 }
 0x101   : > { %6596 = shalt.err (!%p6593_p13)
}
 0x102   : > { %5710 = dma.hbm_to_vmem [thread:$0]  (!%p7183_p9), %s8997_s1, 1024, %s7178_s7, [#allocation7], %s8980_s20, %s8980_s20, %s8979_s0  }
 0x103   : > { %p8998_p10 = scmp.ne.s32.totalorder %s8992_s15, 0 }
 0x105   : > { %633 = sbr.rel (%p8998_p10) target bundleno = 6698 (0x1a2a), region = 76 }
 0x10c   : > { %s635_s25 = sand.u32 1, %s7132_s24   ;;  %s8917_s5 = sand.u32 1, %s6703_s17  }
 0x10d   : > { %s5004_s18 = sshll.u32 %s8917_s5, 6  ;;  %s636_s8 = scalar_lea.sflag [#allocation4], %s635_s25 }
 0x10e   : > { %s7244_s21 = scalar_lea.vmem [#allocation3], %s5004_s18  ;;  %p8999_p12 = scmp.ne.s32.totalorder %s8985_s2, 0 }
 0x110   : > { %6670 = dma.done.wait (%p8999_p12), %s636_s8, 1024  }
 0x111   : > { %6672 = vsyncadd (%p8999_p12), %s636_s8, 4294966272  ;;  %p9000_p9 = scmp.eq.s32.totalorder %s7132_s24, 0 }
 0x113   : > { %6674 = dma.done.wait (%p9000_p9), [#allocation7], 1024   ;;  %p9001_p2 = pmov %p9000_p9 }
 0x114   : > { %s650_s0 = sand.u32 1, %s6691_s30   ;;  %p9002_p8 = scmp.ne.s32.totalorder %s8986_s9, 0 }
 0x115   : > { %6676 = vsyncadd (%p9001_p2), [#allocation7], 4294966272  ;;  %s5006_s20 = sshll.u32 %s650_s0, 7 }
 0x116   : > { %s7255_s15 = scalar_lea.vmem [#allocation8], %s5006_s20 }
 0x117   : > { %6678 = dma.done.wait (%p9002_p8), %s636_s8, 8192  }
 0x118   : > { %6680 = vsyncadd (%p9002_p8), %s636_s8, 4294959104  ;;  %s5007_s2 = sshll.u32 %s650_s0, 6  ;;  %p783_p6 = scmp.lt.s32.totalorder %s6711_s19, 1 }
 0x119   : > { %s9004_s14 = sld [smem:[#allocation57_spill]]  ;;  %s9005_s4 = sld [smem:[#allocation61_spill]] }
 0x11a   : > { %s7263_s7 = scalar_select %p783_p6, %s6711_s19, 1 }
 0x11b   : > { %s9006_s5 = sld [smem:[#allocation63_spill]]  ;;  %s9007_s22 = sld [smem:[#allocation65_spill]] }
 0x11c   : > { %s7266_s24 = sshll.u32 %s7263_s7, 1  ;;  %s9008_s23 = sld [smem:[#allocation66_spill]] }
 0x11d   : > { %s9009_s28 = sld [smem:[#allocation67_spill]]  ;;  %s7298_s6 = scalar_lea.vmem [#allocation10], %s5007_s2 }
 0x11e   : > { %s7300_s12 = scalar_lea.vmem [#allocation11], %s5006_s20  ;;  %p5016_p4 = scmp.ne.s32.totalorder %s6711_s19, 0 }
 0x11f   : > { %s786_s13 = scalar_lea.vmem %s9004_s14, %s7266_s24  ;;  %s792_s25 = scalar_lea.vmem %s9005_s4, %s7263_s7  ;;  %v813_v0 = vld [vmem:[%s7244_s21] sm:$0xff] (!%p5016_p4)  ;;  %v814_v1 = vld [vmem:[%s7244_s21 + $0x8] sm:$0xff] (!%p5016_p4)  ;;  %v815_v2 = vld [vmem:[%s7244_s21 + $0x10] sm:$0xff] (!%p5016_p4) }
 0x120   : > { %s7296_s14 = scalar_lea.vmem [#allocation9], %s5007_s2  ;;  %s7302_s4 = scalar_lea.vmem [#allocation12], %s5006_s20  ;;  %821 = vst [vmem:[#allocation2] sm:$0xff] (!%p5016_p4), %v813_v0  ;;  %822 = vst [vmem:[#allocation2 + $0x8] sm:$0xff] (!%p5016_p4), %v814_v1  ;;  %v816_v3 = vld [vmem:[%s7244_s21 + $0x18] sm:$0xff] (!%p5016_p4)  ;;  %v817_v4 = vld [vmem:[%s7244_s21 + $0x20] sm:$0xff] (!%p5016_p4) }
 0x121   : > { %s796_s1 = scalar_lea.vmem %s9006_s5, %s7266_s24  ;;  %s799_s3 = scalar_lea.vmem %s9007_s22, %s7263_s7  ;;  %823 = vst [vmem:[#allocation2 + $0x10] sm:$0xff] (!%p5016_p4), %v815_v2  ;;  %v818_v5 = vld [vmem:[%s7244_s21 + $0x28] sm:$0xff] (!%p5016_p4)  ;;  %824 = vst [vmem:[#allocation2 + $0x18] sm:$0xff] (!%p5016_p4), %v816_v3  ;;  %v819_v6 = vld [vmem:[%s7244_s21 + $0x30] sm:$0xff] (!%p5016_p4) }
 0x122   : > { %s803_s26 = scalar_lea.vmem %s9008_s23, %s7266_s24  ;;  %s7304_s5 = scalar_lea.vmem [#allocation13], %s5004_s18  ;;  %825 = vst [vmem:[#allocation2 + $0x20] sm:$0xff] (!%p5016_p4), %v817_v4  ;;  %826 = vst [vmem:[#allocation2 + $0x28] sm:$0xff] (!%p5016_p4), %v818_v5  ;;  %v820_v7 = vld [vmem:[%s7244_s21 + $0x38] sm:$0xff] (!%p5016_p4) }
 0x123   : > { %s807_s27 = scalar_lea.vmem %s9009_s28, %s7266_s24  ;;  %812 = sbr.rel (%p5016_p4) target bundleno = 298 (0x12a), region = 108  ;;  %827 = vst [vmem:[#allocation2 + $0x30] sm:$0xff] (!%p5016_p4), %v819_v6  ;;  %828 = vst [vmem:[#allocation2 + $0x38] sm:$0xff] (!%p5016_p4), %v820_v7 }
 0x12a PF: > { %v5981_v8 = vld [vmem:[%s7255_s15 + $0x4] ss:$8 sps:$4 sm:$0xff]   ;;  %v5983_v9 = vld [vmem:[%s7255_s15] ss:$8 sps:$4 sm:$0xff]   ;;  %v8925_v10 = vmov 0   ;;  %v7338_v31 = vld [vmem:[#allocation2 + $0x10] sm:$0xff]  ;;  %v879_v53 = vlaneseq }
 0x12b   : > { %1001 = vmatprep.mubr.bf16.mxu0 %v8925_v10  ;;  %969 = vmatprep.subr.bf16.mxu0 %v5981_v8  ;;  %v5984_v11 = vld [vmem:[%s7255_s15 + $0x14] ss:$8 sps:$4 sm:$0xff]   ;;  %v5986_v12 = vld [vmem:[%s7255_s15 + $0x10] ss:$8 sps:$4 sm:$0xff]   ;;  %v5987_v13 = vld [vmem:[%s7255_s15 + $0x24] ss:$8 sps:$4 sm:$0xff]  }
 0x12c   : > { %970 = vmatpush1.bf16.msra.mxu0 %v5983_v9  ;;  %v5989_v14 = vld [vmem:[%s7255_s15 + $0x20] ss:$8 sps:$4 sm:$0xff]   ;;  %v5990_v15 = vld [vmem:[%s7255_s15 + $0x34] ss:$8 sps:$4 sm:$0xff]   ;;  %v5992_v16 = vld [vmem:[%s7255_s15 + $0x30] ss:$8 sps:$4 sm:$0xff]  }
 0x12d   : > { %971 = vmatprep.subr.bf16.mxu0 %v5984_v11  ;;  %v5993_v17 = vld [vmem:[%s7255_s15 + $0x44] ss:$8 sps:$4 sm:$0xff]   ;;  %v5995_v18 = vld [vmem:[%s7255_s15 + $0x40] ss:$8 sps:$4 sm:$0xff]   ;;  %v5996_v19 = vld [vmem:[%s7255_s15 + $0x54] ss:$8 sps:$4 sm:$0xff]  }
 0x12e   : > { %v5998_v20 = vld [vmem:[%s7255_s15 + $0x50] ss:$8 sps:$4 sm:$0xff]   ;;  %v5999_v21 = vld [vmem:[%s7255_s15 + $0x64] ss:$8 sps:$4 sm:$0xff]   ;;  %v6001_v22 = vld [vmem:[%s7255_s15 + $0x60] ss:$8 sps:$4 sm:$0xff]  }
 0x12f   : > { %v7330_v23 = vld [vmem:[#allocation2] sm:$0xff]  ;;  %v7332_v24 = vld [vmem:[#allocation2 + $0x8] sm:$0xff]  ;;  %v6002_v27 = vld [vmem:[%s7255_s15 + $0x74] ss:$8 sps:$4 sm:$0xff]   ;;  %v880_v54 = vshrl.u32 %v879_v53, 7  ;;  %vm1198_vm0 = vcmask 130048  }
 0x130   : > { %972 = vmatpush1.bf16.msra.mxu0 %v5986_v12  ;;  %v837_v25 = vld [vmem:[#allocation6] sm:$0xff]  ;;  %v838_v26 = vld [vmem:[#allocation6 + $0x8] sm:$0xff]  ;;  %v6004_v28 = vld [vmem:[%s7255_s15 + $0x70] ss:$8 sps:$4 sm:$0xff]   ;;  %vm1288_vm1 = vcmask 523264   ;;  %s6741_s23 = smov 112  }
 0x131   : > { %973 = vmatprep.subr.bf16.mxu0 %v5987_v13  ;;  %v845_v29 = vadd.f32 %v837_v25, %v7330_v23  ;;  %v846_v30 = vadd.f32 %v838_v26, %v7332_v24  ;;  %v7340_v32 = vld [vmem:[#allocation2 + $0x18] sm:$0xff]  ;;  %v839_v33 = vld [vmem:[#allocation6 + $0x10] sm:$0xff]  ;;  %v7345_v38 = vld [vmem:[#allocation2 + $0x20] sm:$0xff]  ;;  %v7359_v55 = vsub.s32 0, %v880_v54  ;;  %v7366_v57 = vsub.s32 1, %v880_v54  ;;  %s9013_s18 = sld [smem:[#allocation59_spill]] }
 0x132   : > { %v840_v34 = vld [vmem:[#allocation6 + $0x18] sm:$0xff]  ;;  %v847_v36 = vadd.f32 %v839_v33, %v7338_v31  ;;  %v7347_v39 = vld [vmem:[#allocation2 + $0x28] sm:$0xff]  ;;  %v841_v40 = vld [vmem:[#allocation6 + $0x20] sm:$0xff]  ;;  %s6742_s20 = smov 96   ;;  %s6743_s15 = smov 80   ;;  %vm3704_vm2 = vcmask 261120  }
 0x133   : > { %v853_v35 = vpack.c.bf16 %v846_v30, %v845_v29  ;;  %v848_v37 = vadd.f32 %v840_v34, %v7340_v32  ;;  %v842_v41 = vld [vmem:[#allocation6 + $0x28] sm:$0xff]  ;;  %v849_v43 = vadd.f32 %v841_v40, %v7345_v38  ;;  %v7352_v46 = vld [vmem:[#allocation2 + $0x30] sm:$0xff]  ;;  %v7354_v47 = vld [vmem:[#allocation2 + $0x38] sm:$0xff]  ;;  %9010 = vst [vmem:[#allocation32_spill] sm:$0xff] %v7359_v55  ;;  %s6744_s2 = smov 64   ;;  %s6745_s9 = smov 48  }
 0x134   : > { %974 = vmatpush1.bf16.msra.mxu0 %v5989_v14  ;;  %v850_v44 = vadd.f32 %v842_v41, %v7347_v39  ;;  %v843_v48 = vld [vmem:[#allocation6 + $0x30] sm:$0xff]  ;;  %v844_v49 = vld [vmem:[#allocation6 + $0x38] sm:$0xff]  ;;  %v877_v56 = vld [vmem:[%s786_s13] sm:$0x3]  ;;  %9012 = vst [vmem:[#allocation33_spill] sm:$0xff] %v7366_v57  ;;  %s6746_s13 = smov 32  }
 0x135   : > { %975 = vmatprep.subr.bf16.mxu0 %v5990_v15  ;;  %v854_v42 = vpack.c.bf16 %v848_v37, %v847_v36  ;;  %v851_v50 = vadd.f32 %v843_v48, %v7352_v46  ;;  %v852_v51 = vadd.f32 %v844_v49, %v7354_v47  ;;  %v882_v58 = vrot.slane %v877_v56, %v7359_v55  ;;  %s6747_s8 = smov 16   ;;  %p5148_p5 = scmp.ne.s32.totalorder %s6711_s19, 1 }
 0x136   : > { %v855_v45 = vpack.c.bf16 %v850_v44, %v849_v43  ;;  %v886_v60 = vrot.slane %v877_v56, %v7366_v57  ;;  %vm3713_vm3 = vcmask 392192   ;;  %vm3730_vm4 = vcmask 654336  }
 0x137   : > { %v856_v52 = vpack.c.bf16 %v852_v51, %v851_v50  ;;  %s9014_s21 = scalar_lea.vmem %s9013_s18, %s7263_s7  ;;  %vm3739_vm5 = vcmask 785408   ;;  %vm3748_vm6 = vcmask 916480  }
 0x138   : > { %976 = vmatpush1.bf16.msra.mxu0 %v5992_v16 }
 0x139   : > { %977 = vmatprep.subr.bf16.mxu0 %v5993_v17 }
 0x13c   : > { %978 = vmatpush1.bf16.msra.mxu0 %v5995_v18 }
 0x13d   : > { %979 = vmatprep.subr.bf16.mxu0 %v5996_v19 }
 0x140   : > { %980 = vmatpush1.bf16.msra.mxu0 %v5998_v20 }
 0x141   : > { %981 = vmatprep.subr.bf16.mxu0 %v5999_v21 }
 0x144   : > { %982 = vmatpush1.bf16.msra.mxu0 %v6001_v22 }
 0x145   : > { %983 = vmatprep.subr.bf16.mxu0 %v6002_v27 }
 0x148   : > { %984 = vmatpush1.bf16.msra.mxu0 %v6004_v28 }
 0x14b   : > { %1002 = vmatmul.mubr.bf16.vlgmr.msra.gmra.mrb[0].mxu0 %v853_v35 }
 0x14c   : > { %1011 = vmatprep.mubr.bf16.mxu0 %v8925_v10 }
 0x153   : > { %1012 = vmatmul.mubr.bf16.gmra.mrb[4].mxu0 %v854_v42 }
 0x154   : > { %1021 = vmatprep.mubr.bf16.mxu0 %v8925_v10 }
 0x15b   : > { %1022 = vmatmul.mubr.bf16.gmra.mrb[8].mxu0 %v855_v45 }
 0x15c   : > { %1031 = vmatprep.mubr.bf16.mxu0 %v8925_v10 }
 0x163   : > { %1032 = vmatmul.mubr.bf16.gmra.mrb[12].mxu0 %v856_v52 }
 0x21e   : > { %v1003_v59 = vpop.f32.mrb[0].mxu0 }
 0x21f   : > { %v1004_v61 = vadd.f32 %v1003_v59, %v882_v58  ;;  %v1005_v62 = vpop.f32.mrb[1].mxu0 }
 0x220   : > { %v1007_v63 = vpop.f32.mrb[2].mxu0  ;;  %v1006_v2 = vadd.f32 %v1005_v62, %v886_v60  ;;  %v6007_v62 = vld [vmem:[%s7296_s14 + $0x10] sm:$0xff]  }
 0x221   : > { %v1008_v0 = vadd.f32 %v1007_v63, %v882_v58  ;;  %v1009_v1 = vpop.f32.mrb[3].mxu0  ;;  %v1178_v4 = vmul.f32 0.25, %v1004_v61  ;;  %v857_v61 = vpack.c.bf16 %v7332_v24, %v7330_v23  ;;  %v6008_v63 = vld [vmem:[%s7296_s14 + $0x18] sm:$0xff]   ;;  %v858_v24 = vpack.c.bf16 %v7340_v32, %v7338_v31 }
 0x222   : > { %v1010_v3 = vadd.f32 %v1009_v1, %v886_v60  ;;  %v6010_v1 = vld [vmem:[%s7296_s14 + $0x28] sm:$0xff]   ;;  %v6012_v23 = vld [vmem:[%s7296_s14 + $0x38] sm:$0xff]  }
 0x223   : > { %v1179_v5 = vmul.f32 0.25, %v1008_v0  ;;  %5369 = vmatprep.mubr.bf16.mxu1 %v857_v61  ;;  %v6009_v0 = vld [vmem:[%s7296_s14 + $0x20] sm:$0xff]  }
 0x224   : > { %v7370_v6 = vpack.c.bf16 %v1010_v3, %v1006_v2  ;;  %v6011_v2 = vld [vmem:[%s7296_s14 + $0x30] sm:$0xff]   ;;  %v859_v3 = vpack.c.bf16 %v7347_v39, %v7345_v38 }
 0x225   : > { %v7372_v7 = vpack.c.bf16 %v1179_v5, %v1178_v4  ;;  %v860_v4 = vpack.c.bf16 %v7354_v47, %v7352_v46 }
 0x226   : > { %v1013_v8 = vpop.f32.mrb[4].mxu0  ;;  %5657 = vmatprep.subr.msk.bf16.mxu0 %vm1198_vm0, %v7370_v6  ;;  %v1212_v9 = vsel %vm1198_vm0, %v7370_v6, 0 }
 0x227   : > { %v1014_v11 = vadd.f32 %v1013_v8, %v882_v58  ;;  %v1015_v12 = vpop.f32.mrb[5].mxu0  ;;  %5378 = vmatpush3.bf16.xpose.msra.mxu0 %v1212_v9  ;;  %5385 = vmatprep.mubr.msk.bf16.mxu0 %vm1198_vm0, %v7372_v7 }
 0x228   : > { %v1017_v13 = vpop.f32.mrb[6].mxu0  ;;  %v1016_v16 = vadd.f32 %v1015_v12, %v886_v60 }
 0x229   : > { %v1018_v14 = vadd.f32 %v1017_v13, %v882_v58  ;;  %v1019_v15 = vpop.f32.mrb[7].mxu0  ;;  %v1180_v18 = vmul.f32 0.25, %v1014_v11 }
 0x22a   : > { %v1020_v17 = vadd.f32 %v1019_v15, %v886_v60 }
 0x22b   : > { %v1181_v19 = vmul.f32 0.25, %v1018_v14 }
 0x22c   : > { %v7380_v20 = vpack.c.bf16 %v1020_v17, %v1016_v16 }
 0x22d   : > { %v7382_v21 = vpack.c.bf16 %v1181_v19, %v1180_v18 }
 0x22e   : > { %v1023_v22 = vpop.f32.mrb[8].mxu0  ;;  %5658 = vmatprep.subr.msk.bf16.mxu0 %vm1198_vm0, %v7380_v20  ;;  %v1215_v25 = vsel %vm1198_vm0, %v7380_v20, 0 }
 0x22f   : > { %v1024_v26 = vadd.f32 %v1023_v22, %v882_v58  ;;  %v1025_v27 = vpop.f32.mrb[9].mxu0  ;;  %5380 = vmatpush3.bf16.xpose.msra.mxu0 %v1215_v25 }
 0x230   : > { %v1027_v28 = vpop.f32.mrb[10].mxu0  ;;  %v1026_v33 = vadd.f32 %v1025_v27, %v886_v60 }
 0x231   : > { %v1028_v29 = vadd.f32 %v1027_v28, %v882_v58  ;;  %v1029_v30 = vpop.f32.mrb[11].mxu0  ;;  %v1182_v35 = vmul.f32 0.25, %v1024_v26 }
 0x232   : > { %v1030_v34 = vadd.f32 %v1029_v30, %v886_v60 }
 0x233   : > { %v1183_v36 = vmul.f32 0.25, %v1028_v29 }
 0x234   : > { %v7388_v37 = vpack.c.bf16 %v1030_v34, %v1026_v33 }
 0x235   : > { %v7390_v40 = vpack.c.bf16 %v1183_v36, %v1182_v35  ;;  %v5033_v36 = vld [vmem:[%s9014_s21] ss:$0 sm:$0xff] }
 0x236   : > { %v1033_v41 = vpop.f32.mrb[12].mxu0  ;;  %5659 = vmatprep.subr.msk.bf16.mxu0 %vm1198_vm0, %v7388_v37  ;;  %v1218_v42 = vsel %vm1198_vm0, %v7388_v37, 0 }
 0x237   : > { %v1034_v43 = vadd.f32 %v1033_v41, %v882_v58  ;;  %v1035_v44 = vpop.f32.mrb[13].mxu0  ;;  %5382 = vmatpush3.bf16.xpose.msra.mxu0 %v1218_v42 }
 0x238   : > { %v1037_v45 = vpop.f32.mrb[14].mxu0  ;;  %v1036_v50 = vadd.f32 %v1035_v44, %v886_v60 }
 0x239   : > { %v1038_v48 = vadd.f32 %v1037_v45, %v882_v58  ;;  %v1039_v49 = vpop.f32.mrb[15].mxu0  ;;  %v1184_v52 = vmul.f32 0.25, %v1034_v43  ;;  %v6005_v58 = vld [vmem:[%s7296_s14] sm:$0xff]  }
 0x23a   : > { %v1040_v51 = vadd.f32 %v1039_v49, %v886_v60  ;;  %v6006_v60 = vld [vmem:[%s7296_s14 + $0x8] sm:$0xff]   ;;  %5353 = vmatprep.subr.bf16.mxu1 %v6005_v58 }
 0x23b   : > { %v1185_v53 = vmul.f32 0.25, %v1038_v48  ;;  %5354 = vmatpush3.bf16.msra.mxu1 %v6005_v58 }
 0x23c   : > { %v7396_v54 = vpack.c.bf16 %v1040_v51, %v1036_v50  ;;  %5355 = vmatprep.subr.bf16.mxu1 %v6006_v60 }
 0x23d   : > { %v7398_v56 = vpack.c.bf16 %v1185_v53, %v1184_v52 }
 0x23e   : > { %5660 = vmatprep.subr.msk.bf16.mxu0 %vm1198_vm0, %v7396_v54  ;;  %v1221_v59 = vsel %vm1198_vm0, %v7396_v54, 0 }
 0x23f   : > { %5384 = vmatpush3.bf16.xpose.msra.mxu0 %v1221_v59  ;;  %5356 = vmatpush3.bf16.msra.mxu1 %v6006_v60 }
 0x240   : > { %5357 = vmatprep.subr.bf16.mxu1 %v6007_v62 }
 0x243   : > { %5358 = vmatpush3.bf16.msra.mxu1 %v6007_v62 }
 0x244   : > { %5359 = vmatprep.subr.bf16.mxu1 %v6008_v63 }
 0x246   : > { %5386 = vmatmul.mubr.msk.bf16.vlgmr.msra.gmra.mrb[16].mxu0 %vm1198_vm0, %v7382_v21 }
 0x247   : > { %5389 = vmatprep.mubr.msk.bf16.mxu0 %vm1198_vm0, %v7390_v40  ;;  %5360 = vmatpush3.bf16.msra.mxu1 %v6008_v63 }
 0x248   : > { %5361 = vmatprep.subr.bf16.mxu1 %v6009_v0 }
 0x24b   : > { %5362 = vmatpush3.bf16.msra.mxu1 %v6009_v0 }
 0x24c   : > { %5363 = vmatprep.subr.bf16.mxu1 %v6010_v1 }
 0x24e   : > { %5390 = vmatmul.mubr.msk.bf16.gmra.mrb[20].mxu0 %vm1198_vm0, %v7398_v56 }
 0x24f   : > { %5364 = vmatpush3.bf16.msra.mxu1 %v6010_v1 }
 0x250   : > { %5365 = vmatprep.subr.bf16.mxu1 %v6011_v2 }
 0x253   : > { %5366 = vmatpush3.bf16.msra.mxu1 %v6011_v2 }
 0x254   : > { %5367 = vmatprep.subr.bf16.mxu1 %v6012_v23 }
 0x257   : > { %5368 = vmatpush3.bf16.msra.mxu1 %v6012_v23 }
 0x25a   : > { %5370 = vmatmul.mubr.bf16.vlgmr.msra.gmra.mrb[0].mxu1 %v858_v24 }
 0x25b   : > { %5373 = vmatprep.mubr.bf16.mxu1 %v859_v3 }
 0x262   : > { %5374 = vmatmul.mubr.bf16.gmra.mrb[4].mxu1 %v860_v4 }
 0x319   : > { %v5387_v5 = vpop.f32.mrb[16].mxu0 }
 0x31a   : > { %v1257_v8 = vpop.f32.mrb[17].mxu0  ;;  %v1295_v9 = vsel %vm1288_vm1, %v5387_v5, -inf }
 0x31b   : > { %1296 = vmax.xlane.f32.xlu1 %v1295_v9  ;;  %v5388_v11 = vpop.f32.mrb[18].mxu0  ;;  %v1289_v12 = vsel %vm1288_vm1, %v1257_v8, -inf }
 0x31c   : > { %1290 = vmax.xlane.f32.xlu0 %v1289_v12  ;;  %v1260_v31 = vpop.f32.mrb[19].mxu0  ;;  %v1298_v32 = vsel %vm1288_vm1, %v5388_v11, -inf }
 0x31d   : > { %v1292_v38 = vsel %vm1288_vm1, %v1260_v31, -inf }
 0x31f   : > { %1299 = vmax.xlane.f32.xlu1 %v1298_v32 }
 0x320   : > { %1293 = vmax.xlane.f32.xlu0 %v1292_v38 }
 0x321   : > { %v7430_v39 = vpop.f32.mrb[20].mxu0 }
 0x322   : > { %v7432_v46 = vpop.f32.mrb[21].mxu0  ;;  %v1307_v16 = vsel %vm1288_vm1, %v7430_v39, -inf }
 0x323   : > { %v7434_v47 = vpop.f32.mrb[22].mxu0  ;;  %v1301_v13 = vsel %vm1288_vm1, %v7432_v46, -inf }
 0x324   : > { %1302 = vmax.xlane.f32.xlu0 %v1301_v13  ;;  %v7438_v14 = vpop.f32.mrb[23].mxu0  ;;  %v1310_v15 = vsel %vm1288_vm1, %v7434_v47, -inf }
 0x325   : > { %1311 = vmax.xlane.f32.xlu1 %v1310_v15  ;;  %v1304_v17 = vsel %vm1288_vm1, %v7438_v14, -inf }
 0x328   : > { %1308 = vmax.xlane.f32.xlu0 %v1307_v16 }
 0x329   : > { %1305 = vmax.xlane.f32.xlu1 %v1304_v17 }
 0x32d   : > { %v5371_v41 = vpop.f32.mrb[0].mxu1 }
 0x32e   : > { %v1156_v42 = vadd.f32 %v5371_v41, %v5033_v36  ;;  %v1147_v43 = vpop.f32.mrb[1].mxu1 }
 0x32f   : > { %v1148_v44 = vadd.f32 %v5033_v36, %v1147_v43  ;;  %v5372_v45 = vpop.f32.mrb[2].mxu1 }
 0x330   : > { %v1159_v48 = vadd.f32 %v5372_v45, %v5033_v36  ;;  %v1150_v49 = vpop.f32.mrb[3].mxu1 }
 0x331   : > { %v1151_v51 = vadd.f32 %v5033_v36, %v1150_v49 }
 0x332   : > { %v7459_v53 = vpack.c.bf16 %v1159_v48, %v1156_v42 }
 0x333   : > { %v7463_v58 = vpack.c.bf16 %v1151_v51, %v1148_v44 }
 0x335   : > { %v5375_v61 = vpop.f32.mrb[4].mxu1  ;;  %5393 = vmatprep.subr.bf16.mxu1 %v7463_v58 }
 0x336   : > { %v1172_v0 = vadd.f32 %v5375_v61, %v5033_v36  ;;  %v1163_v1 = vpop.f32.mrb[5].mxu1  ;;  %5394 = vmatpush3.bf16.msra.mxu1 %v7463_v58 }
 0x337   : > { %v1164_v23 = vadd.f32 %v5033_v36, %v1163_v1  ;;  %v5376_v24 = vpop.f32.mrb[6].mxu1  ;;  %5395 = vmatprep.subr.bf16.mxu1 %v7459_v53 }
 0x338   : > { %v1175_v3 = vadd.f32 %v5376_v24, %v5033_v36  ;;  %v1166_v4 = vpop.f32.mrb[7].mxu1 }
 0x33a   : > { %1476 = vrot.lane.b32.xlu1 %v7380_v20, %s6741_s23  ;;  %v7478_v9 = vpack.c.bf16 %v1175_v3, %v1172_v0  ;;  %5396 = vmatpush3.bf16.msra.mxu1 %v7459_v53 }
 0x33e   : > { %1478 = vrot.lane.b32.xlu1 %v7388_v37, %s6741_s23 }
 0x3a8   : > { %v1297_v18 = vpop.xlane.xlu1 %1296 }
 0x3a9   : > { %v1315_v19 = vsub.f32 %v5387_v5, %v1297_v18  ;;  %v1291_v22 = vpop.xlane.xlu0 %1290  ;;  %v1167_v5 = vadd.f32 %v5033_v36, %v1166_v4 }
 0x3aa   : > { %v1313_v25 = vsub.f32 %v1257_v8, %v1291_v22 }
 0x3ab   : > { %v1325_v26 = vmul.f32 1.442695, %v1315_v19 }
 0x3ac   : > { %v1321_v27 = vmul.f32 1.442695, %v1313_v25  ;;  %v1300_v28 = vpop.xlane.xlu1 %1299 }
 0x3ad   : > { %6061 = vpow2.f32 %v1325_v26  ;;  %v1316_v29 = vsub.f32 %v5388_v11, %v1300_v28  ;;  %v1294_v30 = vpop.xlane.xlu0 %1293  ;;  %v7481_v11 = vpack.c.bf16 %v1167_v5, %v1164_v23 }
 0x3ae   : > { %v1314_v33 = vsub.f32 %v1260_v31, %v1294_v30  ;;  %6063 = vpow2.f32 %v1321_v27 }
 0x3af   : > { %v1327_v34 = vmul.f32 1.442695, %v1316_v29  ;;  %5397 = vmatprep.subr.bf16.mxu1 %v7481_v11 }
 0x3b0   : > { %v1323_v35 = vmul.f32 1.442695, %v1314_v33  ;;  %5398 = vmatpush3.bf16.msra.mxu1 %v7481_v11 }
 0x3b1   : > { %6065 = vpow2.f32 %v1327_v34  ;;  %5399 = vmatprep.subr.bf16.mxu1 %v7478_v9  ;;  %v1303_v12 = vpop.xlane.xlu0 %1302 }
 0x3b2   : > { %6067 = vpow2.f32 %v1323_v35  ;;  %v1312_v32 = vpop.xlane.xlu1 %1311  ;;  %v1317_v13 = vsub.f32 %v7432_v46, %v1303_v12 }
 0x3b3   : > { %v1320_v15 = vsub.f32 %v7434_v47, %v1312_v32 }
 0x3b4   : > { %5400 = vmatpush3.bf16.msra.mxu1 %v7478_v9  ;;  %v1329_v18 = vmul.f32 1.442695, %v1317_v13 }
 0x3b5   : > { %v1309_v31 = vpop.xlane.xlu0 %1308  ;;  %v1335_v19 = vmul.f32 1.442695, %v1320_v15 }
 0x3b6   : > { %v1319_v38 = vsub.f32 %v7430_v39, %v1309_v31  ;;  %v1306_v17 = vpop.xlane.xlu1 %1305 }
 0x3b7   : > { %v7455_v50 = vpop.eup %6061  ;;  %v1318_v22 = vsub.f32 %v7438_v14, %v1306_v17 }
 0x3b8   : > { %v1343_v52 = vsel %vm1288_vm1, %v7455_v50, 0.0  ;;  %v7461_v59 = vpop.eup %6063  ;;  %v1333_v16 = vmul.f32 1.442695, %v1319_v38 }
 0x3b9   : > { %1344 = vadd.xlane.f32.xlu0 %v1343_v52  ;;  %v1337_v62 = vsel %vm1288_vm1, %v7461_v59, 0.0  ;;  %v1331_v25 = vmul.f32 1.442695, %v1318_v22 }
 0x3ba   : > { %6069 = vpow2.f32 %v1333_v16  ;;  %v1477_v30 = vpop.permute.xlu1 %1476 }
 0x3bb   : > { %v7465_v60 = vpop.eup %6065  ;;  %6071 = vpow2.f32 %v1329_v18  ;;  %v1498_v24 = vsel %vm1198_vm0, %v1477_v30, 0 }
 0x3bc   : > { %v1346_v63 = vsel %vm1288_vm1, %v7465_v60, 0.0  ;;  %v7473_v2 = vpop.eup %6067  ;;  %6073 = vpow2.f32 %v1335_v19 }
 0x3bd   : > { %1338 = vadd.xlane.f32.xlu0 %v1337_v62  ;;  %1347 = vadd.xlane.f32.xlu1 %v1346_v63  ;;  %v1340_v8 = vsel %vm1288_vm1, %v7473_v2, 0.0  ;;  %6075 = vpow2.f32 %v1331_v25 }
 0x3be   : > { %v1479_v33 = vpop.permute.xlu1 %1478 }
 0x3c1   : > { %1341 = vadd.xlane.f32.xlu1 %v1340_v8 }
 0x3c4   : > { %v7495_v26 = vpop.eup %6069 }
 0x3c5   : > { %v7497_v27 = vpop.eup %6071  ;;  %v1355_v39 = vsel %vm1288_vm1, %v7495_v26, 0.0 }
 0x3c6   : > { %v7501_v46 = vpop.eup %6073  ;;  %v1349_v47 = vsel %vm1288_vm1, %v7497_v27, 0.0 }
 0x3c7   : > { %v1358_v14 = vsel %vm1288_vm1, %v7501_v46, 0.0  ;;  %v7507_v28 = vpop.eup %6075 }
 0x3c8   : > { %v1352_v29 = vsel %vm1288_vm1, %v7507_v28, 0.0 }
 0x3d2   : > { %1764 = vrot.lane.b32.xlu1 %v7370_v6, %s6742_s20 }
 0x3d3   : > { %1474 = vrot.lane.b32.xlu0 %v7370_v6, %s6741_s23 }
 0x3f2   : > { %1356 = vadd.xlane.f32.xlu0 %v1355_v39 }
 0x3f6   : > { %1350 = vadd.xlane.f32.xlu0 %v1349_v47  ;;  %1359 = vadd.xlane.f32.xlu1 %v1358_v14 }
 0x3fa   : > { %1353 = vadd.xlane.f32.xlu1 %v1352_v29 }
 0x40b   : > { %1766 = vrot.lane.b32.xlu1 %v7380_v20, %s6742_s20 }
 0x40c   : > { %1480 = vrot.lane.b32.xlu0 %v7396_v54, %s6741_s23 }
 0x40f   : > { %1464 = vrot.lane.b32.xlu1 %v7382_v21, %s6741_s23 }
 0x410   : > { %1462 = vrot.lane.b32.xlu0 %v7372_v7, %s6741_s23 }
 0x413   : > { %1466 = vrot.lane.b32.xlu1 %v7390_v40, %s6741_s23 }
 0x414   : > { %1768 = vrot.lane.b32.xlu0 %v7388_v37, %s6742_s20 }
 0x417   : > { %1770 = vrot.lane.b32.xlu1 %v7396_v54, %s6742_s20 }
 0x418   : > { %1468 = vrot.lane.b32.xlu0 %v7398_v56, %s6741_s23 }
 0x41b   : > { %1758 = vrot.lane.b32.xlu1 %v7382_v21, %s6742_s20 }
 0x41c   : > { %1756 = vrot.lane.b32.xlu0 %v7372_v7, %s6742_s20 }
 0x41f   : > { %1762 = vrot.lane.b32.xlu1 %v7398_v56, %s6742_s20 }
 0x420   : > { %1760 = vrot.lane.b32.xlu0 %v7390_v40, %s6742_s20 }
 0x446   : > { %v1345_v34 = vpop.xlane.xlu0 %1344 }
 0x44a   : > { %v1339_v35 = vpop.xlane.xlu0 %1338  ;;  %v1348_v36 = vpop.xlane.xlu1 %1347 }
 0x44b   : > { %6077 = vrcp.f32 %v1348_v36 }
 0x44c   : > { %6079 = vrcp.f32 %v1339_v35 }
 0x44d   : > { %6081 = vrcp.f32 %v1345_v34 }
 0x44e   : > { %v1475_v41 = vpop.permute.xlu0 %1474  ;;  %v1342_v42 = vpop.xlane.xlu1 %1341 }
 0x44f   : > { %6083 = vrcp.f32 %v1342_v42  ;;  %5661 = vmatprep.subr.msk.bf16.mxu1 %vm1198_vm0, %v1475_v41  ;;  %v1495_v23 = vsel %vm1198_vm0, %v1475_v41, 0 }
 0x452   : > { %v1765_v43 = vpop.permute.xlu1 %1764 }
 0x453   : > { %5665 = vmatprep.subr.msk.bf16.mxu0 %vm1198_vm0, %v1765_v43  ;;  %v1785_v44 = vsel %vm1198_vm0, %v1765_v43, 0 }
 0x454   : > { %5442 = vmatpush3.bf16.xpose.msra.mxu0 %v1785_v44 }
 0x455   : > { %v6078_v45 = vpop.eup %6077 }
 0x456   : > { %v6080_v48 = vpop.eup %6079  ;;  %v1372_v52 = vmul.f32 %v6078_v45, %v7465_v60 }
 0x457   : > { %v6082_v49 = vpop.eup %6081  ;;  %v1369_v61 = vmul.f32 %v6080_v48, %v7461_v59  ;;  %v1501_v59 = vsel %vm1198_vm0, %v1479_v33, 0 }
 0x458   : > { %v1371_v63 = vmul.f32 %v6082_v49, %v7455_v50 }
 0x459   : > { %v6084_v51 = vpop.eup %6083 }
 0x45a   : > { %v1370_v62 = vmul.f32 %v6084_v51, %v7473_v2  ;;  %v1378_v1 = vpack.c.bf16 %v1372_v52, %v1371_v63 }
 0x45c   : > { %v1377_v0 = vpack.c.bf16 %v1370_v62, %v1369_v61 }
 0x45e   : > { %5401 = vmatprep.mubr.msk.bf16.mxu1 %vm1288_vm1, %v1377_v0 }
 0x45f   : > { %5402 = vmatmul.mubr.msk.bf16.vlgmr.msra.gmra.mrb[8].mxu1 %vm1288_vm1, %v1378_v1 }
 0x460   : > { %5410 = vmatpush3.bf16.xpose.msra.mxu1 %v1495_v23 }
 0x461   : > { %5662 = vmatprep.subr.msk.bf16.mxu1 %vm1198_vm0, %v1477_v30 }
 0x468   : > { %5412 = vmatpush3.bf16.xpose.msra.mxu1 %v1498_v24 }
 0x469   : > { %5663 = vmatprep.subr.msk.bf16.mxu1 %vm1198_vm0, %v1479_v33 }
 0x470   : > { %5414 = vmatpush3.bf16.xpose.msra.mxu1 %v1501_v59 }
 0x47f   : > { %v1357_v50 = vpop.xlane.xlu0 %1356 }
 0x483   : > { %v1351_v60 = vpop.xlane.xlu0 %1350  ;;  %v1360_v2 = vpop.xlane.xlu1 %1359 }
 0x484   : > { %6085 = vrcp.f32 %v1360_v2 }
 0x485   : > { %6087 = vrcp.f32 %v1351_v60 }
 0x486   : > { %6089 = vrcp.f32 %v1357_v50 }
 0x487   : > { %v1481_v3 = vpop.permute.xlu0 %1480  ;;  %v1354_v4 = vpop.xlane.xlu1 %1353 }
 0x488   : > { %6091 = vrcp.f32 %v1354_v4  ;;  %5664 = vmatprep.subr.msk.bf16.mxu1 %vm1198_vm0, %v1481_v3  ;;  %v1504_v5 = vsel %vm1198_vm0, %v1481_v3, 0 }
 0x489   : > { %5416 = vmatpush3.bf16.xpose.msra.mxu1 %v1504_v5 }
 0x48b   : > { %v1463_v8 = vpop.permute.xlu0 %1462  ;;  %v1767_v12 = vpop.permute.xlu1 %1766 }
 0x48c   : > { %5666 = vmatprep.subr.msk.bf16.mxu0 %vm1198_vm0, %v1767_v12  ;;  %v1788_v31 = vsel %vm1198_vm0, %v1767_v12, 0 }
 0x48d   : > { %5444 = vmatpush3.bf16.xpose.msra.mxu0 %v1788_v31 }
 0x48e   : > { %v6086_v32 = vpop.eup %6085 }
 0x48f   : > { %v1769_v38 = vpop.permute.xlu0 %1768  ;;  %v1465_v13 = vpop.permute.xlu1 %1464  ;;  %v1376_v18 = vmul.f32 %v6086_v32, %v7501_v46 }
 0x490   : > { %v6088_v15 = vpop.eup %6087  ;;  %5667 = vmatprep.subr.msk.bf16.mxu0 %vm1198_vm0, %v1769_v38  ;;  %v1791_v47 = vsel %vm1198_vm0, %v1769_v38, 0 }
 0x491   : > { %v6090_v16 = vpop.eup %6089  ;;  %v1373_v25 = vmul.f32 %v6088_v15, %v7497_v27 }
 0x492   : > { %v6092_v17 = vpop.eup %6091  ;;  %v1375_v14 = vmul.f32 %v6090_v16, %v7495_v26 }
 0x493   : > { %v1469_v19 = vpop.permute.xlu0 %1468  ;;  %v1467_v22 = vpop.permute.xlu1 %1466  ;;  %v1374_v39 = vmul.f32 %v6092_v17, %v7507_v28 }
 0x494   : > { %v1380_v30 = vpack.c.bf16 %v1376_v18, %v1375_v14 }
 0x495   : > { %5446 = vmatpush3.bf16.xpose.msra.mxu0 %v1791_v47  ;;  %v1379_v29 = vpack.c.bf16 %v1374_v39, %v1373_v25 }
 0x497   : > { %v1757_v33 = vpop.permute.xlu0 %1756  ;;  %5405 = vmatprep.mubr.msk.bf16.mxu1 %vm1288_vm1, %v1379_v29  ;;  %v1771_v34 = vpop.permute.xlu1 %1770 }
 0x498   : > { %5406 = vmatmul.mubr.msk.bf16.gmra.mrb[12].mxu1 %vm1288_vm1, %v1380_v30  ;;  %5668 = vmatprep.subr.msk.bf16.mxu0 %vm1198_vm0, %v1771_v34  ;;  %v1794_v27 = vsel %vm1198_vm0, %v1771_v34, 0 }
 0x499   : > { %5449 = vmatprep.mubr.msk.bf16.mxu0 %vm1198_vm0, %v1757_v33  ;;  %5417 = vmatprep.mubr.msk.bf16.mxu1 %vm1198_vm0, %v1463_v8 }
 0x49b   : > { %v1759_v26 = vpop.permute.xlu1 %1758  ;;  %v1761_v46 = vpop.permute.xlu0 %1760 }
 0x49d   : > { %5448 = vmatpush3.bf16.xpose.msra.mxu0 %v1794_v27 }
 0x49f   : > { %v1763_v28 = vpop.permute.xlu1 %1762 }
 0x4a0   : > { %5418 = vmatmul.mubr.msk.bf16.vlgmr.msra.gmra.mrb[16].mxu1 %vm1198_vm0, %v1465_v13 }
 0x4a1   : > { %5421 = vmatprep.mubr.msk.bf16.mxu1 %vm1198_vm0, %v1467_v22 }
 0x4a4   : > { %5450 = vmatmul.mubr.msk.bf16.vlgmr.msra.gmra.mrb[24].mxu0 %vm1198_vm0, %v1759_v26 }
 0x4a5   : > { %5453 = vmatprep.mubr.msk.bf16.mxu0 %vm1198_vm0, %v1761_v46 }
 0x4a8   : > { %5422 = vmatmul.mubr.msk.bf16.gmra.mrb[20].mxu1 %vm1198_vm0, %v1469_v19 }
 0x4ac   : > { %5454 = vmatmul.mubr.msk.bf16.gmra.mrb[28].mxu0 %vm1198_vm0, %v1763_v28 }
 0x532   : > { %v7571_v35 = vpop.f32.mrb[8].mxu1 }
 0x533   : > { %9015 = vst [vmem:[#allocation34_spill] sm:$0xff] %v7571_v35  ;;  %v7573_v36 = vpop.f32.mrb[9].mxu1 }
 0x534   : > { %9016 = vst [vmem:[#allocation35_spill] sm:$0xff] %v7573_v36  ;;  %v7575_v41 = vpop.f32.mrb[10].mxu1 }
 0x535   : > { %9017 = vst [vmem:[#allocation36_spill] sm:$0xff] %v7575_v41  ;;  %v7577_v42 = vpop.f32.mrb[11].mxu1 }
 0x536   : > { %9018 = vst [vmem:[#allocation37_spill] sm:$0xff] %v7577_v42 }
 0x56b   : > { %v7579_v43 = vpop.f32.mrb[12].mxu1 }
 0x56c   : > { %9019 = vst [vmem:[#allocation38_spill] sm:$0xff] %v7579_v43  ;;  %v7581_v44 = vpop.f32.mrb[13].mxu1 }
 0x56d   : > { %9020 = vst [vmem:[#allocation39_spill] sm:$0xff] %v7581_v44  ;;  %v7583_v45 = vpop.f32.mrb[14].mxu1 }
 0x56e   : > { %9021 = vst [vmem:[#allocation40_spill] sm:$0xff] %v7583_v45  ;;  %v7585_v48 = vpop.f32.mrb[15].mxu1 }
 0x56f   : > { %9022 = vst [vmem:[#allocation41_spill] sm:$0xff] %v7585_v48 }
 0x573   : > { %v7587_v49 = vpop.f32.mrb[16].mxu1 }
 0x574   : > { %v7589_v51 = vpop.f32.mrb[17].mxu1  ;;  %v1577_v16 = vsel %vm1288_vm1, %v7587_v49, -inf }
 0x575   : > { %v7591_v52 = vpop.f32.mrb[18].mxu1  ;;  %v1571_v18 = vsel %vm1288_vm1, %v7589_v51, -inf }
 0x576   : > { %v7593_v61 = vpop.f32.mrb[19].mxu1  ;;  %v1580_v19 = vsel %vm1288_vm1, %v7591_v52, -inf }
 0x577   : > { %v5451_v62 = vpop.f32.mrb[24].mxu0  ;;  %v1574_v17 = vsel %vm1288_vm1, %v7593_v61, -inf }
 0x578   : > { %v1830_v63 = vpop.f32.mrb[25].mxu0  ;;  %v1867_v2 = vsel %vm1288_vm1, %v5451_v62, -inf }
 0x579   : > { %v5452_v0 = vpop.f32.mrb[26].mxu0  ;;  %v1861_v1 = vsel %vm1288_vm1, %v1830_v63, -inf }
 0x57a   : > { %1862 = vmax.xlane.f32.xlu0 %v1861_v1  ;;  %v1833_v23 = vpop.f32.mrb[27].mxu0  ;;  %v1870_v5 = vsel %vm1288_vm1, %v5452_v0, -inf }
 0x57b   : > { %v7596_v24 = vpop.f32.mrb[20].mxu1  ;;  %v1864_v59 = vsel %vm1288_vm1, %v1833_v23, -inf }
 0x57c   : > { %v7599_v50 = vpop.f32.mrb[21].mxu1  ;;  %1865 = vmax.xlane.f32.xlu1 %v1864_v59  ;;  %v1589_v22 = vsel %vm1288_vm1, %v7596_v24, -inf }
 0x57d   : > { %v7601_v60 = vpop.f32.mrb[22].mxu1  ;;  %v1583_v25 = vsel %vm1288_vm1, %v7599_v50, -inf }
 0x57e   : > { %v7604_v3 = vpop.f32.mrb[23].mxu1  ;;  %1868 = vmax.xlane.f32.xlu0 %v1867_v2 }
 0x57f   : > { %v7606_v4 = vpop.f32.mrb[28].mxu0 }
 0x580   : > { %1871 = vmax.xlane.f32.xlu1 %v1870_v5  ;;  %v7609_v8 = vpop.f32.mrb[29].mxu0  ;;  %v1879_v13 = vsel %vm1288_vm1, %v7606_v4, -inf }
 0x581   : > { %v7611_v12 = vpop.f32.mrb[30].mxu0  ;;  %v1873_v31 = vsel %vm1288_vm1, %v7609_v8, -inf }
 0x582   : > { %1874 = vmax.xlane.f32.xlu0 %v1873_v31  ;;  %v7615_v32 = vpop.f32.mrb[31].mxu0  ;;  %v1882_v15 = vsel %vm1288_vm1, %v7611_v12, -inf }
 0x583   : > { %v1876_v38 = vsel %vm1288_vm1, %v7615_v32, -inf }
 0x584   : > { %1877 = vmax.xlane.f32.xlu1 %v1876_v38 }
 0x586   : > { %1880 = vmax.xlane.f32.xlu0 %v1879_v13 }
 0x588   : > { %1883 = vmax.xlane.f32.xlu1 %v1882_v15 }
 0x599   : > { %1669 = vrot.lane.b32.xlu1 %v7459_v53, %s6741_s23 }
 0x59c   : > { %1667 = vrot.lane.b32.xlu0 %v7463_v58, %s6741_s23 }
 0x5bb   : > { %1578 = vmax.xlane.f32.xlu0 %v1577_v16 }
 0x5bd   : > { %1575 = vmax.xlane.f32.xlu1 %v1574_v17 }
 0x5bf   : > { %1572 = vmax.xlane.f32.xlu0 %v1571_v18 }
 0x5c3   : > { %1581 = vmax.xlane.f32.xlu0 %v1580_v19 }
 0x5c7   : > { %1590 = vmax.xlane.f32.xlu0 %v1589_v22 }
 0x5cb   : > { %1584 = vmax.xlane.f32.xlu0 %v1583_v25 }
 0x5e1   : > { %1671 = vrot.lane.b32.xlu0 %v7481_v11, %s6741_s23 }
 0x607   : > { %v1863_v39 = vpop.xlane.xlu0 %1862 }
 0x608   : > { %v1885_v47 = vsub.f32 %v1830_v63, %v1863_v39 }
 0x609   : > { %v1866_v14 = vpop.xlane.xlu1 %1865 }
 0x60a   : > { %v1893_v29 = vmul.f32 1.442695, %v1885_v47  ;;  %v1886_v30 = vsub.f32 %v1833_v23, %v1866_v14  ;;  %v1592_v47 = vsel %vm1288_vm1, %v7601_v60, -inf }
 0x60b   : > { %v1869_v33 = vpop.xlane.xlu0 %1868 }
 0x60c   : > { %6093 = vpow2.f32 %v1893_v29  ;;  %v1895_v34 = vmul.f32 1.442695, %v1886_v30  ;;  %v1887_v27 = vsub.f32 %v5451_v62, %v1869_v33  ;;  %v1586_v33 = vsel %vm1288_vm1, %v7604_v3, -inf }
 0x60d   : > { %v1872_v26 = vpop.xlane.xlu1 %1871 }
 0x60e   : > { %6095 = vpow2.f32 %v1895_v34  ;;  %v1897_v46 = vmul.f32 1.442695, %v1887_v27  ;;  %v1888_v28 = vsub.f32 %v5452_v0, %v1872_v26 }
 0x60f   : > { %v7641_v1 = vpop.xlane.xlu0 %1874 }
 0x610   : > { %6097 = vpow2.f32 %v1897_v46  ;;  %v1899_v59 = vmul.f32 1.442695, %v1888_v28 }
 0x611   : > { %v7643_v2 = vpop.xlane.xlu1 %1877 }
 0x612   : > { %6099 = vpow2.f32 %v1899_v59 }
 0x613   : > { %v7645_v5 = vpop.xlane.xlu0 %1880 }
 0x615   : > { %v7647_v63 = vpop.xlane.xlu1 %1883 }
 0x616   : > { %v7649_v23 = vpop.eup %6093 }
 0x617   : > { %v1668_v31 = vpop.permute.xlu0 %1667  ;;  %v1909_v62 = vsel %vm1288_vm1, %v7649_v23, 0.0 }
 0x618   : > { %v7653_v38 = vpop.eup %6095  ;;  %5425 = vmatprep.subr.bf16.mxu1 %v1668_v31  ;;  %1910 = vadd.xlane.f32.xlu1 %v1909_v62 }
 0x619   : > { %5426 = vmatpush3.bf16.msra.mxu1 %v1668_v31  ;;  %v1670_v0 = vpop.permute.xlu1 %1669  ;;  %v1912_v13 = vsel %vm1288_vm1, %v7653_v38, 0.0 }
 0x61a   : > { %v7657_v15 = vpop.eup %6097  ;;  %1913 = vadd.xlane.f32.xlu0 %v1912_v13  ;;  %5427 = vmatprep.subr.bf16.mxu1 %v1670_v0 }
 0x61b   : > { %v1915_v16 = vsel %vm1288_vm1, %v7657_v15, 0.0 }
 0x61c   : > { %v7661_v17 = vpop.eup %6099 }
 0x61d   : > { %5428 = vmatpush3.bf16.msra.mxu1 %v1670_v0  ;;  %v1918_v18 = vsel %vm1288_vm1, %v7661_v17, 0.0 }
 0x61e   : > { %1916 = vadd.xlane.f32.xlu0 %v1915_v16 }
 0x622   : > { %1919 = vadd.xlane.f32.xlu0 %v1918_v18 }
 0x629   : > { %1673 = vrot.lane.b32.xlu1 %v7478_v9, %s6741_s23 }
 0x648   : > { %v1579_v19 = vpop.xlane.xlu0 %1578 }
 0x649   : > { %v1597_v22 = vsub.f32 %v7587_v49, %v1579_v19 }
 0x64a   : > { %v1576_v31 = vpop.xlane.xlu1 %1575 }
 0x64b   : > { %v1607_v25 = vmul.f32 1.442695, %v1597_v22  ;;  %v1596_v62 = vsub.f32 %v7593_v61, %v1576_v31  ;;  %v1889_v22 = vsub.f32 %v7609_v8, %v7641_v1 }
 0x64c   : > { %v1573_v39 = vpop.xlane.xlu0 %1572 }
 0x64d   : > { %6101 = vpow2.f32 %v1607_v25  ;;  %v1595_v14 = vsub.f32 %v7589_v51, %v1573_v39  ;;  %1593 = vmax.xlane.f32.xlu1 %v1592_v47  ;;  %v1605_v16 = vmul.f32 1.442695, %v1596_v62  ;;  %v1901_v39 = vmul.f32 1.442695, %v1889_v22 }
 0x64e   : > { %v1892_v47 = vsub.f32 %v7611_v12, %v7647_v63 }
 0x64f   : > { %v1603_v29 = vmul.f32 1.442695, %v1595_v14 }
 0x650   : > { %v1582_v30 = vpop.xlane.xlu0 %1581  ;;  %v1907_v8 = vmul.f32 1.442695, %v1892_v47 }
 0x651   : > { %6103 = vpow2.f32 %v1603_v29  ;;  %1587 = vmax.xlane.f32.xlu1 %v1586_v33  ;;  %v1598_v59 = vsub.f32 %v7591_v52, %v1582_v30  ;;  %v1891_v52 = vsub.f32 %v7606_v4, %v7645_v5 }
 0x653   : > { %v1609_v0 = vmul.f32 1.442695, %v1598_v59 }
 0x654   : > { %v1591_v34 = vpop.xlane.xlu0 %1590 }
 0x655   : > { %v1601_v13 = vsub.f32 %v7596_v24, %v1591_v34  ;;  %6105 = vpow2.f32 %v1609_v0  ;;  %v1905_v24 = vmul.f32 1.442695, %v1891_v52 }
 0x656   : > { %6107 = vpow2.f32 %v1605_v16 }
 0x657   : > { %v7673_v27 = vpop.eup %6101  ;;  %v1615_v19 = vmul.f32 1.442695, %v1601_v13 }
 0x658   : > { %v1585_v49 = vpop.xlane.xlu0 %1584  ;;  %v1625_v26 = vsel %vm1288_vm1, %v7673_v27, 0.0 }
 0x659   : > { %1626 = vadd.xlane.f32.xlu0 %v1625_v26  ;;  %v1599_v18 = vsub.f32 %v7599_v50, %v1585_v49  ;;  %6109 = vpow2.f32 %v1615_v19 }
 0x65b   : > { %v7677_v46 = vpop.eup %6103  ;;  %v1611_v25 = vmul.f32 1.442695, %v1599_v18 }
 0x65c   : > { %v1672_v28 = vpop.permute.xlu0 %1671  ;;  %v1619_v51 = vsel %vm1288_vm1, %v7677_v46, 0.0 }
 0x65d   : > { %1620 = vadd.xlane.f32.xlu0 %v1619_v51  ;;  %5429 = vmatprep.subr.bf16.mxu1 %v1672_v28  ;;  %6111 = vpow2.f32 %v1611_v25 }
 0x65e   : > { %5430 = vmatpush3.bf16.msra.mxu1 %v1672_v28  ;;  %6113 = vpow2.f32 %v1901_v39 }
 0x65f   : > { %v7695_v61 = vpop.eup %6105  ;;  %6115 = vpow2.f32 %v1905_v24 }
 0x660   : > { %v1628_v50 = vsel %vm1288_vm1, %v7695_v61, 0.0  ;;  %v7701_v14 = vpop.eup %6107  ;;  %6117 = vpow2.f32 %v1907_v8  ;;  %v1890_v8 = vsub.f32 %v7615_v32, %v7643_v2 }
 0x661   : > { %v1622_v4 = vsel %vm1288_vm1, %v7701_v14, 0.0 }
 0x662   : > { %1955 = vrot.lane.b32.xlu1 %v7459_v53, %s6742_s20 }
 0x663   : > { %v7703_v1 = vpop.eup %6109 }
 0x664   : > { %v1637_v63 = vsel %vm1288_vm1, %v7703_v1, 0.0 }
 0x666   : > { %1957 = vrot.lane.b32.xlu1 %v7481_v11, %s6742_s20 }
 0x667   : > { %v7707_v5 = vpop.eup %6111 }
 0x668   : > { %v1631_v12 = vsel %vm1288_vm1, %v7707_v5, 0.0  ;;  %v7713_v29 = vpop.eup %6113 }
 0x669   : > { %v1921_v30 = vsel %vm1288_vm1, %v7713_v29, 0.0  ;;  %v7717_v33 = vpop.eup %6115 }
 0x66a   : > { %v1927_v34 = vsel %vm1288_vm1, %v7717_v33, 0.0  ;;  %v7721_v49 = vpop.eup %6117 }
 0x66b   : > { %v1930_v26 = vsel %vm1288_vm1, %v7721_v49, 0.0 }
 0x673   : > { %1953 = vrot.lane.b32.xlu0 %v7463_v58, %s6742_s20 }
 0x68a   : > { %1629 = vadd.xlane.f32.xlu1 %v1628_v50 }
 0x68e   : > { %1623 = vadd.xlane.f32.xlu1 %v1622_v4  ;;  %v1903_v4 = vmul.f32 1.442695, %v1890_v8 }
 0x692   : > { %1632 = vadd.xlane.f32.xlu0 %v1631_v12  ;;  %1638 = vadd.xlane.f32.xlu1 %v1637_v63 }
 0x696   : > { %1922 = vadd.xlane.f32.xlu0 %v1921_v30 }
 0x69a   : > { %1928 = vadd.xlane.f32.xlu0 %v1927_v34 }
 0x69e   : > { %1931 = vadd.xlane.f32.xlu0 %v1930_v26 }
 0x6a5   : > { %v7725_v28 = vpop.xlane.xlu1 %1910 }
 0x6a7   : > { %v7733_v59 = vpop.xlane.xlu0 %1913 }
 0x6a9   : > { %v1674_v51 = vpop.permute.xlu1 %1673 }
 0x6aa   : > { %5431 = vmatprep.subr.bf16.mxu1 %v1674_v51 }
 0x6ab   : > { %5432 = vmatpush3.bf16.msra.mxu1 %v1674_v51  ;;  %v7736_v0 = vpop.xlane.xlu0 %1916 }
 0x6af   : > { %v7739_v22 = vpop.xlane.xlu0 %1919 }
 0x6b4   : > { %2050 = vrot.lane.b32.xlu0 %v7370_v6, %s6743_s15 }
 0x6b8   : > { %2042 = vrot.lane.b32.xlu0 %v7372_v7, %s6743_s15 }
 0x6bc   : > { %2046 = vrot.lane.b32.xlu0 %v7390_v40, %s6743_s15 }
 0x6da   : > { %v1594_v31 = vpop.xlane.xlu1 %1593 }
 0x6db   : > { %v1602_v62 = vsub.f32 %v7601_v60, %v1594_v31 }
 0x6dd   : > { %v1617_v13 = vmul.f32 1.442695, %v1602_v62 }
 0x6de   : > { %v1588_v16 = vpop.xlane.xlu1 %1587 }
 0x6df   : > { %6119 = vpow2.f32 %v1617_v13  ;;  %v1600_v18 = vsub.f32 %v7604_v3, %v1588_v16 }
 0x6e1   : > { %v1613_v19 = vmul.f32 1.442695, %v1600_v18 }
 0x6e2   : > { %v1956_v3 = vpop.permute.xlu1 %1955 }
 0x6e3   : > { %6121 = vpow2.f32 %v1613_v19 }
 0x6e4   : > { %6123 = vpow2.f32 %v1903_v4 }
 0x6e6   : > { %v1627_v25 = vpop.xlane.xlu0 %1626  ;;  %v1958_v12 = vpop.permute.xlu1 %1957 }
 0x6e9   : > { %v7741_v39 = vpop.eup %6119 }
 0x6ea   : > { %v1621_v52 = vpop.xlane.xlu0 %1620  ;;  %v1640_v24 = vsel %vm1288_vm1, %v7741_v39, 0.0 }
 0x6eb   : > { %1641 = vadd.xlane.f32.xlu1 %v1640_v24 }
 0x6ed   : > { %v7745_v60 = vpop.eup %6121 }
 0x6ee   : > { %v1954_v47 = vpop.permute.xlu0 %1953  ;;  %v1634_v50 = vsel %vm1288_vm1, %v7745_v60, 0.0  ;;  %v7753_v34 = vpop.eup %6123 }
 0x6ef   : > { %5457 = vmatprep.subr.bf16.mxu1 %v1954_v47  ;;  %1635 = vadd.xlane.f32.xlu1 %v1634_v50  ;;  %v1924_v51 = vsel %vm1288_vm1, %v7753_v34, 0.0 }
 0x700   : > { %1959 = vrot.lane.b32.xlu1 %v7478_v9, %s6742_s20 }
 0x717   : > { %v1630_v63 = vpop.xlane.xlu1 %1629 }
 0x718   : > { %6125 = vrcp.f32 %v1630_v63 }
 0x719   : > { %6127 = vrcp.f32 %v1621_v52 }
 0x71a   : > { %6129 = vrcp.f32 %v1627_v25 }
 0x71b   : > { %v1624_v30 = vpop.xlane.xlu1 %1623 }
 0x71c   : > { %6131 = vrcp.f32 %v1624_v30 }
 0x71d   : > { %6133 = vrcp.f32 %v7725_v28 }
 0x71e   : > { %6135 = vrcp.f32 %v7733_v59 }
 0x722   : > { %v6126_v26 = vpop.eup %6125 }
 0x723   : > { %v6128_v31 = vpop.eup %6127  ;;  %v1654_v32 = vmul.f32 %v6126_v26, %v7695_v61  ;;  %v1639_v61 = vpop.xlane.xlu1 %1638 }
 0x724   : > { %1925 = vadd.xlane.f32.xlu1 %v1924_v51  ;;  %v6130_v62 = vpop.eup %6129  ;;  %v1651_v2 = vmul.f32 %v6128_v31, %v7677_v46 }
 0x725   : > { %v1653_v18 = vmul.f32 %v6130_v62, %v7673_v27  ;;  %v1633_v27 = vpop.xlane.xlu0 %1632 }
 0x726   : > { %v6132_v13 = vpop.eup %6131 }
 0x727   : > { %v1652_v16 = vmul.f32 %v6132_v13, %v7701_v14  ;;  %v1660_v25 = vpack.c.bf16 %v1654_v32, %v1653_v18 }
 0x729   : > { %v1659_v19 = vpack.c.bf16 %v1652_v16, %v1651_v2  ;;  %v1923_v46 = vpop.xlane.xlu0 %1922 }
 0x72b   : > { %5433 = vmatprep.mubr.msk.bf16.mxu1 %vm1288_vm1, %v1659_v19 }
 0x72c   : > { %5434 = vmatmul.mubr.msk.bf16.vlgmr.msra.gmra.mrb[24].mxu1 %vm1288_vm1, %v1660_v25 }
 0x72d   : > { %5458 = vmatpush3.bf16.msra.mxu1 %v1954_v47  ;;  %v1929_v14 = vpop.xlane.xlu0 %1928 }
 0x72e   : > { %5459 = vmatprep.subr.bf16.mxu1 %v1956_v3 }
 0x731   : > { %5460 = vmatpush3.bf16.msra.mxu1 %v1956_v3  ;;  %v1932_v24 = vpop.xlane.xlu0 %1931  ;;  %v6134_v3 = vpop.eup %6133 }
 0x732   : > { %5461 = vmatprep.subr.bf16.mxu1 %v1958_v12  ;;  %v6136_v4 = vpop.eup %6135  ;;  %v1941_v13 = vmul.f32 %v6134_v3, %v7649_v23 }
 0x733   : > { %v1942_v31 = vmul.f32 %v6136_v4, %v7653_v38 }
 0x735   : > { %5462 = vmatpush3.bf16.msra.mxu1 %v1958_v12  ;;  %2052 = vrot.lane.b32.xlu1 %v7380_v20, %s6743_s15  ;;  %v2051_v8 = vpop.permute.xlu0 %2050 }
 0x739   : > { %2054 = vrot.lane.b32.xlu1 %v7388_v37, %s6743_s15 }
 0x73d   : > { %2056 = vrot.lane.b32.xlu1 %v7396_v54, %s6743_s15 }
 0x741   : > { %2044 = vrot.lane.b32.xlu1 %v7382_v21, %s6743_s15 }
 0x745   : > { %2048 = vrot.lane.b32.xlu1 %v7398_v56, %s6743_s15 }
 0x778   : > { %v1642_v52 = vpop.xlane.xlu1 %1641 }
 0x779   : > { %6137 = vrcp.f32 %v1642_v52 }
 0x77a   : > { %6139 = vrcp.f32 %v1633_v27 }
 0x77b   : > { %6141 = vrcp.f32 %v1639_v61 }
 0x77c   : > { %v1636_v47 = vpop.xlane.xlu1 %1635 }
 0x77d   : > { %6143 = vrcp.f32 %v1636_v47 }
 0x77e   : > { %6145 = vrcp.f32 %v7739_v22 }
 0x77f   : > { %6147 = vrcp.f32 %v7736_v0  ;;  %v1949_v0 = vpack.c.bf16 %v1942_v31, %v1941_v13 }
 0x780   : > { %v1960_v50 = vpop.permute.xlu1 %1959  ;;  %6149 = vrcp.f32 %v1932_v24 }
 0x781   : > { %5463 = vmatprep.subr.bf16.mxu1 %v1960_v50  ;;  %6151 = vrcp.f32 %v1923_v46 }
 0x782   : > { %5464 = vmatpush3.bf16.msra.mxu1 %v1960_v50  ;;  %6153 = vrcp.f32 %v1929_v14 }
 0x783   : > { %5669 = vmatprep.subr.msk.bf16.mxu1 %vm1198_vm0, %v2051_v8  ;;  %v6138_v28 = vpop.eup %6137 }
 0x784   : > { %v6140_v59 = vpop.eup %6139  ;;  %v1658_v30 = vmul.f32 %v6138_v28, %v7741_v39 }
 0x785   : > { %v6142_v12 = vpop.eup %6141  ;;  %v1655_v26 = vmul.f32 %v6140_v59, %v7707_v5 }
 0x786   : > { %v1657_v22 = vmul.f32 %v6142_v12, %v7703_v1  ;;  %v2071_v1 = vsel %vm1198_vm0, %v2051_v8, 0  ;;  %v2043_v8 = vpop.permute.xlu0 %2042 }
 0x787   : > { %v6144_v63 = vpop.eup %6143 }
 0x788   : > { %v1656_v51 = vmul.f32 %v6144_v63, %v7745_v60  ;;  %v1662_v32 = vpack.c.bf16 %v1658_v30, %v1657_v22  ;;  %v6146_v2 = vpop.eup %6145 }
 0x789   : > { %v6148_v16 = vpop.eup %6147  ;;  %v1944_v5 = vmul.f32 %v6146_v2, %v7661_v17 }
 0x78a   : > { %v1661_v62 = vpack.c.bf16 %v1656_v51, %v1655_v26  ;;  %v1943_v39 = vmul.f32 %v6148_v16, %v7657_v15  ;;  %v6150_v17 = vpop.eup %6149 }
 0x78b   : > { %v6152_v15 = vpop.eup %6151  ;;  %v1948_v61 = vmul.f32 %v6150_v17, %v7721_v49 }
 0x78c   : > { %5437 = vmatprep.mubr.msk.bf16.mxu1 %vm1288_vm1, %v1661_v62  ;;  %v1950_v38 = vpack.c.bf16 %v1944_v5, %v1943_v39  ;;  %v6154_v25 = vpop.eup %6153  ;;  %v1945_v46 = vmul.f32 %v6152_v15, %v7713_v29 }
 0x78d   : > { %5438 = vmatmul.mubr.msk.bf16.gmra.mrb[28].mxu1 %vm1288_vm1, %v1662_v32  ;;  %v1947_v24 = vmul.f32 %v6154_v25, %v7717_v33 }
 0x78e   : > { %5465 = vmatprep.mubr.msk.bf16.mxu1 %vm1288_vm1, %v1949_v0 }
 0x78f   : > { %v1952_v3 = vpack.c.bf16 %v1948_v61, %v1947_v24 }
 0x795   : > { %5466 = vmatmul.mubr.msk.bf16.vlgmr.msra.gmra.mrb[32].mxu1 %vm1288_vm1, %v1950_v38 }
 0x796   : > { %5474 = vmatpush3.bf16.xpose.msra.mxu1 %v2071_v1 }
 0x7b1   : > { %v1926_v23 = vpop.xlane.xlu1 %1925 }
 0x7b2   : > { %6155 = vrcp.f32 %v1926_v23 }
 0x7b5   : > { %v2053_v60 = vpop.permute.xlu1 %2052 }
 0x7b6   : > { %5670 = vmatprep.subr.msk.bf16.mxu1 %vm1198_vm0, %v2053_v60  ;;  %v2074_v18 = vsel %vm1198_vm0, %v2053_v60, 0 }
 0x7b7   : > { %5476 = vmatpush3.bf16.xpose.msra.mxu1 %v2074_v18 }
 0x7b9   : > { %v2055_v19 = vpop.permute.xlu1 %2054 }
 0x7ba   : > { %5671 = vmatprep.subr.msk.bf16.mxu1 %vm1198_vm0, %v2055_v19  ;;  %v2077_v52 = vsel %vm1198_vm0, %v2055_v19, 0 }
 0x7bc   : > { %v6156_v27 = vpop.eup %6155 }
 0x7bd   : > { %v1946_v14 = vmul.f32 %v6156_v27, %v7753_v34  ;;  %v2057_v47 = vpop.permute.xlu1 %2056  ;;  %v2047_v34 = vpop.permute.xlu0 %2046 }
 0x7be   : > { %v2080_v29 = vsel %vm1198_vm0, %v2057_v47, 0 }
 0x7bf   : > { %5478 = vmatpush3.bf16.xpose.msra.mxu1 %v2077_v52  ;;  %v1951_v50 = vpack.c.bf16 %v1946_v14, %v1945_v46 }
 0x7c0   : > { %5672 = vmatprep.subr.msk.bf16.mxu1 %vm1198_vm0, %v2057_v47 }
 0x7c1   : > { %5469 = vmatprep.mubr.msk.bf16.mxu1 %vm1288_vm1, %v1951_v50  ;;  %v2045_v49 = vpop.permute.xlu1 %2044 }
 0x7c2   : > { %5470 = vmatmul.mubr.msk.bf16.gmra.mrb[36].mxu1 %vm1288_vm1, %v1952_v3 }
 0x7c3   : > { %5481 = vmatprep.mubr.msk.bf16.mxu1 %vm1198_vm0, %v2043_v8 }
 0x7c5   : > { %v2049_v33 = vpop.permute.xlu1 %2048 }
 0x7c7   : > { %5480 = vmatpush3.bf16.xpose.msra.mxu1 %v2080_v29 }
 0x7ce   : > { %5482 = vmatmul.mubr.msk.bf16.vlgmr.msra.gmra.mrb[40].mxu1 %vm1198_vm0, %v2045_v49 }
 0x7cf   : > { %5485 = vmatprep.mubr.msk.bf16.mxu1 %vm1198_vm0, %v2047_v34 }
 0x7d6   : > { %5486 = vmatmul.mubr.msk.bf16.gmra.mrb[44].mxu1 %vm1198_vm0, %v2049_v33 }
 0x7ff   : > { %v7807_v4 = vpop.f32.mrb[24].mxu1 }
 0x800   : > { %v7809_v28 = vpop.f32.mrb[25].mxu1 }
 0x801   : > { %v7811_v59 = vpop.f32.mrb[26].mxu1 }
 0x802   : > { %v7815_v63 = vpop.f32.mrb[27].mxu1 }
 0x860   : > { %v7819_v26 = vpop.f32.mrb[28].mxu1 }
 0x861   : > { %v7821_v51 = vpop.f32.mrb[29].mxu1 }
 0x862   : > { %v7823_v31 = vpop.f32.mrb[30].mxu1 }
 0x863   : > { %v7827_v62 = vpop.f32.mrb[31].mxu1 }
 0x868   : > { %v7831_v32 = vpop.f32.mrb[32].mxu1 }
 0x869   : > { %v7833_v2 = vpop.f32.mrb[33].mxu1 }
 0x86a   : > { %v7835_v0 = vpop.f32.mrb[34].mxu1 }
 0x86b   : > { %v7839_v5 = vpop.f32.mrb[35].mxu1 }
 0x895   : > { %v7843_v38 = vpop.f32.mrb[36].mxu1 }
 0x896   : > { %9023 = vst [vmem:[#allocation42_spill] sm:$0xff] %v7843_v38  ;;  %v7845_v1 = vpop.f32.mrb[37].mxu1 }
 0x897   : > { %v7847_v23 = vpop.f32.mrb[38].mxu1 }
 0x898   : > { %9024 = vst [vmem:[#allocation43_spill] sm:$0xff] %v7847_v23  ;;  %v7851_v18 = vpop.f32.mrb[39].mxu1 }
 0x8a1   : > { %v5483_v19 = vpop.f32.mrb[40].mxu1 }
 0x8a2   : > { %v2116_v15 = vpop.f32.mrb[41].mxu1  ;;  %v2153_v25 = vsel %vm1288_vm1, %v5483_v19, -inf }
 0x8a3   : > { %2154 = vmax.xlane.f32.xlu0 %v2153_v25  ;;  %v5484_v27 = vpop.f32.mrb[42].mxu1  ;;  %v2147_v14 = vsel %vm1288_vm1, %v2116_v15, -inf }
 0x8a4   : > { %v2119_v61 = vpop.f32.mrb[43].mxu1  ;;  %v2156_v47 = vsel %vm1288_vm1, %v5484_v27, -inf }
 0x8a5   : > { %v2150_v46 = vsel %vm1288_vm1, %v2119_v61, -inf }
 0x8a6   : > { %2151 = vmax.xlane.f32.xlu1 %v2150_v46 }
 0x8a7   : > { %2148 = vmax.xlane.f32.xlu0 %v2147_v14 }
 0x8a9   : > { %v5487_v52 = vpop.f32.mrb[44].mxu1 }
 0x8aa   : > { %v2132_v24 = vpop.f32.mrb[45].mxu1  ;;  %v2165_v8 = vsel %vm1288_vm1, %v5487_v52, -inf }
 0x8ab   : > { %2157 = vmax.xlane.f32.xlu0 %v2156_v47  ;;  %v7859_v50 = vpop.f32.mrb[46].mxu1  ;;  %v2159_v29 = vsel %vm1288_vm1, %v2132_v24, -inf }
 0x8ac   : > { %v7861_v3 = vpop.f32.mrb[47].mxu1  ;;  %v2168_v49 = vsel %vm1288_vm1, %v7859_v50, -inf }
 0x8ad   : > { %v2162_v34 = vsel %vm1288_vm1, %v7861_v3, -inf }
 0x8af   : > { %2166 = vmax.xlane.f32.xlu0 %v2165_v8 }
 0x8b3   : > { %2160 = vmax.xlane.f32.xlu0 %v2159_v29 }
 0x8b7   : > { %2241 = vrot.lane.b32.xlu1 %v7459_v53, %s6743_s15 }
 0x8bb   : > { %2243 = vrot.lane.b32.xlu1 %v7481_v11, %s6743_s15 }
 0x8c9   : > { %2239 = vrot.lane.b32.xlu0 %v7463_v58, %s6743_s15 }
 0x8df   : > { %2169 = vmax.xlane.f32.xlu1 %v2168_v49 }
 0x8e3   : > { %2163 = vmax.xlane.f32.xlu1 %v2162_v34 }
 0x8f4   : > { %2245 = vrot.lane.b32.xlu1 %v7478_v9, %s6743_s15 }
 0x930   : > { %v2155_v33 = vpop.xlane.xlu0 %2154 }
 0x931   : > { %v2173_v25 = vsub.f32 %v5483_v19, %v2155_v33 }
 0x933   : > { %v2183_v46 = vmul.f32 1.442695, %v2173_v25  ;;  %v2152_v14 = vpop.xlane.xlu1 %2151 }
 0x934   : > { %v2149_v47 = vpop.xlane.xlu0 %2148  ;;  %v2172_v29 = vsub.f32 %v2119_v61, %v2152_v14 }
 0x935   : > { %6157 = vpow2.f32 %v2183_v46  ;;  %v2171_v8 = vsub.f32 %v2116_v15, %v2149_v47 }
 0x936   : > { %v2181_v49 = vmul.f32 1.442695, %v2172_v29 }
 0x937   : > { %v2179_v60 = vmul.f32 1.442695, %v2171_v8 }
 0x938   : > { %v2158_v22 = vpop.xlane.xlu0 %2157 }
 0x939   : > { %6159 = vpow2.f32 %v2179_v60  ;;  %v2174_v17 = vsub.f32 %v5484_v27, %v2158_v22  ;;  %v2242_v22 = vpop.permute.xlu1 %2241 }
 0x93b   : > { %v2185_v13 = vmul.f32 1.442695, %v2174_v17 }
 0x93c   : > { %v2167_v16 = vpop.xlane.xlu0 %2166 }
 0x93d   : > { %6161 = vpow2.f32 %v2185_v13  ;;  %v2177_v34 = vsub.f32 %v5487_v52, %v2167_v16 }
 0x93e   : > { %6163 = vpow2.f32 %v2181_v49 }
 0x93f   : > { %v7877_v12 = vpop.eup %6157  ;;  %v2191_v39 = vmul.f32 1.442695, %v2177_v34 }
 0x940   : > { %v2161_v19 = vpop.xlane.xlu0 %2160  ;;  %v2201_v33 = vsel %vm1288_vm1, %v7877_v12, 0.0 }
 0x941   : > { %6165 = vpow2.f32 %v2191_v39  ;;  %v2175_v15 = vsub.f32 %v2132_v24, %v2161_v19  ;;  %2202 = vadd.xlane.f32.xlu0 %v2201_v33  ;;  %v2244_v39 = vpop.permute.xlu1 %2243 }
 0x943   : > { %v7881_v61 = vpop.eup %6159  ;;  %v2187_v60 = vmul.f32 1.442695, %v2175_v15 }
 0x944   : > { %v2240_v27 = vpop.permute.xlu0 %2239  ;;  %v2195_v13 = vsel %vm1288_vm1, %v7881_v61, 0.0 }
 0x945   : > { %6167 = vpow2.f32 %v2187_v60  ;;  %2196 = vadd.xlane.f32.xlu0 %v2195_v13  ;;  %5489 = vmatprep.subr.bf16.mxu0 %v2240_v27 }
 0x946   : > { %5490 = vmatpush3.bf16.msra.mxu0 %v2240_v27 }
 0x947   : > { %v6162_v16 = vpop.eup %6161  ;;  %5491 = vmatprep.subr.bf16.mxu0 %v2242_v22 }
 0x948   : > { %v2204_v17 = vsel %vm1288_vm1, %v6162_v16, 0.0  ;;  %v6164_v52 = vpop.eup %6163 }
 0x949   : > { %2205 = vadd.xlane.f32.xlu1 %v2204_v17  ;;  %v2198_v46 = vsel %vm1288_vm1, %v6164_v52, 0.0 }
 0x94a   : > { %5492 = vmatpush3.bf16.msra.mxu0 %v2242_v22 }
 0x94b   : > { %v7886_v24 = vpop.eup %6165  ;;  %5493 = vmatprep.subr.bf16.mxu0 %v2244_v39 }
 0x94c   : > { %v2213_v25 = vsel %vm1288_vm1, %v7886_v24, 0.0 }
 0x94d   : > { %2214 = vadd.xlane.f32.xlu0 %v2213_v25  ;;  %2199 = vadd.xlane.f32.xlu1 %v2198_v46 }
 0x94e   : > { %5494 = vmatpush3.bf16.msra.mxu0 %v2244_v39 }
 0x94f   : > { %v7891_v14 = vpop.eup %6167 }
 0x950   : > { %v2207_v47 = vsel %vm1288_vm1, %v7891_v14, 0.0 }
 0x951   : > { %2208 = vadd.xlane.f32.xlu0 %v2207_v47 }
 0x95e   : > { %2338 = vrot.lane.b32.xlu1 %v7380_v20, %s6744_s2 }
 0x962   : > { %2340 = vrot.lane.b32.xlu1 %v7388_v37, %s6744_s2 }
 0x96c   : > { %v2170_v8 = vpop.xlane.xlu1 %2169 }
 0x96d   : > { %v2178_v29 = vsub.f32 %v7859_v50, %v2170_v8 }
 0x96f   : > { %v2193_v49 = vmul.f32 1.442695, %v2178_v29 }
 0x970   : > { %v2164_v34 = vpop.xlane.xlu1 %2163 }
 0x971   : > { %6169 = vpow2.f32 %v2193_v49  ;;  %v2176_v19 = vsub.f32 %v7861_v3, %v2164_v34 }
 0x973   : > { %v2189_v33 = vmul.f32 1.442695, %v2176_v19 }
 0x974   : > { %v2246_v15 = vpop.permute.xlu1 %2245 }
 0x975   : > { %5495 = vmatprep.subr.bf16.mxu0 %v2246_v15  ;;  %6171 = vpow2.f32 %v2189_v33 }
 0x976   : > { %5496 = vmatpush3.bf16.msra.mxu0 %v2246_v15 }
 0x97b   : > { %v6170_v60 = vpop.eup %6169 }
 0x97c   : > { %v2216_v22 = vsel %vm1288_vm1, %v6170_v60, 0.0 }
 0x97d   : > { %2217 = vadd.xlane.f32.xlu0 %v2216_v22 }
 0x97f   : > { %v6172_v27 = vpop.eup %6171 }
 0x980   : > { %v2210_v13 = vsel %vm1288_vm1, %v6172_v27, 0.0 }
 0x986   : > { %2211 = vadd.xlane.f32.xlu1 %v2210_v13 }
 0x993   : > { %2336 = vrot.lane.b32.xlu0 %v7370_v6, %s6744_s2 }
 0x997   : > { %2328 = vrot.lane.b32.xlu0 %v7372_v7, %s6744_s2  ;;  %2342 = vrot.lane.b32.xlu1 %v7396_v54, %s6744_s2 }
 0x99b   : > { %2332 = vrot.lane.b32.xlu0 %v7390_v40, %s6744_s2  ;;  %2330 = vrot.lane.b32.xlu1 %v7382_v21, %s6744_s2 }
 0x99f   : > { %2334 = vrot.lane.b32.xlu1 %v7398_v56, %s6744_s2 }
 0x9ce   : > { %v2203_v50 = vpop.xlane.xlu0 %2202 }
 0x9d2   : > { %v2197_v17 = vpop.xlane.xlu0 %2196 }
 0x9d6   : > { %v2206_v3 = vpop.xlane.xlu1 %2205 }
 0x9d7   : > { %6173 = vrcp.f32 %v2206_v3 }
 0x9d8   : > { %6175 = vrcp.f32 %v2197_v17 }
 0x9d9   : > { %6177 = vrcp.f32 %v2203_v50 }
 0x9da   : > { %v2200_v39 = vpop.xlane.xlu1 %2199  ;;  %v2215_v22 = vpop.xlane.xlu0 %2214 }
 0x9db   : > { %6179 = vrcp.f32 %v2200_v39 }
 0x9de   : > { %v2209_v13 = vpop.xlane.xlu0 %2208  ;;  %v2339_v50 = vpop.permute.xlu1 %2338 }
 0x9e1   : > { %v6174_v25 = vpop.eup %6173 }
 0x9e2   : > { %v6176_v46 = vpop.eup %6175  ;;  %v2230_v29 = vmul.f32 %v6174_v25, %v6162_v16  ;;  %v2341_v39 = vpop.permute.xlu1 %2340 }
 0x9e3   : > { %v6178_v47 = vpop.eup %6177  ;;  %v2227_v49 = vmul.f32 %v6176_v46, %v7881_v61  ;;  %v2360_v61 = vsel %vm1198_vm0, %v2339_v50, 0 }
 0x9e4   : > { %v2229_v19 = vmul.f32 %v6178_v47, %v7877_v12 }
 0x9e5   : > { %v6180_v8 = vpop.eup %6179 }
 0x9e6   : > { %v2228_v34 = vmul.f32 %v6180_v8, %v6164_v52  ;;  %v2236_v15 = vpack.c.bf16 %v2230_v29, %v2229_v19  ;;  %v2363_v29 = vsel %vm1198_vm0, %v2341_v39, 0 }
 0x9e8   : > { %v2235_v33 = vpack.c.bf16 %v2228_v34, %v2227_v49 }
 0x9ea   : > { %5497 = vmatprep.mubr.msk.bf16.mxu0 %vm1288_vm1, %v2235_v33 }
 0x9eb   : > { %5498 = vmatmul.mubr.msk.bf16.vlgmr.msra.gmra.mrb[32].mxu0 %vm1288_vm1, %v2236_v15 }
 0xa0a   : > { %v2218_v3 = vpop.xlane.xlu0 %2217 }
 0xa0b   : > { %6181 = vrcp.f32 %v2218_v3 }
 0xa0c   : > { %6183 = vrcp.f32 %v2209_v13 }
 0xa0d   : > { %6185 = vrcp.f32 %v2215_v22 }
 0xa0e   : > { %v2337_v17 = vpop.permute.xlu0 %2336 }
 0xa0f   : > { %5673 = vmatprep.subr.msk.bf16.mxu0 %vm1198_vm0, %v2337_v17  ;;  %v2357_v16 = vsel %vm1198_vm0, %v2337_v17, 0 }
 0xa10   : > { %5506 = vmatpush3.bf16.xpose.msra.mxu0 %v2357_v16 }
 0xa11   : > { %5674 = vmatprep.subr.msk.bf16.mxu0 %vm1198_vm0, %v2339_v50 }
 0xa12   : > { %v2329_v13 = vpop.permute.xlu0 %2328 }
 0xa13   : > { %v2212_v12 = vpop.xlane.xlu1 %2211 }
 0xa14   : > { %6187 = vrcp.f32 %v2212_v12 }
 0xa15   : > { %v6182_v52 = vpop.eup %6181 }
 0xa16   : > { %v6184_v25 = vpop.eup %6183  ;;  %v2234_v8 = vmul.f32 %v6182_v52, %v6170_v60 }
 0xa17   : > { %v6186_v46 = vpop.eup %6185  ;;  %v2231_v49 = vmul.f32 %v6184_v25, %v7891_v14  ;;  %v2343_v19 = vpop.permute.xlu1 %2342 }
 0xa18   : > { %5508 = vmatpush3.bf16.xpose.msra.mxu0 %v2360_v61  ;;  %v2233_v33 = vmul.f32 %v6186_v46, %v7886_v24  ;;  %v2366_v60 = vsel %vm1198_vm0, %v2343_v19, 0 }
 0xa19   : > { %5675 = vmatprep.subr.msk.bf16.mxu0 %vm1198_vm0, %v2341_v39 }
 0xa1a   : > { %v2238_v22 = vpack.c.bf16 %v2234_v8, %v2233_v33 }
 0xa1b   : > { %v2331_v14 = vpop.permute.xlu1 %2330 }
 0xa1e   : > { %v6188_v47 = vpop.eup %6187 }
 0xa1f   : > { %v2232_v34 = vmul.f32 %v6188_v47, %v6172_v27  ;;  %v2333_v27 = vpop.permute.xlu0 %2332  ;;  %v2335_v24 = vpop.permute.xlu1 %2334 }
 0xa20   : > { %5510 = vmatpush3.bf16.xpose.msra.mxu0 %v2363_v29 }
 0xa21   : > { %5676 = vmatprep.subr.msk.bf16.mxu0 %vm1198_vm0, %v2343_v19  ;;  %v2237_v15 = vpack.c.bf16 %v2232_v34, %v2231_v49 }
 0xa23   : > { %5501 = vmatprep.mubr.msk.bf16.mxu0 %vm1288_vm1, %v2237_v15 }
 0xa24   : > { %5502 = vmatmul.mubr.msk.bf16.gmra.mrb[36].mxu0 %vm1288_vm1, %v2238_v22 }
 0xa25   : > { %5513 = vmatprep.mubr.msk.bf16.mxu0 %vm1198_vm0, %v2329_v13 }
 0xa28   : > { %5512 = vmatpush3.bf16.xpose.msra.mxu0 %v2366_v60 }
 0xa2f   : > { %5514 = vmatmul.mubr.msk.bf16.vlgmr.msra.gmra.mrb[40].mxu0 %vm1198_vm0, %v2331_v14 }
 0xa30   : > { %5517 = vmatprep.mubr.msk.bf16.mxu0 %vm1198_vm0, %v2333_v27 }
 0xa37   : > { %5518 = vmatmul.mubr.msk.bf16.gmra.mrb[44].mxu0 %vm1198_vm0, %v2335_v24 }
 0xabe   : > { %v7935_v50 = vpop.f32.mrb[32].mxu0 }
 0xabf   : > { %v7937_v3 = vpop.f32.mrb[33].mxu0 }
 0xac0   : > { %v7939_v17 = vpop.f32.mrb[34].mxu0 }
 0xac1   : > { %v7943_v16 = vpop.f32.mrb[35].mxu0 }
 0xaf7   : > { %v7947_v61 = vpop.f32.mrb[36].mxu0 }
 0xaf8   : > { %9025 = vst [vmem:[#allocation44_spill] sm:$0xff] %v7947_v61  ;;  %v7949_v52 = vpop.f32.mrb[37].mxu0 }
 0xaf9   : > { %v7951_v25 = vpop.f32.mrb[38].mxu0 }
 0xafa   : > { %9026 = vst [vmem:[#allocation45_spill] sm:$0xff] %v7951_v25  ;;  %v7955_v47 = vpop.f32.mrb[39].mxu0 }
 0xb02   : > { %v5515_v29 = vpop.f32.mrb[40].mxu0 }
 0xb03   : > { %v2402_v49 = vpop.f32.mrb[41].mxu0  ;;  %v2439_v34 = vsel %vm1288_vm1, %v5515_v29, -inf }
 0xb04   : > { %2440 = vmax.xlane.f32.xlu0 %v2439_v34  ;;  %v5516_v19 = vpop.f32.mrb[42].mxu0  ;;  %v2433_v22 = vsel %vm1288_vm1, %v2402_v49, -inf }
 0xb05   : > { %v2405_v33 = vpop.f32.mrb[43].mxu0  ;;  %v2442_v14 = vsel %vm1288_vm1, %v5516_v19, -inf }
 0xb06   : > { %v2436_v15 = vsel %vm1288_vm1, %v2405_v33, -inf }
 0xb07   : > { %2437 = vmax.xlane.f32.xlu1 %v2436_v15 }
 0xb08   : > { %2434 = vmax.xlane.f32.xlu0 %v2433_v22 }
 0xb0a   : > { %v5519_v13 = vpop.f32.mrb[44].mxu0 }
 0xb0b   : > { %v2418_v60 = vpop.f32.mrb[45].mxu0  ;;  %v2451_v46 = vsel %vm1288_vm1, %v5519_v13, -inf }
 0xb0c   : > { %2443 = vmax.xlane.f32.xlu0 %v2442_v14  ;;  %v7963_v27 = vpop.f32.mrb[46].mxu0  ;;  %v2445_v34 = vsel %vm1288_vm1, %v2418_v60, -inf }
 0xb0d   : > { %v7965_v24 = vpop.f32.mrb[47].mxu0  ;;  %v2454_v15 = vsel %vm1288_vm1, %v7963_v27, -inf }
 0xb0e   : > { %v2448_v22 = vsel %vm1288_vm1, %v7965_v24, -inf }
 0xb10   : > { %2452 = vmax.xlane.f32.xlu0 %v2451_v46 }
 0xb14   : > { %2446 = vmax.xlane.f32.xlu0 %v2445_v34 }
 0xb18   : > { %2527 = vrot.lane.b32.xlu1 %v7459_v53, %s6744_s2 }
 0xb1c   : > { %2529 = vrot.lane.b32.xlu1 %v7481_v11, %s6744_s2 }
 0xb2a   : > { %2525 = vrot.lane.b32.xlu0 %v7463_v58, %s6744_s2 }
 0xb40   : > { %2455 = vmax.xlane.f32.xlu1 %v2454_v15 }
 0xb44   : > { %2449 = vmax.xlane.f32.xlu1 %v2448_v22 }
 0xb55   : > { %2531 = vrot.lane.b32.xlu1 %v7478_v9, %s6744_s2 }
 0xb91   : > { %v2441_v46 = vpop.xlane.xlu0 %2440 }
 0xb92   : > { %v2459_v14 = vsub.f32 %v5515_v29, %v2441_v46 }
 0xb94   : > { %v2469_v34 = vmul.f32 1.442695, %v2459_v14  ;;  %v2438_v8 = vpop.xlane.xlu1 %2437 }
 0xb95   : > { %v2435_v39 = vpop.xlane.xlu0 %2434  ;;  %v2458_v30 = vsub.f32 %v2405_v33, %v2438_v8 }
 0xb96   : > { %6189 = vpow2.f32 %v2469_v34  ;;  %v2457_v12 = vsub.f32 %v2402_v49, %v2435_v39 }
 0xb97   : > { %v2467_v15 = vmul.f32 1.442695, %v2458_v30 }
 0xb98   : > { %v2465_v10 = vmul.f32 1.442695, %v2457_v12 }
 0xb99   : > { %v2444_v57 = vpop.xlane.xlu0 %2443 }
 0xb9a   : > { %6191 = vpow2.f32 %v2465_v10  ;;  %v2460_v55 = vsub.f32 %v5516_v19, %v2444_v57  ;;  %v2528_v57 = vpop.permute.xlu1 %2527 }
 0xb9c   : > { %v2471_v43 = vmul.f32 1.442695, %v2460_v55 }
 0xb9d   : > { %v2453_v45 = vpop.xlane.xlu0 %2452 }
 0xb9e   : > { %6193 = vpow2.f32 %v2471_v43  ;;  %v2463_v22 = vsub.f32 %v5519_v13, %v2453_v45 }
 0xb9f   : > { %6195 = vpow2.f32 %v2467_v15 }
 0xba0   : > { %v7981_v44 = vpop.eup %6189  ;;  %v2477_v48 = vmul.f32 1.442695, %v2463_v22 }
 0xba1   : > { %v2447_v29 = vpop.xlane.xlu0 %2446  ;;  %v2487_v46 = vsel %vm1288_vm1, %v7981_v44, 0.0 }
 0xba2   : > { %6197 = vpow2.f32 %v2477_v48  ;;  %v2461_v39 = vsub.f32 %v2418_v60, %v2447_v29  ;;  %2488 = vadd.xlane.f32.xlu0 %v2487_v46  ;;  %v2530_v48 = vpop.permute.xlu1 %2529 }
 0xba4   : > { %v7985_v12 = vpop.eup %6191  ;;  %v2473_v10 = vmul.f32 1.442695, %v2461_v39 }
 0xba5   : > { %v2526_v30 = vpop.permute.xlu0 %2525  ;;  %v2481_v55 = vsel %vm1288_vm1, %v7985_v12, 0.0 }
 0xba6   : > { %6199 = vpow2.f32 %v2473_v10  ;;  %2482 = vadd.xlane.f32.xlu0 %v2481_v55  ;;  %5521 = vmatprep.subr.bf16.mxu1 %v2526_v30 }
 0xba7   : > { %5522 = vmatpush3.bf16.msra.mxu1 %v2526_v30 }
 0xba8   : > { %v6194_v43 = vpop.eup %6193  ;;  %5523 = vmatprep.subr.bf16.mxu1 %v2528_v57 }
 0xba9   : > { %v2490_v45 = vsel %vm1288_vm1, %v6194_v43, 0.0  ;;  %v6196_v8 = vpop.eup %6195 }
 0xbaa   : > { %2491 = vadd.xlane.f32.xlu1 %v2490_v45  ;;  %v2484_v33 = vsel %vm1288_vm1, %v6196_v8, 0.0 }
 0xbab   : > { %5524 = vmatpush3.bf16.msra.mxu1 %v2528_v57 }
 0xbac   : > { %v7990_v49 = vpop.eup %6197  ;;  %5525 = vmatprep.subr.bf16.mxu1 %v2530_v48 }
 0xbad   : > { %v2499_v19 = vsel %vm1288_vm1, %v7990_v49, 0.0 }
 0xbae   : > { %2500 = vadd.xlane.f32.xlu0 %v2499_v19  ;;  %2485 = vadd.xlane.f32.xlu1 %v2484_v33 }
 0xbaf   : > { %5526 = vmatpush3.bf16.msra.mxu1 %v2530_v48 }
 0xbb0   : > { %v7995_v13 = vpop.eup %6199 }
 0xbb1   : > { %v2493_v60 = vsel %vm1288_vm1, %v7995_v13, 0.0 }
 0xbb2   : > { %2494 = vadd.xlane.f32.xlu0 %v2493_v60 }
 0xbbf   : > { %2624 = vrot.lane.b32.xlu1 %v7380_v20, %s6745_s9 }
 0xbc3   : > { %2626 = vrot.lane.b32.xlu1 %v7388_v37, %s6745_s9 }
 0xbcd   : > { %v2456_v14 = vpop.xlane.xlu1 %2455 }
 0xbce   : > { %v2464_v34 = vsub.f32 %v7963_v27, %v2456_v14 }
 0xbd0   : > { %v2479_v15 = vmul.f32 1.442695, %v2464_v34 }
 0xbd1   : > { %v2450_v22 = vpop.xlane.xlu1 %2449 }
 0xbd2   : > { %6201 = vpow2.f32 %v2479_v15  ;;  %v2462_v29 = vsub.f32 %v7965_v24, %v2450_v22 }
 0xbd4   : > { %v2475_v46 = vmul.f32 1.442695, %v2462_v29 }
 0xbd5   : > { %v2532_v39 = vpop.permute.xlu1 %2531 }
 0xbd6   : > { %5527 = vmatprep.subr.bf16.mxu1 %v2532_v39  ;;  %6203 = vpow2.f32 %v2475_v46 }
 0xbd7   : > { %5528 = vmatpush3.bf16.msra.mxu1 %v2532_v39 }
 0xbdc   : > { %v6202_v10 = vpop.eup %6201 }
 0xbdd   : > { %v2502_v57 = vsel %vm1288_vm1, %v6202_v10, 0.0 }
 0xbde   : > { %2503 = vadd.xlane.f32.xlu0 %v2502_v57 }
 0xbe0   : > { %v6204_v30 = vpop.eup %6203 }
 0xbe1   : > { %v2496_v55 = vsel %vm1288_vm1, %v6204_v30, 0.0 }
 0xbe7   : > { %2497 = vadd.xlane.f32.xlu1 %v2496_v55 }
 0xbf4   : > { %2622 = vrot.lane.b32.xlu0 %v7370_v6, %s6745_s9 }
 0xbf8   : > { %2614 = vrot.lane.b32.xlu0 %v7372_v7, %s6745_s9  ;;  %2628 = vrot.lane.b32.xlu1 %v7396_v54, %s6745_s9 }
 0xbfc   : > { %2618 = vrot.lane.b32.xlu0 %v7390_v40, %s6745_s9  ;;  %2616 = vrot.lane.b32.xlu1 %v7382_v21, %s6745_s9 }
 0xc00   : > { %2620 = vrot.lane.b32.xlu1 %v7398_v56, %s6745_s9 }
 0xc2f   : > { %v2489_v27 = vpop.xlane.xlu0 %2488 }
 0xc33   : > { %v2483_v45 = vpop.xlane.xlu0 %2482 }
 0xc37   : > { %v2492_v24 = vpop.xlane.xlu1 %2491 }
 0xc38   : > { %6205 = vrcp.f32 %v2492_v24 }
 0xc39   : > { %6207 = vrcp.f32 %v2483_v45 }
 0xc3a   : > { %6209 = vrcp.f32 %v2489_v27 }
 0xc3b   : > { %v2486_v48 = vpop.xlane.xlu1 %2485  ;;  %v2501_v57 = vpop.xlane.xlu0 %2500 }
 0xc3c   : > { %6211 = vrcp.f32 %v2486_v48 }
 0xc3f   : > { %v2495_v55 = vpop.xlane.xlu0 %2494  ;;  %v2625_v27 = vpop.permute.xlu1 %2624 }
 0xc42   : > { %v6206_v19 = vpop.eup %6205 }
 0xc43   : > { %v6208_v33 = vpop.eup %6207  ;;  %v2516_v34 = vmul.f32 %v6206_v19, %v6194_v43  ;;  %v2627_v48 = vpop.permute.xlu1 %2626 }
 0xc44   : > { %v6210_v60 = vpop.eup %6209  ;;  %v2513_v15 = vmul.f32 %v6208_v33, %v7985_v12  ;;  %v2646_v12 = vsel %vm1198_vm0, %v2625_v27, 0 }
 0xc45   : > { %v2515_v29 = vmul.f32 %v6210_v60, %v7981_v44 }
 0xc46   : > { %v6212_v14 = vpop.eup %6211 }
 0xc47   : > { %v2514_v22 = vmul.f32 %v6212_v14, %v6196_v8  ;;  %v2522_v39 = vpack.c.bf16 %v2516_v34, %v2515_v29  ;;  %v2649_v34 = vsel %vm1198_vm0, %v2627_v48, 0 }
 0xc49   : > { %v2521_v46 = vpack.c.bf16 %v2514_v22, %v2513_v15 }
 0xc4b   : > { %5529 = vmatprep.mubr.msk.bf16.mxu1 %vm1288_vm1, %v2521_v46 }
 0xc4c   : > { %5530 = vmatmul.mubr.msk.bf16.vlgmr.msra.gmra.mrb[48].mxu1 %vm1288_vm1, %v2522_v39 }
 0xc6b   : > { %v2504_v24 = vpop.xlane.xlu0 %2503 }
 0xc6c   : > { %6213 = vrcp.f32 %v2504_v24 }
 0xc6d   : > { %6215 = vrcp.f32 %v2495_v55 }
 0xc6e   : > { %6217 = vrcp.f32 %v2501_v57 }
 0xc6f   : > { %v2623_v45 = vpop.permute.xlu0 %2622 }
 0xc70   : > { %5677 = vmatprep.subr.msk.bf16.mxu1 %vm1198_vm0, %v2623_v45  ;;  %v2643_v43 = vsel %vm1198_vm0, %v2623_v45, 0 }
 0xc71   : > { %5538 = vmatpush3.bf16.xpose.msra.mxu1 %v2643_v43 }
 0xc72   : > { %5678 = vmatprep.subr.msk.bf16.mxu1 %vm1198_vm0, %v2625_v27 }
 0xc73   : > { %v2615_v55 = vpop.permute.xlu0 %2614 }
 0xc74   : > { %v2498_v44 = vpop.xlane.xlu1 %2497 }
 0xc75   : > { %6219 = vrcp.f32 %v2498_v44 }
 0xc76   : > { %v6214_v8 = vpop.eup %6213 }
 0xc77   : > { %v6216_v19 = vpop.eup %6215  ;;  %v2520_v14 = vmul.f32 %v6214_v8, %v6202_v10 }
 0xc78   : > { %v6218_v33 = vpop.eup %6217  ;;  %v2517_v15 = vmul.f32 %v6216_v19, %v7995_v13  ;;  %v2629_v29 = vpop.permute.xlu1 %2628 }
 0xc79   : > { %5540 = vmatpush3.bf16.xpose.msra.mxu1 %v2646_v12  ;;  %v2519_v46 = vmul.f32 %v6218_v33, %v7990_v49  ;;  %v2652_v10 = vsel %vm1198_vm0, %v2629_v29, 0 }
 0xc7a   : > { %5679 = vmatprep.subr.msk.bf16.mxu1 %vm1198_vm0, %v2627_v48 }
 0xc7b   : > { %v2524_v57 = vpack.c.bf16 %v2520_v14, %v2519_v46 }
 0xc7c   : > { %v2617_v13 = vpop.permute.xlu1 %2616 }
 0xc7f   : > { %v6220_v60 = vpop.eup %6219 }
 0xc80   : > { %v2518_v22 = vmul.f32 %v6220_v60, %v6204_v30  ;;  %v2619_v30 = vpop.permute.xlu0 %2618  ;;  %v2621_v49 = vpop.permute.xlu1 %2620 }
 0xc81   : > { %5542 = vmatpush3.bf16.xpose.msra.mxu1 %v2649_v34 }
 0xc82   : > { %5680 = vmatprep.subr.msk.bf16.mxu1 %vm1198_vm0, %v2629_v29  ;;  %v2523_v39 = vpack.c.bf16 %v2518_v22, %v2517_v15 }
 0xc84   : > { %5533 = vmatprep.mubr.msk.bf16.mxu1 %vm1288_vm1, %v2523_v39 }
 0xc85   : > { %5534 = vmatmul.mubr.msk.bf16.gmra.mrb[52].mxu1 %vm1288_vm1, %v2524_v57 }
 0xc86   : > { %5545 = vmatprep.mubr.msk.bf16.mxu1 %vm1198_vm0, %v2615_v55 }
 0xc89   : > { %5544 = vmatpush3.bf16.xpose.msra.mxu1 %v2652_v10 }
 0xc90   : > { %5546 = vmatmul.mubr.msk.bf16.vlgmr.msra.gmra.mrb[56].mxu1 %vm1198_vm0, %v2617_v13 }
 0xc91   : > { %5549 = vmatprep.mubr.msk.bf16.mxu1 %vm1198_vm0, %v2619_v30 }
 0xc98   : > { %5550 = vmatmul.mubr.msk.bf16.gmra.mrb[60].mxu1 %vm1198_vm0, %v2621_v49 }
 0xd1f   : > { %v8039_v27 = vpop.f32.mrb[48].mxu1 }
 0xd20   : > { %v8041_v24 = vpop.f32.mrb[49].mxu1 }
 0xd21   : > { %v8043_v45 = vpop.f32.mrb[50].mxu1 }
 0xd22   : > { %v8047_v43 = vpop.f32.mrb[51].mxu1 }
 0xd58   : > { %v8051_v12 = vpop.f32.mrb[52].mxu1 }
 0xd59   : > { %9027 = vst [vmem:[#allocation46_spill] sm:$0xff] %v8051_v12  ;;  %v8053_v8 = vpop.f32.mrb[53].mxu1 }
 0xd5a   : > { %9028 = vst [vmem:[#allocation47_spill] sm:$0xff] %v8053_v8  ;;  %v8055_v19 = vpop.f32.mrb[54].mxu1 }
 0xd5b   : > { %9029 = vst [vmem:[#allocation48_spill] sm:$0xff] %v8055_v19  ;;  %v8059_v60 = vpop.f32.mrb[55].mxu1 }
 0xd5c   : > { %9030 = vst [vmem:[#allocation49_spill] sm:$0xff] %v8059_v60 }
 0xd63   : > { %v5547_v34 = vpop.f32.mrb[56].mxu1 }
 0xd64   : > { %v2688_v15 = vpop.f32.mrb[57].mxu1  ;;  %v2725_v22 = vsel %vm1288_vm1, %v5547_v34, -inf }
 0xd65   : > { %2726 = vmax.xlane.f32.xlu0 %v2725_v22  ;;  %v5548_v29 = vpop.f32.mrb[58].mxu1  ;;  %v2719_v57 = vsel %vm1288_vm1, %v2688_v15, -inf }
 0xd66   : > { %v2691_v46 = vpop.f32.mrb[59].mxu1  ;;  %v2728_v13 = vsel %vm1288_vm1, %v5548_v29, -inf }
 0xd67   : > { %v2722_v39 = vsel %vm1288_vm1, %v2691_v46, -inf }
 0xd68   : > { %2723 = vmax.xlane.f32.xlu1 %v2722_v39 }
 0xd69   : > { %2720 = vmax.xlane.f32.xlu0 %v2719_v57 }
 0xd6b   : > { %v5551_v55 = vpop.f32.mrb[60].mxu1 }
 0xd6c   : > { %v2704_v10 = vpop.f32.mrb[61].mxu1  ;;  %v2737_v14 = vsel %vm1288_vm1, %v5551_v55, -inf }
 0xd6d   : > { %2729 = vmax.xlane.f32.xlu0 %v2728_v13  ;;  %v8067_v30 = vpop.f32.mrb[62].mxu1  ;;  %v2731_v22 = vsel %vm1288_vm1, %v2704_v10, -inf }
 0xd6e   : > { %v8069_v49 = vpop.f32.mrb[63].mxu1  ;;  %v2740_v39 = vsel %vm1288_vm1, %v8067_v30, -inf }
 0xd6f   : > { %v2734_v57 = vsel %vm1288_vm1, %v8069_v49, -inf }
 0xd71   : > { %2738 = vmax.xlane.f32.xlu0 %v2737_v14 }
 0xd75   : > { %2732 = vmax.xlane.f32.xlu0 %v2731_v22 }
 0xd79   : > { %2813 = vrot.lane.b32.xlu1 %v7459_v53, %s6745_s9 }
 0xd7d   : > { %2815 = vrot.lane.b32.xlu1 %v7481_v11, %s6745_s9 }
 0xd8b   : > { %2811 = vrot.lane.b32.xlu0 %v7463_v58, %s6745_s9 }
 0xda1   : > { %2741 = vmax.xlane.f32.xlu1 %v2740_v39 }
 0xda5   : > { %2735 = vmax.xlane.f32.xlu1 %v2734_v57 }
 0xdb6   : > { %2817 = vrot.lane.b32.xlu1 %v7478_v9, %s6745_s9 }
 0xdf2   : > { %v2727_v14 = vpop.xlane.xlu0 %2726 }
 0xdf3   : > { %v2745_v13 = vsub.f32 %v5547_v34, %v2727_v14 }
 0xdf5   : > { %v2755_v22 = vmul.f32 1.442695, %v2745_v13  ;;  %v2724_v33 = vpop.xlane.xlu1 %2723 }
 0xdf6   : > { %v2721_v48 = vpop.xlane.xlu0 %2720  ;;  %v2744_v35 = vsub.f32 %v2691_v46, %v2724_v33 }
 0xdf7   : > { %6221 = vpow2.f32 %v2755_v22  ;;  %v2743_v44 = vsub.f32 %v2688_v15, %v2721_v48 }
 0xdf8   : > { %v2753_v39 = vmul.f32 1.442695, %v2744_v35 }
 0xdf9   : > { %v2751_v41 = vmul.f32 1.442695, %v2743_v44 }
 0xdfa   : > { %v2730_v42 = vpop.xlane.xlu0 %2729 }
 0xdfb   : > { %6223 = vpow2.f32 %v2751_v41  ;;  %v2746_v36 = vsub.f32 %v5548_v29, %v2730_v42  ;;  %v2814_v42 = vpop.permute.xlu1 %2813 }
 0xdfd   : > { %v2757_v8 = vmul.f32 1.442695, %v2746_v36 }
 0xdfe   : > { %v2739_v60 = vpop.xlane.xlu0 %2738 }
 0xdff   : > { %6225 = vpow2.f32 %v2757_v8  ;;  %v2749_v57 = vsub.f32 %v5551_v55, %v2739_v60 }
 0xe00   : > { %6227 = vpow2.f32 %v2753_v39 }
 0xe01   : > { %v8085_v12 = vpop.eup %6221  ;;  %v2763_v19 = vmul.f32 1.442695, %v2749_v57 }
 0xe02   : > { %v2733_v34 = vpop.xlane.xlu0 %2732  ;;  %v2773_v14 = vsel %vm1288_vm1, %v8085_v12, 0.0 }
 0xe03   : > { %6229 = vpow2.f32 %v2763_v19  ;;  %v2747_v48 = vsub.f32 %v2704_v10, %v2733_v34  ;;  %2774 = vadd.xlane.f32.xlu0 %v2773_v14  ;;  %v2816_v19 = vpop.permute.xlu1 %2815 }
 0xe05   : > { %v8089_v44 = vpop.eup %6223  ;;  %v2759_v41 = vmul.f32 1.442695, %v2747_v48 }
 0xe06   : > { %v2812_v35 = vpop.permute.xlu0 %2811  ;;  %v2767_v36 = vsel %vm1288_vm1, %v8089_v44, 0.0 }
 0xe07   : > { %6231 = vpow2.f32 %v2759_v41  ;;  %2768 = vadd.xlane.f32.xlu0 %v2767_v36  ;;  %5553 = vmatprep.subr.bf16.mxu0 %v2812_v35 }
 0xe08   : > { %5554 = vmatpush3.bf16.msra.mxu0 %v2812_v35 }
 0xe09   : > { %v6226_v8 = vpop.eup %6225  ;;  %5555 = vmatprep.subr.bf16.mxu0 %v2814_v42 }
 0xe0a   : > { %v2776_v33 = vsel %vm1288_vm1, %v6226_v8, 0.0  ;;  %v6228_v60 = vpop.eup %6227 }
 0xe0b   : > { %2777 = vadd.xlane.f32.xlu1 %v2776_v33  ;;  %v2770_v46 = vsel %vm1288_vm1, %v6228_v60, 0.0 }
 0xe0c   : > { %5556 = vmatpush3.bf16.msra.mxu0 %v2814_v42 }
 0xe0d   : > { %v8094_v15 = vpop.eup %6229  ;;  %5557 = vmatprep.subr.bf16.mxu0 %v2816_v19 }
 0xe0e   : > { %v2785_v29 = vsel %vm1288_vm1, %v8094_v15, 0.0 }
 0xe0f   : > { %2786 = vadd.xlane.f32.xlu0 %v2785_v29  ;;  %2771 = vadd.xlane.f32.xlu1 %v2770_v46 }
 0xe10   : > { %5558 = vmatpush3.bf16.msra.mxu0 %v2816_v19 }
 0xe11   : > { %v8099_v55 = vpop.eup %6231 }
 0xe12   : > { %v2779_v10 = vsel %vm1288_vm1, %v8099_v55, 0.0 }
 0xe13   : > { %2780 = vadd.xlane.f32.xlu0 %v2779_v10 }
 0xe20   : > { %2910 = vrot.lane.b32.xlu1 %v7380_v20, %s6746_s13 }
 0xe24   : > { %2912 = vrot.lane.b32.xlu1 %v7388_v37, %s6746_s13 }
 0xe2e   : > { %v2742_v13 = vpop.xlane.xlu1 %2741 }
 0xe2f   : > { %v2750_v22 = vsub.f32 %v8067_v30, %v2742_v13 }
 0xe31   : > { %v2765_v39 = vmul.f32 1.442695, %v2750_v22 }
 0xe32   : > { %v2736_v57 = vpop.xlane.xlu1 %2735 }
 0xe33   : > { %6233 = vpow2.f32 %v2765_v39  ;;  %v2748_v34 = vsub.f32 %v8069_v49, %v2736_v57 }
 0xe35   : > { %v2761_v14 = vmul.f32 1.442695, %v2748_v34 }
 0xe36   : > { %v2818_v48 = vpop.permute.xlu1 %2817 }
 0xe37   : > { %5559 = vmatprep.subr.bf16.mxu0 %v2818_v48  ;;  %6235 = vpow2.f32 %v2761_v14 }
 0xe38   : > { %5560 = vmatpush3.bf16.msra.mxu0 %v2818_v48 }
 0xe3d   : > { %v6234_v41 = vpop.eup %6233 }
 0xe3e   : > { %v2788_v42 = vsel %vm1288_vm1, %v6234_v41, 0.0 }
 0xe3f   : > { %2789 = vadd.xlane.f32.xlu0 %v2788_v42 }
 0xe41   : > { %v6236_v35 = vpop.eup %6235 }
 0xe42   : > { %v2782_v36 = vsel %vm1288_vm1, %v6236_v35, 0.0 }
 0xe48   : > { %2783 = vadd.xlane.f32.xlu1 %v2782_v36 }
 0xe55   : > { %2908 = vrot.lane.b32.xlu0 %v7370_v6, %s6746_s13 }
 0xe59   : > { %2900 = vrot.lane.b32.xlu0 %v7372_v7, %s6746_s13  ;;  %2914 = vrot.lane.b32.xlu1 %v7396_v54, %s6746_s13 }
 0xe5d   : > { %2904 = vrot.lane.b32.xlu0 %v7390_v40, %s6746_s13  ;;  %2902 = vrot.lane.b32.xlu1 %v7382_v21, %s6746_s13 }
 0xe61   : > { %2906 = vrot.lane.b32.xlu1 %v7398_v56, %s6746_s13 }
 0xe90   : > { %v2775_v30 = vpop.xlane.xlu0 %2774 }
 0xe94   : > { %v2769_v33 = vpop.xlane.xlu0 %2768 }
 0xe98   : > { %v2778_v49 = vpop.xlane.xlu1 %2777 }
 0xe99   : > { %6237 = vrcp.f32 %v2778_v49 }
 0xe9a   : > { %6239 = vrcp.f32 %v2769_v33 }
 0xe9b   : > { %6241 = vrcp.f32 %v2775_v30 }
 0xe9c   : > { %v2772_v19 = vpop.xlane.xlu1 %2771  ;;  %v2787_v42 = vpop.xlane.xlu0 %2786 }
 0xe9d   : > { %6243 = vrcp.f32 %v2772_v19 }
 0xea0   : > { %v2781_v36 = vpop.xlane.xlu0 %2780  ;;  %v2911_v30 = vpop.permute.xlu1 %2910 }
 0xea3   : > { %v6238_v29 = vpop.eup %6237 }
 0xea4   : > { %v6240_v46 = vpop.eup %6239  ;;  %v2802_v22 = vmul.f32 %v6238_v29, %v6226_v8  ;;  %v2913_v19 = vpop.permute.xlu1 %2912 }
 0xea5   : > { %v6242_v10 = vpop.eup %6241  ;;  %v2799_v39 = vmul.f32 %v6240_v46, %v8089_v44  ;;  %v2932_v44 = vsel %vm1198_vm0, %v2911_v30, 0 }
 0xea6   : > { %v2801_v34 = vmul.f32 %v6242_v10, %v8085_v12 }
 0xea7   : > { %v6244_v13 = vpop.eup %6243 }
 0xea8   : > { %v2800_v57 = vmul.f32 %v6244_v13, %v6228_v60  ;;  %v2808_v48 = vpack.c.bf16 %v2802_v22, %v2801_v34  ;;  %v2935_v22 = vsel %vm1198_vm0, %v2913_v19, 0 }
 0xeaa   : > { %v2807_v14 = vpack.c.bf16 %v2800_v57, %v2799_v39 }
 0xeac   : > { %5561 = vmatprep.mubr.msk.bf16.mxu0 %vm1288_vm1, %v2807_v14 }
 0xead   : > { %5562 = vmatmul.mubr.msk.bf16.vlgmr.msra.gmra.mrb[48].mxu0 %vm1288_vm1, %v2808_v48 }
 0xecc   : > { %v2790_v49 = vpop.xlane.xlu0 %2789 }
 0xecd   : > { %6245 = vrcp.f32 %v2790_v49 }
 0xece   : > { %6247 = vrcp.f32 %v2781_v36 }
 0xecf   : > { %6249 = vrcp.f32 %v2787_v42 }
 0xed0   : > { %v2909_v33 = vpop.permute.xlu0 %2908 }
 0xed1   : > { %5681 = vmatprep.subr.msk.bf16.mxu0 %vm1198_vm0, %v2909_v33  ;;  %v2929_v8 = vsel %vm1198_vm0, %v2909_v33, 0 }
 0xed2   : > { %5570 = vmatpush3.bf16.xpose.msra.mxu0 %v2929_v8 }
 0xed3   : > { %5682 = vmatprep.subr.msk.bf16.mxu0 %vm1198_vm0, %v2911_v30 }
 0xed4   : > { %v2901_v36 = vpop.permute.xlu0 %2900 }
 0xed5   : > { %v2784_v12 = vpop.xlane.xlu1 %2783 }
 0xed6   : > { %6251 = vrcp.f32 %v2784_v12 }
 0xed7   : > { %v6246_v60 = vpop.eup %6245 }
 0xed8   : > { %v6248_v29 = vpop.eup %6247  ;;  %v2806_v13 = vmul.f32 %v6246_v60, %v6234_v41 }
 0xed9   : > { %v6250_v46 = vpop.eup %6249  ;;  %v2803_v39 = vmul.f32 %v6248_v29, %v8099_v55  ;;  %v2915_v34 = vpop.permute.xlu1 %2914 }
 0xeda   : > { %5572 = vmatpush3.bf16.xpose.msra.mxu0 %v2932_v44  ;;  %v2805_v14 = vmul.f32 %v6250_v46, %v8094_v15  ;;  %v2938_v41 = vsel %vm1198_vm0, %v2915_v34, 0 }
 0xedb   : > { %5683 = vmatprep.subr.msk.bf16.mxu0 %vm1198_vm0, %v2913_v19 }
 0xedc   : > { %v2810_v42 = vpack.c.bf16 %v2806_v13, %v2805_v14 }
 0xedd   : > { %v2903_v55 = vpop.permute.xlu1 %2902 }
 0xee0   : > { %v6252_v10 = vpop.eup %6251 }
 0xee1   : > { %v2804_v57 = vmul.f32 %v6252_v10, %v6236_v35  ;;  %v2905_v35 = vpop.permute.xlu0 %2904  ;;  %v2907_v15 = vpop.permute.xlu1 %2906 }
 0xee2   : > { %5574 = vmatpush3.bf16.xpose.msra.mxu0 %v2935_v22 }
 0xee3   : > { %5684 = vmatprep.subr.msk.bf16.mxu0 %vm1198_vm0, %v2915_v34  ;;  %v2809_v48 = vpack.c.bf16 %v2804_v57, %v2803_v39 }
 0xee5   : > { %5565 = vmatprep.mubr.msk.bf16.mxu0 %vm1288_vm1, %v2809_v48 }
 0xee6   : > { %5566 = vmatmul.mubr.msk.bf16.gmra.mrb[52].mxu0 %vm1288_vm1, %v2810_v42 }
 0xee7   : > { %5577 = vmatprep.mubr.msk.bf16.mxu0 %vm1198_vm0, %v2901_v36 }
 0xeea   : > { %5576 = vmatpush3.bf16.xpose.msra.mxu0 %v2938_v41 }
 0xef1   : > { %5578 = vmatmul.mubr.msk.bf16.vlgmr.msra.gmra.mrb[56].mxu0 %vm1198_vm0, %v2903_v55 }
 0xef2   : > { %5581 = vmatprep.mubr.msk.bf16.mxu0 %vm1198_vm0, %v2905_v35 }
 0xef9   : > { %5582 = vmatmul.mubr.msk.bf16.gmra.mrb[60].mxu0 %vm1198_vm0, %v2907_v15 }
 0xf80   : > { %v8143_v30 = vpop.f32.mrb[48].mxu0 }
 0xf81   : > { %v8145_v49 = vpop.f32.mrb[49].mxu0 }
 0xf82   : > { %v8147_v33 = vpop.f32.mrb[50].mxu0 }
 0xf83   : > { %v8151_v8 = vpop.f32.mrb[51].mxu0 }
 0xfb9   : > { %v8155_v44 = vpop.f32.mrb[52].mxu0 }
 0xfba   : > { %9031 = vst [vmem:[#allocation50_spill] sm:$0xff] %v8155_v44  ;;  %v8157_v60 = vpop.f32.mrb[53].mxu0 }
 0xfbb   : > { %9032 = vst [vmem:[#allocation51_spill] sm:$0xff] %v8157_v60  ;;  %v8159_v29 = vpop.f32.mrb[54].mxu0 }
 0xfbc   : > { %9033 = vst [vmem:[#allocation52_spill] sm:$0xff] %v8159_v29  ;;  %v8163_v10 = vpop.f32.mrb[55].mxu0 }
 0xfbd   : > { %9034 = vst [vmem:[#allocation53_spill] sm:$0xff] %v8163_v10 }
 0xfc4   : > { %v5579_v22 = vpop.f32.mrb[56].mxu0 }
 0xfc5   : > { %v2974_v39 = vpop.f32.mrb[57].mxu0  ;;  %v3011_v57 = vsel %vm1288_vm1, %v5579_v22, -inf }
 0xfc6   : > { %3012 = vmax.xlane.f32.xlu0 %v3011_v57  ;;  %v5580_v34 = vpop.f32.mrb[58].mxu0  ;;  %v3005_v42 = vsel %vm1288_vm1, %v2974_v39, -inf }
 0xfc7   : > { %v2977_v14 = vpop.f32.mrb[59].mxu0  ;;  %v3014_v55 = vsel %vm1288_vm1, %v5580_v34, -inf }
 0xfc8   : > { %v3008_v48 = vsel %vm1288_vm1, %v2977_v14, -inf }
 0xfc9   : > { %3009 = vmax.xlane.f32.xlu1 %v3008_v48 }
 0xfca   : > { %3006 = vmax.xlane.f32.xlu0 %v3005_v42 }
 0xfcc   : > { %v5583_v36 = vpop.f32.mrb[60].mxu0 }
 0xfcd   : > { %v2990_v41 = vpop.f32.mrb[61].mxu0  ;;  %v3023_v13 = vsel %vm1288_vm1, %v5583_v36, -inf }
 0xfce   : > { %3015 = vmax.xlane.f32.xlu0 %v3014_v55  ;;  %v8171_v35 = vpop.f32.mrb[62].mxu0  ;;  %v3017_v57 = vsel %vm1288_vm1, %v2990_v41, -inf }
 0xfcf   : > { %v8173_v15 = vpop.f32.mrb[63].mxu0  ;;  %v3026_v48 = vsel %vm1288_vm1, %v8171_v35, -inf }
 0xfd0   : > { %v3020_v42 = vsel %vm1288_vm1, %v8173_v15, -inf }
 0xfd2   : > { %3024 = vmax.xlane.f32.xlu0 %v3023_v13 }
 0xfd6   : > { %3018 = vmax.xlane.f32.xlu0 %v3017_v57 }
 0xfda   : > { %3099 = vrot.lane.b32.xlu1 %v7459_v53, %s6746_s13 }
 0xfde   : > { %3101 = vrot.lane.b32.xlu1 %v7481_v11, %s6746_s13 }
 0xfec   : > { %3097 = vrot.lane.b32.xlu0 %v7463_v58, %s6746_s13 }
0x1002   : > { %3027 = vmax.xlane.f32.xlu1 %v3026_v48 }
0x1006   : > { %3021 = vmax.xlane.f32.xlu1 %v3020_v42 }
0x1017   : > { %3103 = vrot.lane.b32.xlu1 %v7478_v9, %s6746_s13 }
0x1053   : > { %v3013_v13 = vpop.xlane.xlu0 %3012 }
0x1054   : > { %v3031_v55 = vsub.f32 %v5579_v22, %v3013_v13 }
0x1056   : > { %v3041_v57 = vmul.f32 1.442695, %v3031_v55  ;;  %v3010_v46 = vpop.xlane.xlu1 %3009 }
0x1057   : > { %v3007_v19 = vpop.xlane.xlu0 %3006  ;;  %v3030_v60 = vsub.f32 %v2977_v14, %v3010_v46 }
0x1058   : > { %6253 = vpow2.f32 %v3041_v57  ;;  %v3029_v12 = vsub.f32 %v2974_v39, %v3007_v19 }
0x1059   : > { %v3039_v48 = vmul.f32 1.442695, %v3030_v60 }
0x105a   : > { %v3037_v10 = vmul.f32 1.442695, %v3029_v12 }
0x105b   : > { %v3016_v44 = vpop.xlane.xlu0 %3015 }
0x105c   : > { %6255 = vpow2.f32 %v3037_v10  ;;  %v3032_v29 = vsub.f32 %v5580_v34, %v3016_v44  ;;  %v3100_v44 = vpop.permute.xlu1 %3099 }
0x105e   : > { %v3043_v61 = vmul.f32 1.442695, %v3032_v29 }
0x105f   : > { %v3025_v25 = vpop.xlane.xlu0 %3024 }
0x1060   : > { %6257 = vpow2.f32 %v3043_v61  ;;  %v3035_v42 = vsub.f32 %v5583_v36, %v3025_v25 }
0x1061   : > { %6259 = vpow2.f32 %v3039_v48 }
0x1062   : > { %v8189_v38 = vpop.eup %6253  ;;  %v3049_v23 = vmul.f32 1.442695, %v3035_v42 }
0x1063   : > { %v3019_v22 = vpop.xlane.xlu0 %3018  ;;  %v3059_v13 = vsel %vm1288_vm1, %v8189_v38, 0.0 }
0x1064   : > { %6261 = vpow2.f32 %v3049_v23  ;;  %v3033_v19 = vsub.f32 %v2990_v41, %v3019_v22  ;;  %3060 = vadd.xlane.f32.xlu0 %v3059_v13  ;;  %v3102_v23 = vpop.permute.xlu1 %3101 }
0x1066   : > { %v8193_v12 = vpop.eup %6255  ;;  %v3045_v46 = vmul.f32 1.442695, %v3033_v19 }
0x1067   : > { %v3098_v60 = vpop.permute.xlu0 %3097  ;;  %v3053_v61 = vsel %vm1288_vm1, %v8193_v12, 0.0 }
0x1068   : > { %6263 = vpow2.f32 %v3045_v46  ;;  %3054 = vadd.xlane.f32.xlu0 %v3053_v61  ;;  %5585 = vmatprep.subr.bf16.mxu1 %v3098_v60 }
0x1069   : > { %5586 = vmatpush3.bf16.msra.mxu1 %v3098_v60 }
0x106a   : > { %v6258_v25 = vpop.eup %6257  ;;  %5587 = vmatprep.subr.bf16.mxu1 %v3100_v44 }
0x106b   : > { %v3062_v29 = vsel %vm1288_vm1, %v6258_v25, 0.0  ;;  %v6260_v10 = vpop.eup %6259 }
0x106c   : > { %3063 = vadd.xlane.f32.xlu1 %v3062_v29  ;;  %v3056_v14 = vsel %vm1288_vm1, %v6260_v10, 0.0 }
0x106d   : > { %5588 = vmatpush3.bf16.msra.mxu1 %v3100_v44 }
0x106e   : > { %v8198_v39 = vpop.eup %6261  ;;  %5589 = vmatprep.subr.bf16.mxu1 %v3102_v23 }
0x106f   : > { %v3071_v34 = vsel %vm1288_vm1, %v8198_v39, 0.0 }
0x1070   : > { %3072 = vadd.xlane.f32.xlu0 %v3071_v34  ;;  %3057 = vadd.xlane.f32.xlu1 %v3056_v14 }
0x1071   : > { %5590 = vmatpush3.bf16.msra.mxu1 %v3102_v23 }
0x1072   : > { %v8203_v36 = vpop.eup %6263 }
0x1073   : > { %v3065_v41 = vsel %vm1288_vm1, %v8203_v36, 0.0 }
0x1074   : > { %3066 = vadd.xlane.f32.xlu0 %v3065_v41 }
0x1081   : > { %3196 = vrot.lane.b32.xlu1 %v7380_v20, %s6747_s8 }
0x1085   : > { %3198 = vrot.lane.b32.xlu1 %v7388_v37, %s6747_s8 }
0x108f   : > { %v3028_v55 = vpop.xlane.xlu1 %3027 }
0x1090   : > { %v3036_v57 = vsub.f32 %v8171_v35, %v3028_v55 }
0x1092   : > { %v3051_v48 = vmul.f32 1.442695, %v3036_v57 }
0x1093   : > { %v3022_v42 = vpop.xlane.xlu1 %3021 }
0x1094   : > { %6265 = vpow2.f32 %v3051_v48  ;;  %v3034_v22 = vsub.f32 %v8173_v15, %v3022_v42 }
0x1096   : > { %v3047_v13 = vmul.f32 1.442695, %v3034_v22 }
0x1097   : > { %v3104_v19 = vpop.permute.xlu1 %3103 }
0x1098   : > { %5591 = vmatprep.subr.bf16.mxu1 %v3104_v19  ;;  %6267 = vpow2.f32 %v3047_v13 }
0x1099   : > { %5592 = vmatpush3.bf16.msra.mxu1 %v3104_v19 }
0x109e   : > { %v6266_v46 = vpop.eup %6265 }
0x109f   : > { %v3074_v44 = vsel %vm1288_vm1, %v6266_v46, 0.0 }
0x10a0   : > { %3075 = vadd.xlane.f32.xlu0 %v3074_v44 }
0x10a2   : > { %v6268_v20 = vpop.eup %6267 }
0x10a3   : > { %v3068_v37 = vsel %vm1288_vm1, %v6268_v20, 0.0 }
0x10a9   : > { %3069 = vadd.xlane.f32.xlu1 %v3068_v37 }
0x10b6   : > { %3194 = vrot.lane.b32.xlu0 %v7370_v6, %s6747_s8 }
0x10ba   : > { %3186 = vrot.lane.b32.xlu0 %v7372_v7, %s6747_s8  ;;  %3200 = vrot.lane.b32.xlu1 %v7396_v54, %s6747_s8 }
0x10be   : > { %3190 = vrot.lane.b32.xlu0 %v7390_v40, %s6747_s8  ;;  %3188 = vrot.lane.b32.xlu1 %v7382_v21, %s6747_s8 }
0x10c2   : > { %3192 = vrot.lane.b32.xlu1 %v7398_v56, %s6747_s8 }
0x10f1   : > { %v3061_v35 = vpop.xlane.xlu0 %3060 }
0x10f5   : > { %v3055_v60 = vpop.xlane.xlu0 %3054 }
0x10f9   : > { %v3064_v15 = vpop.xlane.xlu1 %3063 }
0x10fa   : > { %6269 = vrcp.f32 %v3064_v15 }
0x10fb   : > { %6271 = vrcp.f32 %v3055_v60 }
0x10fc   : > { %6273 = vrcp.f32 %v3061_v35 }
0x10fd   : > { %v3058_v6 = vpop.xlane.xlu1 %3057  ;;  %v3073_v41 = vpop.xlane.xlu0 %3072 }
0x10fe   : > { %6275 = vrcp.f32 %v3058_v6 }
0x1101   : > { %v3067_v55 = vpop.xlane.xlu0 %3066  ;;  %v3197_v57 = vpop.permute.xlu1 %3196 }
0x1104   : > { %v6270_v7 = vpop.eup %6269 }
0x1105   : > { %v6272_v61 = vpop.eup %6271  ;;  %v3088_v23 = vmul.f32 %v6270_v7, %v6258_v25  ;;  %v3199_v22 = vpop.permute.xlu1 %3198 }
0x1106   : > { %v6274_v54 = vpop.eup %6273  ;;  %v3085_v40 = vmul.f32 %v6272_v61, %v8193_v12  ;;  %v3218_v12 = vsel %vm1198_vm0, %v3197_v57, 0  ;;  %v3221_v35 = vsel %vm1198_vm0, %v3199_v22, 0 }
0x1107   : > { %v3087_v21 = vmul.f32 %v6274_v54, %v8189_v38 }
0x1108   : > { %v6276_v29 = vpop.eup %6275 }
0x1109   : > { %v3086_v34 = vmul.f32 %v6276_v29, %v6260_v10  ;;  %v3094_v56 = vpack.c.bf16 %v3088_v23, %v3087_v21  ;;  %v9035_v23 = vmov 0  }
0x110b   : > { %v3093_v14 = vpack.c.bf16 %v3086_v34, %v3085_v40 }
0x110d   : > { %5593 = vmatprep.mubr.msk.bf16.mxu1 %vm1288_vm1, %v3093_v14 }
0x110e   : > { %5594 = vmatmul.mubr.msk.bf16.vlgmr.msra.gmra.mrb[64].mxu1 %vm1288_vm1, %v3094_v56 }
0x112d   : > { %v3076_v48 = vpop.xlane.xlu0 %3075 }
0x112e   : > { %6277 = vrcp.f32 %v3076_v48 }
0x112f   : > { %6279 = vrcp.f32 %v3067_v55 }
0x1130   : > { %6281 = vrcp.f32 %v3073_v41 }
0x1131   : > { %v3195_v42 = vpop.permute.xlu0 %3194 }
0x1132   : > { %v3215_v13 = vsel %vm1198_vm0, %v3195_v42, 0  ;;  %5685 = vmatprep.subr.msk.bf16.mxu1 %vm1198_vm0, %v3195_v42 }
0x1133   : > { %5602 = vmatpush3.bf16.xpose.msra.mxu1 %v3215_v13 }
0x1134   : > { %5686 = vmatprep.subr.msk.bf16.mxu1 %vm1198_vm0, %v3197_v57 }
0x1135   : > { %v3187_v29 = vpop.permute.xlu0 %3186 }
0x1136   : > { %v3070_v38 = vpop.xlane.xlu1 %3069 }
0x1137   : > { %6283 = vrcp.f32 %v3070_v38 }
0x1138   : > { %v6278_v25 = vpop.eup %6277 }
0x1139   : > { %v6280_v10 = vpop.eup %6279  ;;  %v3092_v37 = vmul.f32 %v6278_v25, %v6266_v46 }
0x113a   : > { %v6282_v19 = vpop.eup %6281  ;;  %v3089_v15 = vmul.f32 %v6280_v10, %v8203_v36  ;;  %v3201_v6 = vpop.permute.xlu1 %3200 }
0x113b   : > { %5604 = vmatpush3.bf16.xpose.msra.mxu1 %v3218_v12  ;;  %v3091_v7 = vmul.f32 %v6282_v19, %v8198_v39  ;;  %v3224_v46 = vsel %vm1198_vm0, %v3201_v6, 0 }
0x113c   : > { %5687 = vmatprep.subr.msk.bf16.mxu1 %vm1198_vm0, %v3199_v22 }
0x113d   : > { %v3096_v54 = vpack.c.bf16 %v3092_v37, %v3091_v7 }
0x113e   : > { %v3189_v36 = vpop.permute.xlu1 %3188 }
0x1141   : > { %v6284_v44 = vpop.eup %6283 }
0x1142   : > { %v3090_v60 = vmul.f32 %v6284_v44, %v6268_v20  ;;  %v3191_v20 = vpop.permute.xlu0 %3190  ;;  %v3193_v39 = vpop.permute.xlu1 %3192 }
0x1143   : > { %5606 = vmatpush3.bf16.xpose.msra.mxu1 %v3221_v35 }
0x1144   : > { %5688 = vmatprep.subr.msk.bf16.mxu1 %vm1198_vm0, %v3201_v6  ;;  %v3095_v61 = vpack.c.bf16 %v3090_v60, %v3089_v15 }
0x1146   : > { %5597 = vmatprep.mubr.msk.bf16.mxu1 %vm1288_vm1, %v3095_v61 }
0x1147   : > { %5598 = vmatmul.mubr.msk.bf16.gmra.mrb[68].mxu1 %vm1288_vm1, %v3096_v54 }
0x1148   : > { %5609 = vmatprep.mubr.msk.bf16.mxu1 %vm1198_vm0, %v3187_v29 }
0x114b   : > { %5608 = vmatpush3.bf16.xpose.msra.mxu1 %v3224_v46 }
0x1152   : > { %5610 = vmatmul.mubr.msk.bf16.vlgmr.msra.gmra.mrb[72].mxu1 %vm1198_vm0, %v3189_v36 }
0x1153   : > { %5613 = vmatprep.mubr.msk.bf16.mxu1 %vm1198_vm0, %v3191_v20 }
0x115a   : > { %5614 = vmatmul.mubr.msk.bf16.gmra.mrb[76].mxu1 %vm1198_vm0, %v3193_v39 }
0x115b   : > { %4163 = vmatprep.mubr.bf16.mxu1 %v9035_v23 }
0x11e1   : > { %v8248_v40 = vpop.f32.mrb[64].mxu1 }
0x11e2   : > { %v8250_v34 = vpop.f32.mrb[65].mxu1 }
0x11e3   : > { %v8252_v21 = vpop.f32.mrb[66].mxu1 }
0x11e4   : > { %v8256_v56 = vpop.f32.mrb[67].mxu1 }
0x121a   : > { %v8260_v55 = vpop.f32.mrb[68].mxu1 }
0x121b   : > { %v8262_v57 = vpop.f32.mrb[69].mxu1 }
0x121c   : > { %v8264_v48 = vpop.f32.mrb[70].mxu1 }
0x121d   : > { %v8268_v22 = vpop.f32.mrb[71].mxu1 }
0x1225   : > { %v5611_v38 = vpop.f32.mrb[72].mxu1 }
0x1226   : > { %v3260_v12 = vpop.f32.mrb[73].mxu1  ;;  %v3297_v37 = vsel %vm1288_vm1, %v5611_v38, -inf }
0x1227   : > { %v5612_v25 = vpop.f32.mrb[74].mxu1  ;;  %v3291_v10 = vsel %vm1288_vm1, %v3260_v12, -inf }
0x1228   : > { %3292 = vmax.xlane.f32.xlu0 %v3291_v10  ;;  %v3263_v19 = vpop.f32.mrb[75].mxu1  ;;  %v3300_v6 = vsel %vm1288_vm1, %v5612_v25, -inf }
0x1229   : > { %v3294_v44 = vsel %vm1288_vm1, %v3263_v19, -inf }
0x122a   : > { %3295 = vmax.xlane.f32.xlu1 %v3294_v44 }
0x122c   : > { %3298 = vmax.xlane.f32.xlu0 %v3297_v37 }
0x122d   : > { %v5615_v35 = vpop.f32.mrb[76].mxu1 }
0x122e   : > { %v3276_v15 = vpop.f32.mrb[77].mxu1  ;;  %v3309_v46 = vsel %vm1288_vm1, %v5615_v35, -inf }
0x122f   : > { %v5616_v60 = vpop.f32.mrb[78].mxu1  ;;  %v3303_v54 = vsel %vm1288_vm1, %v3276_v15, -inf }
0x1230   : > { %3301 = vmax.xlane.f32.xlu0 %v3300_v6  ;;  %v3279_v7 = vpop.f32.mrb[79].mxu1  ;;  %v3312_v29 = vsel %vm1288_vm1, %v5616_v60, -inf }
0x1231   : > { %v3306_v61 = vsel %vm1288_vm1, %v3279_v7, -inf }
0x1232   : > { %3307 = vmax.xlane.f32.xlu1 %v3306_v61 }
0x1234   : > { %3304 = vmax.xlane.f32.xlu0 %v3303_v54 }
0x1236   : > { %3313 = vmax.xlane.f32.xlu1 %v3312_v29 }
0x1238   : > { %3310 = vmax.xlane.f32.xlu0 %v3309_v46 }
0x124e   : > { %3383 = vrot.lane.b32.xlu0 %v7463_v58, %s6747_s8 }
0x12b5   : > { %v3293_v36 = vpop.xlane.xlu0 %3292 }
0x12b6   : > { %v3315_v20 = vsub.f32 %v3260_v12, %v3293_v36 }
0x12b7   : > { %v3296_v39 = vpop.xlane.xlu1 %3295 }
0x12b8   : > { %v3323_v37 = vmul.f32 1.442695, %v3315_v20  ;;  %v3316_v6 = vsub.f32 %v3263_v19, %v3296_v39 }
0x12b9   : > { %v3299_v10 = vpop.xlane.xlu0 %3298 }
0x12ba   : > { %v3317_v44 = vsub.f32 %v5611_v38, %v3299_v10  ;;  %v3325_v29 = vmul.f32 1.442695, %v3316_v6 }
0x12bc   : > { %v3327_v61 = vmul.f32 1.442695, %v3317_v44 }
0x12bd   : > { %v3302_v13 = vpop.xlane.xlu0 %3301 }
0x12be   : > { %6285 = vpow2.f32 %v3327_v61  ;;  %v3318_v54 = vsub.f32 %v5612_v25, %v3302_v13 }
0x12bf   : > { %v3308_v42 = vpop.xlane.xlu1 %3307  ;;  %6287 = vpow2.f32 %v3323_v37 }
0x12c0   : > { %v3329_v14 = vmul.f32 1.442695, %v3318_v54 }
0x12c1   : > { %v3305_v41 = vpop.xlane.xlu0 %3304 }
0x12c2   : > { %6289 = vpow2.f32 %v3329_v14  ;;  %v3319_v46 = vsub.f32 %v3276_v15, %v3305_v41  ;;  %v3320_v41 = vsub.f32 %v3279_v7, %v3308_v42 }
0x12c3   : > { %6291 = vpow2.f32 %v3325_v29  ;;  %v3314_v58 = vpop.xlane.xlu1 %3313 }
0x12c4   : > { %v3331_v38 = vmul.f32 1.442695, %v3319_v46  ;;  %v3322_v20 = vsub.f32 %v5616_v60, %v3314_v58  ;;  %v3333_v10 = vmul.f32 1.442695, %v3320_v41  ;;  %v9036_v58 = vpack.i.bf16 %v7815_v63, %v7809_v28 }
0x12c5   : > { %v3311_v23 = vpop.xlane.xlu0 %3310  ;;  %v9040_v28 = vpack.i.bf16 %v8047_v43, %v8041_v24  ;;  %v9041_v63 = vpack.i.bf16 %v7835_v0, %v7831_v32  ;;  %v9045_v32 = vpack.i.bf16 %v8043_v45, %v8039_v27  ;;  %v9047_v0 = vpack.i.bf16 %v8147_v33, %v8143_v30 }
0x12c6   : > { %v3321_v12 = vsub.f32 %v5615_v35, %v3311_v23  ;;  %v3337_v23 = vmul.f32 1.442695, %v3322_v20 }
0x12c8   : > { %v8282_v36 = vpop.eup %6285  ;;  %v3335_v19 = vmul.f32 1.442695, %v3321_v12  ;;  %v9037_v12 = vpack.i.bf16 %v7839_v5, %v7833_v2  ;;  %v9046_v2 = vpack.i.bf16 %v7827_v62, %v7821_v51  ;;  %v9048_v5 = vpack.i.bf16 %v7851_v18, %v7845_v1  ;;  %v9055_v18 = vld [vmem:[#allocation45_spill] sm:$0xff] }
0x12c9   : > { %v3384_v39 = vpop.permute.xlu0 %3383  ;;  %v3345_v13 = vsel %vm1288_vm1, %v8282_v36, 0.0  ;;  %v8286_v25 = vpop.eup %6287  ;;  %v9050_v51 = vpack.i.bf16 %v7955_v47, %v7949_v52  ;;  %v9051_v62 = vpack.i.bf16 %v7823_v31, %v7819_v26 }
0x12ca   : > { %6293 = vpow2.f32 %v3335_v19  ;;  %3346 = vadd.xlane.f32.xlu0 %v3345_v13  ;;  %5617 = vmatprep.subr.bf16.mxu0 %v3384_v39  ;;  %v3339_v35 = vsel %vm1288_vm1, %v8286_v25, 0.0 }
0x12cb   : > { %5618 = vmatpush3.bf16.msra.mxu0 %v3384_v39  ;;  %6295 = vpow2.f32 %v3331_v38 }
0x12cc   : > { %v8288_v14 = vpop.eup %6289  ;;  %6297 = vpow2.f32 %v3337_v23 }
0x12cd   : > { %v3348_v15 = vsel %vm1288_vm1, %v8288_v14, 0.0  ;;  %v6292_v60 = vpop.eup %6291  ;;  %6299 = vpow2.f32 %v3333_v10 }
0x12ce   : > { %3340 = vadd.xlane.f32.xlu0 %v3339_v35  ;;  %3349 = vadd.xlane.f32.xlu1 %v3348_v15  ;;  %v3342_v44 = vsel %vm1288_vm1, %v6292_v60, 0.0 }
0x12d2   : > { %3343 = vadd.xlane.f32.xlu1 %v3342_v44 }
0x12d4   : > { %v8295_v37 = vpop.eup %6293 }
0x12d5   : > { %v3357_v42 = vsel %vm1288_vm1, %v8295_v37, 0.0  ;;  %v8299_v7 = vpop.eup %6295 }
0x12d6   : > { %3358 = vadd.xlane.f32.xlu1 %v3357_v42  ;;  %v3351_v6 = vsel %vm1288_vm1, %v8299_v7, 0.0  ;;  %v8303_v61 = vpop.eup %6297 }
0x12d7   : > { %v3360_v54 = vsel %vm1288_vm1, %v8303_v61, 0.0  ;;  %v6300_v29 = vpop.eup %6299 }
0x12d8   : > { %v3354_v46 = vsel %vm1288_vm1, %v6300_v29, 0.0 }
0x12da   : > { %3352 = vadd.xlane.f32.xlu1 %v3351_v6 }
0x12de   : > { %3361 = vadd.xlane.f32.xlu1 %v3360_v54  ;;  %v6015_v54 = vld [vmem:[%s7298_s6 + $0x10] sm:$0xff]  }
0x12e2   : > { %3355 = vadd.xlane.f32.xlu1 %v3354_v46  ;;  %v6019_v46 = vld [vmem:[%s7298_s6 + $0x30] sm:$0xff]  }
0x12e4   : > { %3387 = vrot.lane.b32.xlu0 %v7481_v11, %s6747_s8  ;;  %v9038_v11 = vpack.i.bf16 %v7943_v16, %v7937_v3  ;;  %v9052_v3 = vld [vmem:[#allocation43_spill] sm:$0xff]  ;;  %v9056_v16 = vld [vmem:[#allocation44_spill] sm:$0xff] }
0x12e5   : > { %v9057_v27 = vpack.i.bf16 %v9055_v18, %v9056_v16  ;;  %v9064_v18 = vld [vmem:[#allocation52_spill] sm:$0xff]  ;;  %v9065_v16 = vld [vmem:[#allocation50_spill] sm:$0xff] }
0x12e8   : > { %3389 = vrot.lane.b32.xlu0 %v7478_v9, %s6747_s8  ;;  %v9039_v9 = vpack.i.bf16 %v7811_v59, %v7807_v4  ;;  %v9043_v4 = vpack.i.bf16 %v7939_v17, %v7935_v50  ;;  %v9044_v59 = vpack.i.bf16 %v8256_v56, %v8250_v34  ;;  %v9049_v50 = vpack.i.bf16 %v8252_v21, %v8248_v40  ;;  %v9053_v17 = vld [vmem:[#allocation42_spill] sm:$0xff] }
0x12e9   : > { %v9054_v1 = vpack.i.bf16 %v9052_v3, %v9053_v17 }
0x12ec   : > { %5842 = vrot.lane.b32.xlu0 %v9036_v58, %s6747_s8  ;;  %v6020_v58 = vld [vmem:[%s7298_s6 + $0x38] sm:$0xff]  }
0x12f0   : > { %5852 = vrot.lane.b32.xlu0 %v9037_v12, %s6746_s13 }
0x12f3   : > { %3385 = vrot.lane.b32.xlu1 %v7459_v53, %s6747_s8  ;;  %v9042_v53 = vpack.i.bf16 %v8151_v8, %v8145_v49 }
0x12f4   : > { %5862 = vrot.lane.b32.xlu0 %v9038_v11, %s6745_s9 }
0x12f7   : > { %5847 = vrot.lane.b32.xlu1 %v9039_v9, %s6747_s8 }
0x12f8   : > { %5872 = vrot.lane.b32.xlu0 %v9040_v28, %s6744_s2 }
0x12fb   : > { %5857 = vrot.lane.b32.xlu1 %v9041_v63, %s6746_s13 }
0x12fc   : > { %5882 = vrot.lane.b32.xlu0 %v9042_v53, %s6743_s15 }
0x12ff   : > { %5867 = vrot.lane.b32.xlu1 %v9043_v4, %s6745_s9 }
0x1300   : > { %5892 = vrot.lane.b32.xlu0 %v9044_v59, %s6742_s20  ;;  %v9058_v59 = vld [vmem:[#allocation48_spill] sm:$0xff] }
0x1303   : > { %5877 = vrot.lane.b32.xlu1 %v9045_v32, %s6744_s2  ;;  %v9059_v32 = vld [vmem:[#allocation46_spill] sm:$0xff] }
0x1304   : > { %5902 = vrot.lane.b32.xlu0 %v9046_v2, %s6747_s8  ;;  %v9060_v2 = vpack.i.bf16 %v9058_v59, %v9059_v32 }
0x1307   : > { %5887 = vrot.lane.b32.xlu1 %v9047_v0, %s6743_s15 }
0x1308   : > { %5912 = vrot.lane.b32.xlu0 %v9048_v5, %s6746_s13  ;;  %v9061_v5 = vld [vmem:[#allocation49_spill] sm:$0xff] }
0x130b   : > { %5897 = vrot.lane.b32.xlu1 %v9049_v50, %s6742_s20  ;;  %v9062_v50 = vld [vmem:[#allocation47_spill] sm:$0xff] }
0x130c   : > { %5922 = vrot.lane.b32.xlu0 %v9050_v51, %s6745_s9  ;;  %v9063_v51 = vpack.i.bf16 %v9061_v5, %v9062_v50  ;;  %v9075_v5 = vld [vmem:[#allocation34_spill] sm:$0xff] }
0x130f   : > { %5907 = vrot.lane.b32.xlu1 %v9051_v62, %s6747_s8 }
0x1313   : > { %5917 = vrot.lane.b32.xlu1 %v9054_v1, %s6746_s13 }
0x1317   : > { %5927 = vrot.lane.b32.xlu1 %v9057_v27, %s6745_s9  ;;  %v9066_v27 = vpack.i.bf16 %v9064_v18, %v9065_v16 }
0x1357   : > { %v3347_v24 = vpop.xlane.xlu0 %3346 }
0x135b   : > { %v3341_v45 = vpop.xlane.xlu0 %3340  ;;  %v3350_v43 = vpop.xlane.xlu1 %3349 }
0x135c   : > { %6301 = vrcp.f32 %v3341_v45  ;;  %v9068_v45 = vld [vmem:[#allocation51_spill] sm:$0xff] }
0x135f   : > { %v3344_v52 = vpop.xlane.xlu1 %3343  ;;  %v3388_v21 = vpop.permute.xlu0 %3387 }
0x1360   : > { %6303 = vrcp.f32 %v3344_v52  ;;  %v9070_v52 = vpack.i.bf16 %v8264_v48, %v8260_v55 }
0x1361   : > { %6305 = vrcp.f32 %v3350_v43 }
0x1362   : > { %6307 = vrcp.f32 %v3347_v24  ;;  %v9067_v24 = vld [vmem:[#allocation53_spill] sm:$0xff] }
0x1363   : > { %v3359_v47 = vpop.xlane.xlu1 %3358  ;;  %v3390_v39 = vpop.permute.xlu0 %3389  ;;  %v9069_v43 = vpack.i.bf16 %v9067_v24, %v9068_v45 }
0x1366   : > { %v6302_v26 = vpop.eup %6301 }
0x1367   : > { %v3353_v30 = vpop.xlane.xlu1 %3352  ;;  %v3371_v33 = vmul.f32 %v6302_v26, %v8286_v25  ;;  %v5843_v26 = vpop.permute.xlu0 %5842 }
0x1368   : > { %6309 = vrcp.f32 %v3353_v30 }
0x136a   : > { %v6304_v31 = vpop.eup %6303 }
0x136b   : > { %v3362_v49 = vpop.xlane.xlu1 %3361  ;;  %v3372_v8 = vmul.f32 %v6304_v31, %v6292_v60  ;;  %v6306_v38 = vpop.eup %6305 }
0x136c   : > { %v6308_v20 = vpop.eup %6307  ;;  %v3374_v25 = vmul.f32 %v6306_v38, %v8288_v14  ;;  %v5844_v38 = vunpack.i.l.bf16 %v5843_v26 }
0x136d   : > { %v3379_v40 = vpack.c.bf16 %v3372_v8, %v3371_v33  ;;  %v3373_v23 = vmul.f32 %v6308_v20, %v8282_v36  ;;  %v6013_v36 = vld [vmem:[%s7298_s6] sm:$0xff]   ;;  %v5845_v20 = vunpack.i.h.bf16 %v5843_v26 }
0x136f   : > { %5625 = vmatprep.mubr.msk.bf16.mxu0 %vm1288_vm1, %v3379_v40  ;;  %v3356_v34 = vpop.xlane.xlu1 %3355  ;;  %v3380_v15 = vpack.c.bf16 %v3374_v25, %v3373_v23 }
0x1370   : > { %6311 = vrcp.f32 %v3356_v34 }
0x1371   : > { %6313 = vrcp.f32 %v3362_v49  ;;  %v5853_v49 = vpop.permute.xlu0 %5852 }
0x1372   : > { %6315 = vrcp.f32 %v3359_v47  ;;  %v6310_v19 = vpop.eup %6309  ;;  %v9071_v47 = vpack.i.bf16 %v8268_v22, %v8262_v57 }
0x1373   : > { %v3386_v56 = vpop.permute.xlu1 %3385  ;;  %v3375_v35 = vmul.f32 %v6310_v19, %v8299_v7  ;;  %v6014_v7 = vld [vmem:[%s7298_s6 + $0x8] sm:$0xff]   ;;  %v5854_v19 = vunpack.i.l.bf16 %v5853_v49 }
0x1374   : > { %5619 = vmatprep.subr.bf16.mxu0 %v3386_v56 }
0x1375   : > { %5620 = vmatpush3.bf16.msra.mxu0 %v3386_v56  ;;  %v5863_v8 = vpop.permute.xlu0 %5862 }
0x1376   : > { %5621 = vmatprep.subr.bf16.mxu0 %v3388_v21  ;;  %v5865_v25 = vunpack.i.h.bf16 %v5863_v8 }
0x1377   : > { %v5848_v30 = vpop.permute.xlu1 %5847 }
0x1379   : > { %5622 = vmatpush3.bf16.msra.mxu0 %v3388_v21  ;;  %v5873_v34 = vpop.permute.xlu0 %5872 }
0x137a   : > { %v6312_v13 = vpop.eup %6311  ;;  %5623 = vmatprep.subr.bf16.mxu0 %v3390_v39 }
0x137b   : > { %v3376_v41 = vmul.f32 %v6312_v13, %v6300_v29  ;;  %v6314_v60 = vpop.eup %6313  ;;  %v6016_v29 = vld [vmem:[%s7298_s6 + $0x18] sm:$0xff]   ;;  %v5858_v31 = vpop.permute.xlu1 %5857  ;;  %v5864_v13 = vunpack.i.l.bf16 %v5863_v8 }
0x137c   : > { %v6316_v44 = vpop.eup %6315  ;;  %v3378_v14 = vmul.f32 %v6314_v60, %v8303_v61  ;;  %v6017_v61 = vld [vmem:[%s7298_s6 + $0x20] sm:$0xff]   ;;  %v5875_v60 = vunpack.i.h.bf16 %v5873_v34 }
0x137d   : > { %5624 = vmatpush3.bf16.msra.mxu0 %v3390_v39  ;;  %v3381_v10 = vpack.c.bf16 %v3376_v41, %v3375_v35  ;;  %v3377_v42 = vmul.f32 %v6316_v44, %v8295_v37  ;;  %v6018_v37 = vld [vmem:[%s7298_s6 + $0x28] sm:$0xff]   ;;  %v5883_v55 = vpop.permute.xlu0 %5882  ;;  %v5855_v39 = vunpack.i.h.bf16 %v5853_v49  ;;  %v5874_v41 = vunpack.i.l.bf16 %v5873_v34  ;;  %v9072_v35 = vld [vmem:[#allocation35_spill] sm:$0xff] }
0x137e   : > { %5633 = vmatprep.subr.bf16.mxu0 %v6013_v36  ;;  %v9073_v44 = vld [vmem:[#allocation37_spill] sm:$0xff] }
0x137f   : > { %v3382_v6 = vpack.c.bf16 %v3378_v14, %v3377_v42  ;;  %v5868_v33 = vpop.permute.xlu1 %5867  ;;  %v3697_v14 = vsel %vm1198_vm0, %v9073_v44, %v5845_v20 }
0x1380   : > { %5626 = vmatmul.mubr.msk.bf16.vlgmr.msra.gmra.mrb[64].mxu0 %vm1288_vm1, %v3380_v15  ;;  %v3696_v15 = vsel %vm1198_vm0, %v9072_v35, %v5844_v38 }
0x1381   : > { %5629 = vmatprep.mubr.msk.bf16.mxu0 %vm1288_vm1, %v3381_v10  ;;  %5634 = vmatpush3.bf16.msra.mxu0 %v6013_v36  ;;  %v8434_v56 = vpop.permute.xlu0 %5892  ;;  %v3705_v42 = vsel %vm3704_vm2, %v3696_v15, %v5854_v19  ;;  %v3706_v36 = vsel %vm3704_vm2, %v3697_v14, %v5855_v39 }
0x1382   : > { %5635 = vmatprep.subr.bf16.mxu0 %v6014_v7  ;;  %v5895_v24 = vunpack.i.h.bf16 %v8434_v56 }
0x1383   : > { %v5878_v40 = vpop.permute.xlu1 %5877 }
0x1384   : > { %v5879_v59 = vunpack.i.l.bf16 %v5878_v40 }
0x1385   : > { %5636 = vmatpush3.bf16.msra.mxu0 %v6014_v7  ;;  %v8438_v22 = vpop.permute.xlu0 %5902  ;;  %v3714_v7 = vsel %vm3713_vm3, %v3705_v42, %v5864_v13 }
0x1386   : > { %5637 = vmatprep.subr.bf16.mxu0 %v6015_v54  ;;  %v5905_v38 = vunpack.i.h.bf16 %v8438_v22  ;;  %v5904_v39 = vunpack.i.l.bf16 %v8438_v22  ;;  %v9076_v22 = vld [vmem:[#allocation41_spill] sm:$0xff] }
0x1387   : > { %v5888_v21 = vpop.permute.xlu1 %5887 }
0x1388   : > { %5630 = vmatmul.mubr.msk.bf16.gmra.mrb[68].mxu0 %vm1288_vm1, %v3382_v6  ;;  %v5884_v6 = vunpack.i.l.bf16 %v5883_v55 }
0x1389   : > { %5638 = vmatpush3.bf16.msra.mxu0 %v6015_v54  ;;  %v8444_v10 = vpop.permute.xlu0 %5912  ;;  %v5850_v54 = vunpack.i.h.bf16 %v5848_v30 }
0x138a   : > { %5639 = vmatprep.subr.bf16.mxu0 %v6016_v29  ;;  %v5915_v15 = vunpack.i.h.bf16 %v8444_v10 }
0x138b   : > { %v8432_v48 = vpop.permute.xlu1 %5897 }
0x138c   : > { %v5900_v18 = vunpack.i.h.bf16 %v8432_v48  ;;  %v5899_v16 = vunpack.i.l.bf16 %v8432_v48 }
0x138d   : > { %5640 = vmatpush3.bf16.msra.mxu0 %v6016_v29  ;;  %v5849_v29 = vunpack.i.l.bf16 %v5848_v30 }
0x138e   : > { %5641 = vmatprep.subr.bf16.mxu0 %v6017_v61 }
0x138f   : > { %v8436_v57 = vpop.permute.xlu1 %5907  ;;  %v3698_v50 = vsel %vm1198_vm0, %v9075_v5, %v5849_v29  ;;  %v9077_v29 = vld [vmem:[#allocation39_spill] sm:$0xff] }
0x1391   : > { %5642 = vmatpush3.bf16.msra.mxu0 %v6017_v61  ;;  %v3715_v61 = vsel %vm3713_vm3, %v3706_v36, %v5865_v25  ;;  %v5910_v36 = vunpack.i.h.bf16 %v8436_v57 }
0x1392   : > { %5643 = vmatprep.subr.bf16.mxu0 %v6018_v37 }
0x1393   : > { %v8440_v23 = vpop.permute.xlu1 %5917 }
0x1395   : > { %5644 = vmatpush3.bf16.msra.mxu0 %v6018_v37  ;;  %v3722_v37 = vsel %vm1288_vm1, %v3714_v7, %v5874_v41  ;;  %v5909_v7 = vunpack.i.l.bf16 %v8436_v57 }
0x1396   : > { %5645 = vmatprep.subr.bf16.mxu0 %v6019_v46 }
0x1397   : > { %v8456_v32 = vpop.permute.xlu1 %5927 }
0x1399   : > { %5646 = vmatpush3.bf16.msra.mxu0 %v6019_v46  ;;  %v5860_v46 = vunpack.i.h.bf16 %v5858_v31 }
0x139a   : > { %5647 = vmatprep.subr.bf16.mxu0 %v6020_v58 }
0x139d   : > { %5648 = vmatpush3.bf16.msra.mxu0 %v6020_v58  ;;  %v5859_v58 = vunpack.i.l.bf16 %v5858_v31 }
0x1453   : > { %v5627_v12 = vpop.f32.mrb[64].mxu0 }
0x1454   : > { %v3441_v11 = vpop.f32.mrb[65].mxu0 }
0x1455   : > { %v5628_v9 = vpop.f32.mrb[66].mxu0 }
0x1456   : > { %v5931_v28 = vpack.i.bf16 %v5628_v9, %v5627_v12  ;;  %v3444_v63 = vpop.f32.mrb[67].mxu0  ;;  %v3723_v12 = vsel %vm1288_vm1, %v3715_v61, %v5875_v60  ;;  %v5870_v9 = vunpack.i.h.bf16 %v5868_v33  ;;  %v5914_v60 = vunpack.i.l.bf16 %v8444_v10 }
0x1457   : > { %v5936_v53 = vpack.i.bf16 %v3444_v63, %v3441_v11  ;;  %v5885_v11 = vunpack.i.h.bf16 %v5883_v55  ;;  %v3731_v63 = vsel %vm3730_vm4, %v3722_v37, %v5884_v6  ;;  %v3700_v61 = vsel %vm1198_vm0, %v9077_v29, %v5904_v39 }
0x1458   : > { %5932 = vrot.lane.b32.xlu1 %v5931_v28, %s6741_s23  ;;  %v5869_v28 = vunpack.i.l.bf16 %v5868_v33 }
0x1459   : > { %5937 = vrot.lane.b32.xlu0 %v5936_v53, %s6741_s23  ;;  %v5894_v53 = vunpack.i.l.bf16 %v8434_v56 }
0x145b   : > { %v5631_v4 = vpop.f32.mrb[68].mxu0 }
0x145c   : > { %5947 = vrot.lane.b32.xlu1 %v9060_v2, %s6744_s2  ;;  %v3457_v0 = vpop.f32.mrb[69].mxu0  ;;  %v9074_v2 = vld [vmem:[#allocation36_spill] sm:$0xff] }
0x145d   : > { %5942 = vrot.lane.b32.xlu0 %v9063_v51, %s6744_s2  ;;  %v5632_v62 = vpop.f32.mrb[70].mxu0  ;;  %v5923_v51 = vpop.permute.xlu0 %5922 }
0x145e   : > { %v5976_v3 = vpack.i.bf16 %v5632_v62, %v5631_v4  ;;  %v3460_v17 = vpop.f32.mrb[71].mxu0  ;;  %v5880_v4 = vunpack.i.h.bf16 %v5878_v40  ;;  %v5890_v62 = vunpack.i.h.bf16 %v5888_v21  ;;  %v5925_v42 = vunpack.i.h.bf16 %v5923_v51 }
0x145f   : > { %v5971_v1 = vpack.i.bf16 %v3460_v17, %v3457_v0  ;;  %v3699_v0 = vsel %vm1198_vm0, %v9074_v2, %v5850_v54  ;;  %v3707_v17 = vsel %vm3704_vm2, %v3698_v50, %v5859_v58  ;;  %v5924_v6 = vunpack.i.l.bf16 %v5923_v51 }
0x1460   : > { %5957 = vrot.lane.b32.xlu1 %v9066_v27, %s6743_s15  ;;  %v3732_v27 = vsel %vm3730_vm4, %v3723_v12, %v5885_v11  ;;  %v3716_v45 = vsel %vm3713_vm3, %v3707_v17, %v5869_v28  ;;  %v3701_v54 = vsel %vm1198_vm0, %v9076_v22, %v5905_v38  ;;  %v5920_v58 = vunpack.i.h.bf16 %v8440_v23 }
0x1461   : > { %5952 = vrot.lane.b32.xlu0 %v9069_v43, %s6743_s15  ;;  %v3741_v56 = vsel %vm3739_vm5, %v3732_v27, %v5895_v24  ;;  %v3710_v10 = vsel %vm3704_vm2, %v3701_v54, %v5915_v15  ;;  %v5919_v12 = vunpack.i.l.bf16 %v8440_v23  ;;  %v5930_v28 = vunpack.i.h.bf16 %v8456_v32 }
0x1464   : > { %5967 = vrot.lane.b32.xlu1 %v9070_v52, %s6742_s20  ;;  %v3740_v52 = vsel %vm3739_vm5, %v3731_v63, %v5894_v53  ;;  %v5929_v63 = vunpack.i.l.bf16 %v8456_v32  ;;  %v9078_v53 = vld [vmem:[#allocation40_spill] sm:$0xff] }
0x1465   : > { %5962 = vrot.lane.b32.xlu0 %v9071_v47, %s6742_s20  ;;  %v3724_v47 = vsel %vm1288_vm1, %v3716_v45, %v5879_v59  ;;  %v9079_v59 = vld [vmem:[#allocation38_spill] sm:$0xff] }
0x1466   : > { %v3702_v2 = vsel %vm1198_vm0, %v9079_v59, %v5909_v7 }
0x1467   : > { %v3711_v17 = vsel %vm3704_vm2, %v3702_v2, %v5919_v12  ;;  %v6383_v12 = vld [vmem:[#allocation2 + $0x10] sm:$0xff] }
0x1468   : > { %5977 = vrot.lane.b32.xlu1 %v5976_v3, %s6741_s23  ;;  %v5889_v3 = vunpack.i.l.bf16 %v5888_v21  ;;  %v3720_v27 = vsel %vm3713_vm3, %v3711_v17, %v5929_v63  ;;  %v6387_v17 = vld [vmem:[#allocation2 + $0x30] sm:$0xff] }
0x1469   : > { %5972 = vrot.lane.b32.xlu0 %v5971_v1, %s6741_s23  ;;  %v3708_v1 = vsel %vm3704_vm2, %v3699_v0, %v5860_v46  ;;  %v3709_v46 = vsel %vm3704_vm2, %v3700_v61, %v5914_v60  ;;  %v6381_v61 = vld [vmem:[#allocation2] sm:$0xff] }
0x146a   : > { %v3717_v43 = vsel %vm3713_vm3, %v3708_v1, %v5870_v9  ;;  %v3733_v31 = vsel %vm3730_vm4, %v3724_v47, %v5889_v3  ;;  %v3718_v57 = vsel %vm3713_vm3, %v3709_v46, %v5924_v6  ;;  %v3719_v9 = vsel %vm3713_vm3, %v3710_v10, %v5925_v42  ;;  %v5106_v42 = vld [vmem:[%s792_s25] ss:$0 sm:$0xff]  ;;  %v6382_v10 = vld [vmem:[#allocation2 + $0x8] sm:$0xff] }
0x146b   : > { %v3725_v30 = vsel %vm1288_vm1, %v3717_v43, %v5880_v4  ;;  %v3742_v34 = vsel %vm3739_vm5, %v3733_v31, %v5899_v16  ;;  %v3703_v4 = vsel %vm1198_vm0, %v9078_v53, %v5910_v36 }
0x146c   : > { %v3734_v49 = vsel %vm3730_vm4, %v3725_v30, %v5890_v62  ;;  %v3712_v1 = vsel %vm3704_vm2, %v3703_v4, %v5920_v58 }
0x146d   : > { %v3743_v21 = vsel %vm3739_vm5, %v3734_v49, %v5900_v18  ;;  %v3721_v24 = vsel %vm3713_vm3, %v3712_v1, %v5930_v28 }
0x14ca   : > { %v5933_v26 = vpop.permute.xlu1 %5932 }
0x14cb   : > { %v5935_v33 = vunpack.i.h.bf16 %v5933_v26  ;;  %v5934_v8 = vunpack.i.l.bf16 %v5933_v26  ;;  %v5938_v40 = vpop.permute.xlu0 %5937 }
0x14cc   : > { %v5940_v55 = vunpack.i.h.bf16 %v5938_v40  ;;  %v5939_v48 = vunpack.i.l.bf16 %v5938_v40 }
0x14cd   : > { %v3751_v20 = vsel %vm3748_vm6, %v3742_v34, %v5934_v8  ;;  %v3752_v19 = vsel %vm3748_vm6, %v3743_v21, %v5935_v33 }
0x14ce   : > { %v3758_v13 = vpack.c.bf16 %v3752_v19, %v3751_v20  ;;  %v5948_v25 = vpop.permute.xlu1 %5947  ;;  %v3749_v41 = vsel %vm3748_vm6, %v3740_v52, %v5939_v48  ;;  %v3750_v35 = vsel %vm3748_vm6, %v3741_v56, %v5940_v55 }
0x14cf   : > { %v5943_v44 = vpop.permute.xlu0 %5942  ;;  %v3757_v14 = vpack.c.bf16 %v3750_v35, %v3749_v41  ;;  %v5950_v0 = vunpack.i.h.bf16 %v5948_v25  ;;  %v5949_v5 = vunpack.i.l.bf16 %v5948_v25 }
0x14d0   : > { %v5945_v50 = vunpack.i.h.bf16 %v5943_v44  ;;  %v5944_v51 = vunpack.i.l.bf16 %v5943_v44 }
0x14d1   : > { %5649 = vmatprep.mubr.bf16.mxu0 %v3757_v14  ;;  %v3728_v52 = vsel %vm1288_vm1, %v3720_v27, %v5949_v5  ;;  %v3729_v47 = vsel %vm1288_vm1, %v3721_v24, %v5950_v0  ;;  %v6385_v5 = vld [vmem:[#allocation2 + $0x20] sm:$0xff]  ;;  %v6026_v24 = vld [vmem:[%s7300_s12 + $0x14] ss:$8 sps:$4 sm:$0xff]  }
0x14d2   : > { %v5958_v37 = vpop.permute.xlu1 %5957  ;;  %5650 = vmatmul.mubr.bf16.vlgmr.msra.gmra.mrb[72].mxu0 %v3758_v13  ;;  %v3727_v31 = vsel %vm1288_vm1, %v3719_v9, %v5945_v50  ;;  %v3726_v49 = vsel %vm1288_vm1, %v3718_v57, %v5944_v51  ;;  %v6384_v9 = vld [vmem:[#allocation2 + $0x18] sm:$0xff]  ;;  %v6023_v27 = vld [vmem:[%s7300_s12 + $0x4] ss:$8 sps:$4 sm:$0xff]  }
0x14d3   : > { %v5953_v11 = vpop.permute.xlu0 %5952  ;;  %v5960_v23 = vunpack.i.h.bf16 %v5958_v37  ;;  %v5959_v62 = vunpack.i.l.bf16 %v5958_v37  ;;  %4131 = vmatprep.subr.bf16.mxu1 %v6023_v27 }
0x14d4   : > { %v5955_v18 = vunpack.i.h.bf16 %v5953_v11  ;;  %v5954_v16 = vunpack.i.l.bf16 %v5953_v11 }
0x14d5   : > { %v3737_v33 = vsel %vm3730_vm4, %v3728_v52, %v5959_v62  ;;  %v3738_v8 = vsel %vm3730_vm4, %v3729_v47, %v5960_v23  ;;  %v6386_v62 = vld [vmem:[#allocation2 + $0x28] sm:$0xff] }
0x14d6   : > { %v5968_v3 = vpop.permute.xlu1 %5967  ;;  %v3735_v34 = vsel %vm3730_vm4, %v3726_v49, %v5954_v16  ;;  %v3736_v21 = vsel %vm3730_vm4, %v3727_v31, %v5955_v18  ;;  %v6388_v18 = vld [vmem:[#allocation2 + $0x38] sm:$0xff] }
0x14d7   : > { %v5963_v32 = vpop.permute.xlu0 %5962  ;;  %v5970_v45 = vunpack.i.h.bf16 %v5968_v3  ;;  %v5969_v43 = vunpack.i.l.bf16 %v5968_v3 }
0x14d8   : > { %v5965_v30 = vunpack.i.h.bf16 %v5963_v32  ;;  %v5964_v26 = vunpack.i.l.bf16 %v5963_v32  ;;  %v6021_v32 = vld [vmem:[%s7300_s12] ss:$8 sps:$4 sm:$0xff]  }
0x14d9   : > { %v3746_v38 = vsel %vm3739_vm5, %v3737_v33, %v5969_v43  ;;  %v3747_v20 = vsel %vm3739_vm5, %v3738_v8, %v5970_v45  ;;  %4132 = vmatpush1.bf16.msra.mxu1 %v6021_v32  ;;  %v6024_v45 = vld [vmem:[%s7300_s12 + $0x10] ss:$8 sps:$4 sm:$0xff]  }
0x14da   : > { %v5978_v40 = vpop.permute.xlu1 %5977  ;;  %v3744_v13 = vsel %vm3739_vm5, %v3735_v34, %v5964_v26  ;;  %v3745_v25 = vsel %vm3739_vm5, %v3736_v21, %v5965_v30  ;;  %4133 = vmatprep.subr.bf16.mxu1 %v6026_v24 }
0x14db   : > { %v5980_v55 = vunpack.i.h.bf16 %v5978_v40  ;;  %v5979_v48 = vunpack.i.l.bf16 %v5978_v40  ;;  %v5973_v56 = vpop.permute.xlu0 %5972 }
0x14dc   : > { %v5975_v19 = vunpack.i.h.bf16 %v5973_v56  ;;  %v5974_v39 = vunpack.i.l.bf16 %v5973_v56 }
0x14dd   : > { %v3755_v41 = vsel %vm3748_vm6, %v3746_v38, %v5979_v48  ;;  %v3756_v35 = vsel %vm3748_vm6, %v3747_v20, %v5980_v55  ;;  %4134 = vmatpush1.bf16.msra.mxu1 %v6024_v45 }
0x14de   : > { %v3753_v15 = vsel %vm3748_vm6, %v3744_v13, %v5974_v39  ;;  %v3754_v60 = vsel %vm3748_vm6, %v3745_v25, %v5975_v19  ;;  %v3760_v44 = vpack.c.bf16 %v3756_v35, %v3755_v41 }
0x14df   : > { %v3759_v14 = vpack.c.bf16 %v3754_v60, %v3753_v15 }
0x14e1   : > { %5653 = vmatprep.mubr.bf16.mxu0 %v3759_v14 }
0x14e2   : > { %5654 = vmatmul.mubr.bf16.gmra.mrb[76].mxu0 %v3760_v44  ;;  %v6029_v44 = vld [vmem:[%s7300_s12 + $0x24] ss:$8 sps:$4 sm:$0xff]  }
0x14e3   : > { %4135 = vmatprep.subr.bf16.mxu1 %v6029_v44 }
0x15a5   : > { %v5651_v6 = vpop.f32.mrb[72].mxu0 }
0x15a6   : > { %v3866_v36 = vpop.f32.mrb[73].mxu0  ;;  %v3875_v29 = vadd.f32 %v5651_v6, %v5106_v42 }
0x15a7   : > { %v3867_v7 = vadd.f32 %v5106_v42, %v3866_v36  ;;  %v5652_v22 = vpop.f32.mrb[74].mxu0 }
0x15a8   : > { %v3869_v54 = vpop.f32.mrb[75].mxu0  ;;  %v3900_v11 = vadd.f32 %v6383_v12, %v3875_v29  ;;  %v3878_v57 = vadd.f32 %v5652_v22, %v5106_v42  ;;  %v6032_v29 = vld [vmem:[%s7300_s12 + $0x34] ss:$8 sps:$4 sm:$0xff]   ;;  %v6036_v12 = vld [vmem:[%s7300_s12 + $0x50] ss:$8 sps:$4 sm:$0xff]  }
0x15a9   : > { %v3898_v37 = vadd.f32 %v6381_v61, %v3867_v7  ;;  %v3870_v46 = vadd.f32 %v5106_v42, %v3869_v54  ;;  %v6030_v61 = vld [vmem:[%s7300_s12 + $0x30] ss:$8 sps:$4 sm:$0xff]  }
0x15aa   : > { %v3901_v28 = vadd.f32 %v6384_v9, %v3878_v57  ;;  %v6039_v57 = vld [vmem:[%s7300_s12 + $0x60] ss:$8 sps:$4 sm:$0xff]   ;;  %v6044_v9 = vld [vmem:[%s7300_s12 + $0x74] ss:$8 sps:$4 sm:$0xff]  }
0x15ab   : > { %v3899_v58 = vadd.f32 %v6382_v10, %v3870_v46  ;;  %3906 = vadd.xlane.f32.xlu0 %v3898_v37  ;;  %v6035_v46 = vld [vmem:[%s7300_s12 + $0x44] ss:$8 sps:$4 sm:$0xff]   ;;  %v6033_v10 = vld [vmem:[%s7300_s12 + $0x40] ss:$8 sps:$4 sm:$0xff]  }
0x15ad   : > { %3908 = vadd.xlane.f32.xlu1 %v3899_v58 }
0x15af   : > { %3910 = vadd.xlane.f32.xlu0 %v3900_v11 }
0x15b3   : > { %3912 = vadd.xlane.f32.xlu0 %v3901_v28 }
0x15b5   : > { %v5655_v63 = vpop.f32.mrb[76].mxu0 }
0x15b6   : > { %v3882_v53 = vpop.f32.mrb[77].mxu0  ;;  %v3891_v0 = vadd.f32 %v5655_v63, %v5106_v42 }
0x15b7   : > { %v3883_v4 = vadd.f32 %v5106_v42, %v3882_v53  ;;  %v5656_v59 = vpop.f32.mrb[78].mxu0 }
0x15b8   : > { %v3885_v2 = vpop.f32.mrb[79].mxu0  ;;  %v3894_v23 = vadd.f32 %v5656_v59, %v5106_v42  ;;  %v3904_v1 = vadd.f32 %v6387_v17, %v3891_v0 }
0x15b9   : > { %v3902_v50 = vadd.f32 %v6385_v5, %v3883_v4  ;;  %v3886_v51 = vadd.f32 %v5106_v42, %v3885_v2  ;;  %v6027_v42 = vld [vmem:[%s7300_s12 + $0x20] ss:$8 sps:$4 sm:$0xff]  }
0x15ba   : > { %v3905_v16 = vadd.f32 %v6388_v18, %v3894_v23  ;;  %4136 = vmatpush1.bf16.msra.mxu1 %v6027_v42 }
0x15bb   : > { %v3903_v3 = vadd.f32 %v6386_v62, %v3886_v51  ;;  %3914 = vadd.xlane.f32.xlu0 %v3902_v50  ;;  %4137 = vmatprep.subr.bf16.mxu1 %v6032_v29 }
0x15bd   : > { %3916 = vadd.xlane.f32.xlu1 %v3903_v3 }
0x15be   : > { %4138 = vmatpush1.bf16.msra.mxu1 %v6030_v61 }
0x15bf   : > { %3918 = vadd.xlane.f32.xlu0 %v3904_v1  ;;  %4139 = vmatprep.subr.bf16.mxu1 %v6035_v46 }
0x15c1   : > { %3920 = vadd.xlane.f32.xlu1 %v3905_v16 }
0x15c2   : > { %4140 = vmatpush1.bf16.msra.mxu1 %v6033_v10 }
0x1638   : > { %v3907_v43 = vpop.xlane.xlu0 %3906 }
0x1639   : > { %v3923_v52 = vmul.f32 0.0078125, %v3907_v43 }
0x163a   : > { %v3909_v47 = vpop.xlane.xlu1 %3908 }
0x163b   : > { %v8533_v30 = vsub.f32 %v3898_v37, %v3923_v52  ;;  %v3924_v26 = vmul.f32 0.0078125, %v3909_v47 }
0x163c   : > { %v3911_v31 = vpop.xlane.xlu0 %3910 }
0x163d   : > { %v8535_v49 = vsub.f32 %v3899_v58, %v3924_v26  ;;  %v3925_v33 = vmul.f32 0.0078125, %v3911_v31  ;;  %v3939_v8 = vmul.f32 %v8533_v30, %v8533_v30  ;;  %v6038_v58 = vld [vmem:[%s7300_s12 + $0x54] ss:$8 sps:$4 sm:$0xff]   ;;  %v9083_v26 = vld [vmem:[#allocation33_spill] sm:$0xff] }
0x163e   : > { %4141 = vmatprep.subr.bf16.mxu1 %v6038_v58 }
0x163f   : > { %v8539_v40 = vsub.f32 %v3900_v11, %v3925_v33  ;;  %3947 = vadd.xlane.f32.xlu0 %v3939_v8  ;;  %v3940_v34 = vmul.f32 %v8535_v49, %v8535_v49  ;;  %4142 = vmatpush1.bf16.msra.mxu1 %v6036_v12  ;;  %v6041_v11 = vld [vmem:[%s7300_s12 + $0x64] ss:$8 sps:$4 sm:$0xff]  }
0x1640   : > { %v3913_v21 = vpop.xlane.xlu0 %3912  ;;  %4143 = vmatprep.subr.bf16.mxu1 %v6041_v11 }
0x1641   : > { %v3926_v55 = vmul.f32 0.0078125, %v3913_v21  ;;  %3949 = vadd.xlane.f32.xlu1 %v3940_v34  ;;  %v3941_v48 = vmul.f32 %v8539_v40, %v8539_v40 }
0x1643   : > { %v8545_v56 = vsub.f32 %v3901_v28, %v3926_v55  ;;  %3951 = vadd.xlane.f32.xlu0 %v3941_v48  ;;  %4144 = vmatpush1.bf16.msra.mxu1 %v6039_v57  ;;  %v6042_v28 = vld [vmem:[%s7300_s12 + $0x70] ss:$8 sps:$4 sm:$0xff]  }
0x1644   : > { %4145 = vmatprep.subr.bf16.mxu1 %v6044_v9 }
0x1645   : > { %v3942_v38 = vmul.f32 %v8545_v56, %v8545_v56 }
0x1647   : > { %3953 = vadd.xlane.f32.xlu1 %v3942_v38  ;;  %4146 = vmatpush1.bf16.msra.mxu1 %v6042_v28 }
0x1648   : > { %v3915_v20 = vpop.xlane.xlu0 %3914 }
0x1649   : > { %v3927_v19 = vmul.f32 0.0078125, %v3915_v20 }
0x164a   : > { %v3917_v39 = vpop.xlane.xlu1 %3916 }
0x164b   : > { %v8549_v13 = vsub.f32 %v3902_v50, %v3927_v19  ;;  %v3928_v25 = vmul.f32 0.0078125, %v3917_v39 }
0x164c   : > { %v3919_v41 = vpop.xlane.xlu0 %3918 }
0x164d   : > { %v8551_v35 = vsub.f32 %v3903_v3, %v3928_v25  ;;  %v3929_v15 = vmul.f32 0.0078125, %v3919_v41  ;;  %v3943_v60 = vmul.f32 %v8549_v13, %v8549_v13  ;;  %v3897_v3 = vld [vmem:[%s803_s26] sm:$0x3] }
0x164e   : > { %v3921_v14 = vpop.xlane.xlu1 %3920  ;;  %v4010_v31 = vrot.slane %v3897_v3, %v9083_v26 }
0x164f   : > { %v8557_v6 = vsub.f32 %v3904_v1, %v3929_v15  ;;  %v3930_v36 = vmul.f32 0.0078125, %v3921_v14  ;;  %3955 = vadd.xlane.f32.xlu0 %v3943_v60  ;;  %v3944_v7 = vmul.f32 %v8551_v35, %v8551_v35  ;;  %v9082_v1 = vld [vmem:[#allocation32_spill] sm:$0xff] }
0x1650   : > { %v3998_v18 = vrot.slane %v3897_v3, %v9082_v1  ;;  %v6054_v3 = vld [vmem:[%s7302_s4 + $0x20] sm:$0xff]  }
0x1651   : > { %v8561_v22 = vsub.f32 %v3905_v16, %v3930_v36  ;;  %3957 = vadd.xlane.f32.xlu1 %v3944_v7  ;;  %v3945_v54 = vmul.f32 %v8557_v6, %v8557_v6  ;;  %v9084_v36 = vmov 0  }
0x1653   : > { %3959 = vadd.xlane.f32.xlu0 %v3945_v54  ;;  %v3946_v37 = vmul.f32 %v8561_v22, %v8561_v22 }
0x1655   : > { %3961 = vadd.xlane.f32.xlu1 %v3946_v37 }
0x16cc   : > { %v3948_v63 = vpop.xlane.xlu0 %3947 }
0x16cd   : > { %v3963_v53 = vmul.f32 0.0078125, %v3948_v63 }
0x16ce   : > { %v3950_v4 = vpop.xlane.xlu1 %3949 }
0x16cf   : > { %v3971_v59 = vadd.f32 1e-05, %v3963_v53  ;;  %v3964_v2 = vmul.f32 0.0078125, %v3950_v4 }
0x16d0   : > { %v3952_v0 = vpop.xlane.xlu0 %3951 }
0x16d1   : > { %6317 = vrsqrt.f32 %v3971_v59  ;;  %v3972_v5 = vadd.f32 1e-05, %v3964_v2  ;;  %v3965_v50 = vmul.f32 0.0078125, %v3952_v0  ;;  %v6046_v59 = vld [vmem:[%s7302_s4] sm:$0xff]   ;;  %v6047_v2 = vld [vmem:[%s7302_s4 + $0x48] sm:$0xff]  }
0x16d2   : > { %v6048_v0 = vld [vmem:[%s7302_s4 + $0x8] sm:$0xff]  }
0x16d3   : > { %6319 = vrsqrt.f32 %v3972_v5  ;;  %v3973_v51 = vadd.f32 1e-05, %v3965_v50  ;;  %v6049_v5 = vld [vmem:[%s7302_s4 + $0x50] sm:$0xff]  }
0x16d4   : > { %v3954_v23 = vpop.xlane.xlu1 %3953  ;;  %v6050_v50 = vld [vmem:[%s7302_s4 + $0x10] sm:$0xff]  }
0x16d5   : > { %6321 = vrsqrt.f32 %v3973_v51  ;;  %v3966_v62 = vmul.f32 0.0078125, %v3954_v23  ;;  %v6051_v51 = vld [vmem:[%s7302_s4 + $0x58] sm:$0xff]  }
0x16d6   : > { %v6052_v23 = vld [vmem:[%s7302_s4 + $0x18] sm:$0xff]  }
0x16d7   : > { %v3974_v17 = vadd.f32 1e-05, %v3966_v62  ;;  %v6053_v62 = vld [vmem:[%s7302_s4 + $0x60] sm:$0xff]  }
0x16d9   : > { %6323 = vrsqrt.f32 %v3974_v17  ;;  %v6055_v17 = vld [vmem:[%s7302_s4 + $0x68] sm:$0xff]  }
0x16db   : > { %v6318_v16 = vpop.eup %6317 }
0x16dc   : > { %v3987_v32 = vmul.f32 %v6318_v16, %v8533_v30  ;;  %v3956_v27 = vpop.xlane.xlu0 %3955  ;;  %v6057_v16 = vld [vmem:[%s7302_s4 + $0x70] sm:$0xff]  }
0x16dd   : > { %v6320_v24 = vpop.eup %6319  ;;  %v3967_v45 = vmul.f32 0.0078125, %v3956_v27  ;;  %v6059_v27 = vld [vmem:[%s7302_s4 + $0x78] sm:$0xff]  }
0x16de   : > { %v3999_v43 = vmul.f32 %v3998_v18, %v3987_v32  ;;  %v3988_v52 = vmul.f32 %v6320_v24, %v8535_v49  ;;  %v3958_v47 = vpop.xlane.xlu1 %3957  ;;  %v6058_v32 = vld [vmem:[%s7302_s4 + $0x30] sm:$0xff]   ;;  %v6060_v24 = vld [vmem:[%s7302_s4 + $0x38] sm:$0xff]  }
0x16df   : > { %v6322_v33 = vpop.eup %6321  ;;  %v3975_v8 = vadd.f32 1e-05, %v3967_v45  ;;  %v3968_v34 = vmul.f32 0.0078125, %v3958_v47  ;;  %v4039_v45 = vld [vmem:[%s796_s1] sm:$0x3] }
0x16e0   : > { %v4000_v21 = vmul.f32 %v3998_v18, %v3988_v52  ;;  %v3960_v55 = vpop.xlane.xlu0 %3959  ;;  %v8586_v19 = vadd.f32 %v4010_v31, %v3999_v43  ;;  %v3989_v39 = vmul.f32 %v6322_v33, %v8539_v40  ;;  %v8641_v43 = vrot.slane %v4039_v45, %v9082_v1 }
0x16e1   : > { %6325 = vrsqrt.f32 %v3975_v8  ;;  %v3976_v48 = vadd.f32 1e-05, %v3968_v34  ;;  %v3969_v38 = vmul.f32 0.0078125, %v3960_v55  ;;  %v8644_v52 = vrot.slane %v4039_v45, %v9083_v26 }
0x16e2   : > { %v3962_v20 = vpop.xlane.xlu1 %3961  ;;  %v8588_v30 = vadd.f32 %v4010_v31, %v4000_v21  ;;  %v4001_v14 = vmul.f32 %v3998_v18, %v3989_v39 }
0x16e3   : > { %v6324_v25 = vpop.eup %6323  ;;  %6327 = vrsqrt.f32 %v3976_v48  ;;  %v3977_v49 = vadd.f32 1e-05, %v3969_v38  ;;  %v3970_v41 = vmul.f32 0.0078125, %v3962_v20 }
0x16e4   : > { %v4019_v15 = vpack.c.bf16 %v8588_v30, %v8586_v19  ;;  %v3990_v60 = vmul.f32 %v6324_v25, %v8545_v56  ;;  %v8597_v40 = vadd.f32 %v4010_v31, %v4001_v14 }
0x16e5   : > { %6329 = vrsqrt.f32 %v3977_v49  ;;  %v3978_v44 = vadd.f32 1e-05, %v3970_v41 }
0x16e6   : > { %4164 = vmatmul.mubr.bf16.vlgmr.msra.gmra.mrb[80].mxu1 %v4019_v15  ;;  %v4002_v42 = vmul.f32 %v3998_v18, %v3990_v60 }
0x16e7   : > { %6331 = vrsqrt.f32 %v3978_v44  ;;  %4173 = vmatprep.mubr.bf16.mxu1 %v9084_v36 }
0x16e8   : > { %v8595_v7 = vadd.f32 %v4010_v31, %v4002_v42 }
0x16ea   : > { %v4020_v29 = vpack.c.bf16 %v8595_v7, %v8597_v40 }
0x16eb   : > { %v6326_v54 = vpop.eup %6325 }
0x16ec   : > { %v3991_v61 = vmul.f32 %v6326_v54, %v8549_v13 }
0x16ed   : > { %v6328_v37 = vpop.eup %6327 }
0x16ee   : > { %4174 = vmatmul.mubr.bf16.gmra.mrb[84].mxu1 %v4020_v29  ;;  %v3992_v56 = vmul.f32 %v6328_v37, %v8551_v35  ;;  %v4003_v46 = vmul.f32 %v3998_v18, %v3991_v61 }
0x16ef   : > { %v6330_v10 = vpop.eup %6329  ;;  %4183 = vmatprep.mubr.bf16.mxu1 %v9084_v36 }
0x16f0   : > { %v4004_v58 = vmul.f32 %v3998_v18, %v3992_v56  ;;  %v8604_v11 = vadd.f32 %v4010_v31, %v4003_v46  ;;  %v3993_v9 = vmul.f32 %v6330_v10, %v8557_v6 }
0x16f1   : > { %v6332_v12 = vpop.eup %6331 }
0x16f2   : > { %v8606_v57 = vadd.f32 %v4010_v31, %v4004_v58  ;;  %v3994_v13 = vmul.f32 %v6332_v12, %v8561_v22  ;;  %v4005_v63 = vmul.f32 %v3998_v18, %v3993_v9  ;;  %v6045_v22 = vld [vmem:[%s7302_s4 + $0x40] sm:$0xff]  }
0x16f3   : > { %5313 = vmatprep.subr.bf16.mxu0 %v6045_v22 }
0x16f4   : > { %v4021_v35 = vpack.c.bf16 %v8606_v57, %v8604_v11  ;;  %v4006_v28 = vmul.f32 %v3998_v18, %v3994_v13  ;;  %v8615_v4 = vadd.f32 %v4010_v31, %v4005_v63  ;;  %5314 = vmatpush3.bf16.msra.mxu0 %v6046_v59  ;;  %v6056_v18 = vld [vmem:[%s7302_s4 + $0x28] sm:$0xff]  }
0x16f5   : > { %5315 = vmatprep.subr.bf16.mxu0 %v6047_v2 }
0x16f6   : > { %4184 = vmatmul.mubr.bf16.gmra.mrb[88].mxu1 %v4021_v35  ;;  %v8613_v53 = vadd.f32 %v4010_v31, %v4006_v28 }
0x16f7   : > { %4193 = vmatprep.mubr.bf16.mxu1 %v9084_v36 }
0x16f8   : > { %v4022_v6 = vpack.c.bf16 %v8613_v53, %v8615_v4  ;;  %5316 = vmatpush3.bf16.msra.mxu0 %v6048_v0 }
0x16f9   : > { %5317 = vmatprep.subr.bf16.mxu0 %v6049_v5 }
0x16fc   : > { %5318 = vmatpush3.bf16.msra.mxu0 %v6050_v50 }
0x16fd   : > { %5319 = vmatprep.subr.bf16.mxu0 %v6051_v51 }
0x16fe   : > { %4194 = vmatmul.mubr.bf16.gmra.mrb[92].mxu1 %v4022_v6 }
0x1700   : > { %5320 = vmatpush3.bf16.msra.mxu0 %v6052_v23 }
0x1701   : > { %5321 = vmatprep.subr.bf16.mxu0 %v6053_v62 }
0x1704   : > { %5322 = vmatpush3.bf16.msra.mxu0 %v6054_v3 }
0x1705   : > { %5323 = vmatprep.subr.bf16.mxu0 %v6055_v17 }
0x1708   : > { %5324 = vmatpush3.bf16.msra.mxu0 %v6056_v18 }
0x1709   : > { %5325 = vmatprep.subr.bf16.mxu0 %v6057_v16 }
0x170c   : > { %5326 = vmatpush3.bf16.msra.mxu0 %v6058_v32 }
0x170d   : > { %5327 = vmatprep.subr.bf16.mxu0 %v6059_v27 }
0x1710   : > { %5328 = vmatpush3.bf16.msra.mxu0 %v6060_v24 }
0x17b9   : > { %v4165_v47 = vpop.f32.mrb[80].mxu1 }
0x17ba   : > { %v4166_v31 = vadd.f32 %v4165_v47, %v8641_v43  ;;  %v4167_v33 = vpop.f32.mrb[81].mxu1 }
0x17bb   : > { %v4168_v8 = vadd.f32 %v4167_v33, %v8644_v52  ;;  %v4169_v34 = vpop.f32.mrb[82].mxu1 }
0x17bc   : > { %v4220_v21 = vmul.f32 0.044715, %v4166_v31  ;;  %v8649_v55 = vadd.f32 %v4169_v34, %v8641_v43  ;;  %v4171_v48 = vpop.f32.mrb[83].mxu1  ;;  %v4204_v16 = vmul.f32 0.5, %v4166_v31 }
0x17bd   : > { %v4221_v38 = vmul.f32 0.044715, %v4168_v8  ;;  %v8652_v20 = vadd.f32 %v4171_v48, %v8644_v52 }
0x17be   : > { %v4236_v39 = vmul.f32 %v4220_v21, %v4166_v31  ;;  %v4222_v25 = vmul.f32 0.044715, %v8649_v55 }
0x17bf   : > { %v4237_v49 = vmul.f32 %v4221_v38, %v4168_v8  ;;  %v4223_v41 = vmul.f32 0.044715, %v8652_v20 }
0x17c0   : > { %v4252_v15 = vmul.f32 %v4236_v39, %v4166_v31  ;;  %v4238_v60 = vmul.f32 %v4222_v25, %v8649_v55  ;;  %v4205_v39 = vmul.f32 0.5, %v4168_v8 }
0x17c1   : > { %v4253_v44 = vmul.f32 %v4237_v49, %v4168_v8  ;;  %v4239_v14 = vmul.f32 %v4223_v41, %v8652_v20  ;;  %v4175_v42 = vpop.f32.mrb[84].mxu1 }
0x17c2   : > { %v4268_v36 = vadd.f32 %v4252_v15, %v4166_v31  ;;  %v4254_v54 = vmul.f32 %v4238_v60, %v8649_v55  ;;  %v8660_v29 = vadd.f32 %v4175_v42, %v8641_v43  ;;  %v4177_v61 = vpop.f32.mrb[85].mxu1 }
0x17c3   : > { %v4255_v37 = vmul.f32 %v4239_v14, %v8652_v20  ;;  %v4178_v56 = vadd.f32 %v4177_v61, %v8644_v52  ;;  %v4179_v46 = vpop.f32.mrb[86].mxu1  ;;  %v4269_v10 = vadd.f32 %v4253_v44, %v4168_v8 }
0x17c4   : > { %v4284_v58 = vmul.f32 0.7978846, %v4268_v36  ;;  %v4270_v12 = vadd.f32 %v4254_v54, %v8649_v55  ;;  %v4224_v9 = vmul.f32 0.044715, %v8660_v29  ;;  %v8667_v13 = vadd.f32 %v4179_v46, %v8641_v43  ;;  %v4181_v35 = vpop.f32.mrb[87].mxu1 }
0x17c5   : > { %v4225_v28 = vmul.f32 0.044715, %v4178_v56  ;;  %v8670_v63 = vadd.f32 %v4181_v35, %v8644_v52  ;;  %v4271_v6 = vadd.f32 %v4255_v37, %v8652_v20  ;;  %v4285_v22 = vmul.f32 0.7978846, %v4269_v10 }
0x17c6   : > { %6333 = vtanh.f32 %v4284_v58  ;;  %v4286_v59 = vmul.f32 0.7978846, %v4270_v12  ;;  %v4240_v2 = vmul.f32 %v4224_v9, %v8660_v29  ;;  %v4226_v0 = vmul.f32 0.044715, %v8667_v13 }
0x17c7   : > { %v4241_v5 = vmul.f32 %v4225_v28, %v4178_v56  ;;  %v4227_v50 = vmul.f32 0.044715, %v8670_v63  ;;  %v4287_v51 = vmul.f32 0.7978846, %v4271_v6  ;;  %6335 = vtanh.f32 %v4285_v22 }
0x17c8   : > { %6337 = vtanh.f32 %v4286_v59  ;;  %v4256_v23 = vmul.f32 %v4240_v2, %v8660_v29  ;;  %v4242_v62 = vmul.f32 %v4226_v0, %v8667_v13  ;;  %v4206_v46 = vmul.f32 0.5, %v8649_v55 }
0x17c9   : > { %v4257_v3 = vmul.f32 %v4241_v5, %v4178_v56  ;;  %v4243_v17 = vmul.f32 %v4227_v50, %v8670_v63  ;;  %v4185_v18 = vpop.f32.mrb[88].mxu1  ;;  %6339 = vtanh.f32 %v4287_v51  ;;  %v4207_v58 = vmul.f32 0.5, %v8652_v20 }
0x17ca   : > { %v4258_v32 = vmul.f32 %v4242_v62, %v8667_v13  ;;  %v8681_v27 = vadd.f32 %v4185_v18, %v8641_v43  ;;  %v4187_v24 = vpop.f32.mrb[89].mxu1  ;;  %v4272_v21 = vadd.f32 %v4256_v23, %v8660_v29  ;;  %v4209_v6 = vmul.f32 0.5, %v4178_v56 }
0x17cb   : > { %v4259_v45 = vmul.f32 %v4243_v17, %v8670_v63  ;;  %v8685_v47 = vadd.f32 %v4187_v24, %v8644_v52  ;;  %v4189_v33 = vpop.f32.mrb[90].mxu1  ;;  %v4273_v34 = vadd.f32 %v4257_v3, %v4178_v56 }
0x17cc   : > { %v4228_v48 = vmul.f32 0.044715, %v8681_v27  ;;  %v8690_v38 = vadd.f32 %v4189_v33, %v8641_v43  ;;  %v4191_v31 = vpop.f32.mrb[91].mxu1  ;;  %v4274_v25 = vadd.f32 %v4258_v32, %v8667_v13  ;;  %v4288_v42 = vmul.f32 0.7978846, %v4272_v21 }
0x17cd   : > { %v4229_v49 = vmul.f32 0.044715, %v8685_v47  ;;  %v8695_v41 = vadd.f32 %v4191_v31, %v8644_v52  ;;  %v4275_v15 = vadd.f32 %v4259_v45, %v8670_v63  ;;  %v4289_v60 = vmul.f32 0.7978846, %v4273_v34 }
0x17ce   : > { %v4244_v44 = vmul.f32 %v4228_v48, %v8681_v27  ;;  %v4230_v14 = vmul.f32 0.044715, %v8690_v38  ;;  %v4290_v36 = vmul.f32 0.7978846, %v4274_v25 }
0x17cf   : > { %v4245_v54 = vmul.f32 %v4229_v49, %v8685_v47  ;;  %v4231_v8 = vmul.f32 0.044715, %v8695_v41  ;;  %v4291_v61 = vmul.f32 0.7978846, %v4275_v15  ;;  %6341 = vtanh.f32 %v4289_v60 }
0x17d0   : > { %v6334_v37 = vpop.eup %6333  ;;  %v4246_v10 = vmul.f32 %v4230_v14, %v8690_v38  ;;  %6343 = vtanh.f32 %v4288_v42  ;;  %v4260_v20 = vmul.f32 %v4244_v44, %v8681_v27 }
0x17d1   : > { %v6336_v12 = vpop.eup %6335  ;;  %v4247_v9 = vmul.f32 %v4231_v8, %v8695_v41  ;;  %v4195_v35 = vpop.f32.mrb[92].mxu1  ;;  %v4316_v28 = vadd.f32 1.0, %v6334_v37  ;;  %6345 = vtanh.f32 %v4291_v61  ;;  %v4261_v59 = vmul.f32 %v4245_v54, %v8685_v47 }
0x17d2   : > { %v6338_v22 = vpop.eup %6337  ;;  %v8708_v2 = vadd.f32 %v4195_v35, %v8641_v43  ;;  %v4197_v0 = vpop.f32.mrb[93].mxu1  ;;  %v4317_v55 = vadd.f32 1.0, %v6336_v12  ;;  %6347 = vtanh.f32 %v4290_v36  ;;  %v4262_v62 = vmul.f32 %v4246_v10, %v8690_v38 }
0x17d3   : > { %v6340_v5 = vpop.eup %6339  ;;  %v4263_v50 = vmul.f32 %v4247_v9, %v8695_v41  ;;  %v8713_v51 = vadd.f32 %v4197_v0, %v8644_v52  ;;  %v4199_v23 = vpop.f32.mrb[94].mxu1  ;;  %v4318_v56 = vadd.f32 1.0, %v6338_v22  ;;  %v4332_v33 = vmul.f32 %v4316_v28, %v4204_v16 }
0x17d4   : > { %v4232_v3 = vmul.f32 0.044715, %v8708_v2  ;;  %v8718_v17 = vadd.f32 %v4199_v23, %v8641_v43  ;;  %v4201_v18 = vpop.f32.mrb[95].mxu1  ;;  %v4319_v32 = vadd.f32 1.0, %v6340_v5  ;;  %v4333_v48 = vmul.f32 %v4317_v55, %v4205_v39 }
0x17d5   : > { %v4233_v24 = vmul.f32 0.044715, %v8713_v51  ;;  %v8722_v45 = vadd.f32 %v4201_v18, %v8644_v52  ;;  %v4334_v34 = vmul.f32 %v4318_v56, %v4206_v46  ;;  %v4277_v25 = vadd.f32 %v4261_v59, %v8685_v47 }
0x17d6   : > { %v4234_v21 = vmul.f32 0.044715, %v8718_v17  ;;  %v4335_v31 = vmul.f32 %v4319_v32, %v4207_v58  ;;  %v4279_v60 = vadd.f32 %v4263_v50, %v8695_v41  ;;  %v4248_v44 = vmul.f32 %v4232_v3, %v8708_v2 }
0x17d7   : > { %v4249_v49 = vmul.f32 %v4233_v24, %v8713_v51  ;;  %v4235_v43 = vmul.f32 0.044715, %v8722_v45  ;;  %v4348_v15 = vpack.c.bf16 %v4334_v34, %v4332_v33  ;;  %v4211_v52 = vmul.f32 0.5, %v8670_v63 }
0x17d8   : > { %v4349_v14 = vpack.c.bf16 %v4335_v31, %v4333_v48  ;;  %v4293_v16 = vmul.f32 0.7978846, %v4277_v25  ;;  %v4250_v36 = vmul.f32 %v4234_v21, %v8718_v17  ;;  %v4208_v54 = vmul.f32 0.5, %v8660_v29 }
0x17d9   : > { %v6342_v42 = vpop.eup %6341  ;;  %v4251_v39 = vmul.f32 %v4235_v43, %v8722_v45  ;;  %v4295_v8 = vmul.f32 0.7978846, %v4279_v60  ;;  %v4265_v37 = vmul.f32 %v4249_v49, %v8713_v51  ;;  %v4276_v10 = vadd.f32 %v4260_v20, %v8681_v27 }
0x17da   : > { %v6344_v61 = vpop.eup %6343  ;;  %4523 = vmatprep.mubr.bf16.mxu0 %v4349_v14  ;;  %v4321_v46 = vadd.f32 1.0, %v6342_v42  ;;  %6349 = vtanh.f32 %v4293_v16  ;;  %v4278_v9 = vadd.f32 %v4262_v62, %v8690_v38  ;;  %v4264_v29 = vmul.f32 %v4248_v44, %v8708_v2 }
0x17db   : > { %v6346_v58 = vpop.eup %6345  ;;  %v4267_v63 = vmul.f32 %v4251_v39, %v8722_v45  ;;  %4524 = vmatmul.mubr.bf16.vlgmr.msra.gmra.mrb[80].mxu0 %v4348_v15  ;;  %v4320_v12 = vadd.f32 1.0, %v6344_v61  ;;  %6351 = vtanh.f32 %v4295_v8  ;;  %v4210_v22 = vmul.f32 0.5, %v8667_v13 }
0x17dc   : > { %v6348_v35 = vpop.eup %6347  ;;  %v4323_v28 = vadd.f32 1.0, %v6346_v58  ;;  %v4292_v59 = vmul.f32 0.7978846, %v4276_v10  ;;  %v4266_v0 = vmul.f32 %v4250_v36, %v8718_v17  ;;  %v4337_v55 = vmul.f32 %v4321_v46, %v4209_v6 }
0x17dd   : > { %v4322_v5 = vadd.f32 1.0, %v6348_v35  ;;  %v4294_v20 = vmul.f32 0.7978846, %v4278_v9  ;;  %v4281_v23 = vadd.f32 %v4265_v37, %v8713_v51  ;;  %v4283_v56 = vadd.f32 %v4267_v63, %v8722_v45 }
0x17de   : > { %v4339_v50 = vmul.f32 %v4323_v28, %v4211_v52  ;;  %6353 = vtanh.f32 %v4292_v59  ;;  %v4336_v3 = vmul.f32 %v4320_v12, %v4208_v54  ;;  %v4280_v13 = vadd.f32 %v4264_v29, %v8708_v2 }
0x17df   : > { %v4338_v62 = vmul.f32 %v4322_v5, %v4210_v22  ;;  %6355 = vtanh.f32 %v4294_v20  ;;  %v4297_v32 = vmul.f32 0.7978846, %v4281_v23  ;;  %v4299_v24 = vmul.f32 0.7978846, %v4283_v56 }
0x17e0   : > { %v4351_v18 = vpack.c.bf16 %v4339_v50, %v4337_v55  ;;  %v4282_v34 = vadd.f32 %v4266_v0, %v8718_v17  ;;  %v4296_v6 = vmul.f32 0.7978846, %v4280_v13  ;;  %v4213_v49 = vmul.f32 0.5, %v8685_v47 }
0x17e1   : > { %v4350_v33 = vpack.c.bf16 %v4338_v62, %v4336_v3  ;;  %6357 = vtanh.f32 %v4297_v32  ;;  %v4215_v43 = vmul.f32 0.5, %v8695_v41  ;;  %v4212_v36 = vmul.f32 0.5, %v8681_v27 }
0x17e2   : > { %4531 = vmatprep.mubr.bf16.mxu0 %v4351_v18  ;;  %6359 = vtanh.f32 %v4299_v24  ;;  %v4298_v21 = vmul.f32 0.7978846, %v4282_v34  ;;  %v4214_v39 = vmul.f32 0.5, %v8690_v38  ;;  %v4217_v58 = vmul.f32 0.5, %v8713_v51 }
0x17e3   : > { %4532 = vmatmul.mubr.bf16.gmra.mrb[84].mxu0 %v4350_v33  ;;  %6361 = vtanh.f32 %v4296_v6  ;;  %v4219_v63 = vmul.f32 0.5, %v8722_v45  ;;  %v4216_v27 = vmul.f32 0.5, %v8708_v2  ;;  %v4218_v28 = vmul.f32 0.5, %v8718_v17  ;;  %v5131_v45 = vld [vmem:[%s799_s3] ss:$0 sm:$0xff] }
0x17e4   : > { %v6350_v48 = vpop.eup %6349  ;;  %6363 = vtanh.f32 %v4298_v21 }
0x17e5   : > { %v6352_v31 = vpop.eup %6351  ;;  %v4325_v25 = vadd.f32 1.0, %v6350_v48 }
0x17e6   : > { %v4327_v15 = vadd.f32 1.0, %v6352_v31 }
0x17e7   : > { %v4341_v44 = vmul.f32 %v4325_v25, %v4213_v49 }
0x17e8   : > { %v6354_v60 = vpop.eup %6353  ;;  %v4343_v14 = vmul.f32 %v4327_v15, %v4215_v43 }
0x17e9   : > { %v6356_v52 = vpop.eup %6355  ;;  %v4324_v16 = vadd.f32 1.0, %v6354_v60 }
0x17ea   : > { %v4353_v42 = vpack.c.bf16 %v4343_v14, %v4341_v44  ;;  %v4326_v54 = vadd.f32 1.0, %v6356_v52 }
0x17eb   : > { %v6358_v8 = vpop.eup %6357  ;;  %v4340_v61 = vmul.f32 %v4324_v16, %v4212_v36 }
0x17ec   : > { %4539 = vmatprep.mubr.bf16.mxu0 %v4353_v42  ;;  %v4342_v37 = vmul.f32 %v4326_v54, %v4214_v39  ;;  %v6360_v46 = vpop.eup %6359  ;;  %v4329_v47 = vadd.f32 1.0, %v6358_v8 }
0x17ed   : > { %v6362_v10 = vpop.eup %6361  ;;  %v4331_v12 = vadd.f32 1.0, %v6360_v46 }
0x17ee   : > { %v4352_v41 = vpack.c.bf16 %v4342_v37, %v4340_v61  ;;  %v6364_v9 = vpop.eup %6363  ;;  %v4328_v35 = vadd.f32 1.0, %v6362_v10  ;;  %v4345_v38 = vmul.f32 %v4329_v47, %v4217_v58 }
0x17ef   : > { %v4347_v29 = vmul.f32 %v4331_v12, %v4219_v63  ;;  %v4330_v22 = vadd.f32 1.0, %v6364_v9 }
0x17f0   : > { %4540 = vmatmul.mubr.bf16.gmra.mrb[88].mxu0 %v4352_v41  ;;  %v4344_v0 = vmul.f32 %v4328_v35, %v4216_v27 }
0x17f1   : > { %v4355_v59 = vpack.c.bf16 %v4347_v29, %v4345_v38  ;;  %v4346_v55 = vmul.f32 %v4330_v22, %v4218_v28 }
0x17f3   : > { %4547 = vmatprep.mubr.bf16.mxu0 %v4355_v59  ;;  %v4354_v5 = vpack.c.bf16 %v4346_v55, %v4344_v0 }
0x17f8   : > { %4548 = vmatmul.mubr.bf16.gmra.mrb[92].mxu0 %v4354_v5 }
0x18ae   : > { %v5329_v51 = vpop.f32.mrb[80].mxu0 }
0x18af   : > { %v5330_v2 = vpop.f32.mrb[81].mxu0 }
0x18b0   : > { %v5331_v20 = vadd.f32 %v5330_v2, %v5329_v51  ;;  %v5332_v50 = vpop.f32.mrb[82].mxu0 }
0x18b1   : > { %v5333_v23 = vpop.f32.mrb[83].mxu0 }
0x18b2   : > { %v4526_v56 = vadd.f32 %v5331_v20, %v5131_v45  ;;  %v5334_v3 = vadd.f32 %v5333_v23, %v5332_v50 }
0x18b4   : > { %v4529_v17 = vadd.f32 %v5334_v3, %v5131_v45  ;;  %v4557_v62 = vadd.f32 %v4526_v56, %v8586_v19 }
0x18b6   : > { %4565 = vadd.xlane.f32.xlu0 %v4557_v62  ;;  %v5335_v18 = vpop.f32.mrb[84].mxu0  ;;  %v4558_v32 = vadd.f32 %v4529_v17, %v8588_v30 }
0x18b7   : > { %v5336_v24 = vpop.f32.mrb[85].mxu0 }
0x18b8   : > { %v5337_v13 = vadd.f32 %v5336_v24, %v5335_v18  ;;  %4567 = vadd.xlane.f32.xlu1 %v4558_v32  ;;  %v5338_v33 = vpop.f32.mrb[86].mxu0 }
0x18b9   : > { %v5339_v34 = vpop.f32.mrb[87].mxu0 }
0x18ba   : > { %v4534_v6 = vadd.f32 %v5337_v13, %v5131_v45  ;;  %v5340_v21 = vadd.f32 %v5339_v34, %v5338_v33 }
0x18bc   : > { %v4537_v48 = vadd.f32 %v5340_v21, %v5131_v45  ;;  %v4559_v31 = vadd.f32 %v4534_v6, %v8597_v40 }
0x18be   : > { %4569 = vadd.xlane.f32.xlu0 %v4559_v31  ;;  %v4560_v25 = vadd.f32 %v4537_v48, %v8595_v7 }
0x18c0   : > { %4571 = vadd.xlane.f32.xlu1 %v4560_v25 }
0x18c3   : > { %v5341_v49 = vpop.f32.mrb[88].mxu0 }
0x18c4   : > { %v5342_v19 = vpop.f32.mrb[89].mxu0 }
0x18c5   : > { %v5343_v43 = vadd.f32 %v5342_v19, %v5341_v49  ;;  %v5344_v15 = vpop.f32.mrb[90].mxu0 }
0x18c6   : > { %v5345_v60 = vpop.f32.mrb[91].mxu0 }
0x18c7   : > { %v4542_v30 = vadd.f32 %v5343_v43, %v5131_v45  ;;  %v5346_v44 = vadd.f32 %v5345_v60, %v5344_v15 }
0x18c9   : > { %v4545_v14 = vadd.f32 %v5346_v44, %v5131_v45  ;;  %v4561_v52 = vadd.f32 %v4542_v30, %v8604_v11 }
0x18cb   : > { %4573 = vadd.xlane.f32.xlu0 %v4561_v52  ;;  %v5347_v16 = vpop.f32.mrb[92].mxu0  ;;  %v4562_v42 = vadd.f32 %v4545_v14, %v8606_v57 }
0x18cc   : > { %v5348_v36 = vpop.f32.mrb[93].mxu0 }
0x18cd   : > { %v5349_v40 = vadd.f32 %v5348_v36, %v5347_v16  ;;  %4575 = vadd.xlane.f32.xlu1 %v4562_v42  ;;  %v5350_v39 = vpop.f32.mrb[94].mxu0 }
0x18ce   : > { %v5351_v7 = vpop.f32.mrb[95].mxu0 }
0x18cf   : > { %v4550_v54 = vadd.f32 %v5349_v40, %v5131_v45  ;;  %v5352_v8 = vadd.f32 %v5351_v7, %v5350_v39 }
0x18d1   : > { %v4553_v61 = vadd.f32 %v5352_v8, %v5131_v45  ;;  %v4563_v37 = vadd.f32 %v4550_v54, %v8615_v4 }
0x18d3   : > { %4577 = vadd.xlane.f32.xlu0 %v4563_v37  ;;  %v4564_v46 = vadd.f32 %v4553_v61, %v8613_v53 }
0x18d5   : > { %4579 = vadd.xlane.f32.xlu1 %v4564_v46 }
0x1943   : > { %v4566_v47 = vpop.xlane.xlu0 %4565 }
0x1944   : > { %v4581_v11 = vmul.f32 0.0078125, %v4566_v47 }
0x1945   : > { %v4568_v10 = vpop.xlane.xlu1 %4567 }
0x1946   : > { %v4589_v41 = vsub.f32 %v4557_v62, %v4581_v11  ;;  %v4582_v58 = vmul.f32 0.0078125, %v4568_v10 }
0x1948   : > { %v4590_v57 = vsub.f32 %v4558_v32, %v4582_v58  ;;  %v4597_v63 = vmul.f32 %v4589_v41, %v4589_v41 }
0x194a   : > { %4605 = vadd.xlane.f32.xlu0 %v4597_v63  ;;  %v4598_v12 = vmul.f32 %v4590_v57, %v4590_v57 }
0x194b   : > { %v4570_v9 = vpop.xlane.xlu0 %4569 }
0x194c   : > { %v4583_v27 = vmul.f32 0.0078125, %v4570_v9  ;;  %4607 = vadd.xlane.f32.xlu1 %v4598_v12 }
0x194d   : > { %v4572_v35 = vpop.xlane.xlu1 %4571 }
0x194e   : > { %v4591_v38 = vsub.f32 %v4559_v31, %v4583_v27  ;;  %v4584_v29 = vmul.f32 0.0078125, %v4572_v35 }
0x1950   : > { %v8766_v4 = vsub.f32 %v4560_v25, %v4584_v29  ;;  %v4599_v28 = vmul.f32 %v4591_v38, %v4591_v38  ;;  %v4556_v25 = vld [vmem:[%s807_s27] sm:$0x3] }
0x1951   : > { %v4656_v15 = vrot.slane %v4556_v25, %v9082_v1  ;;  %v4668_v30 = vrot.slane %v4556_v25, %v9083_v26 }
0x1952   : > { %4609 = vadd.xlane.f32.xlu0 %v4599_v28  ;;  %v4600_v53 = vmul.f32 %v8766_v4, %v8766_v4 }
0x1954   : > { %4611 = vadd.xlane.f32.xlu1 %v4600_v53 }
0x1958   : > { %v4574_v22 = vpop.xlane.xlu0 %4573 }
0x1959   : > { %v4585_v59 = vmul.f32 0.0078125, %v4574_v22 }
0x195a   : > { %v4576_v0 = vpop.xlane.xlu1 %4575 }
0x195b   : > { %v8770_v55 = vsub.f32 %v4561_v52, %v4585_v59  ;;  %v4586_v5 = vmul.f32 0.0078125, %v4576_v0 }
0x195d   : > { %v8772_v51 = vsub.f32 %v4562_v42, %v4586_v5  ;;  %v4601_v45 = vmul.f32 %v8770_v55, %v8770_v55 }
0x195f   : > { %4613 = vadd.xlane.f32.xlu0 %v4601_v45  ;;  %v4602_v2 = vmul.f32 %v8772_v51, %v8772_v51 }
0x1960   : > { %v4578_v20 = vpop.xlane.xlu0 %4577 }
0x1961   : > { %v4587_v50 = vmul.f32 0.0078125, %v4578_v20  ;;  %4615 = vadd.xlane.f32.xlu1 %v4602_v2 }
0x1962   : > { %v4580_v23 = vpop.xlane.xlu1 %4579 }
0x1963   : > { %v8778_v56 = vsub.f32 %v4563_v37, %v4587_v50  ;;  %v4588_v3 = vmul.f32 0.0078125, %v4580_v23 }
0x1965   : > { %v8780_v17 = vsub.f32 %v4564_v46, %v4588_v3  ;;  %v4603_v62 = vmul.f32 %v8778_v56, %v8778_v56 }
0x1967   : > { %4617 = vadd.xlane.f32.xlu0 %v4603_v62  ;;  %v4604_v18 = vmul.f32 %v8780_v17, %v8780_v17 }
0x1969   : > { %4619 = vadd.xlane.f32.xlu1 %v4604_v18 }
0x19d7   : > { %v4606_v32 = vpop.xlane.xlu0 %4605 }
0x19d8   : > { %v4621_v24 = vmul.f32 0.0078125, %v4606_v32 }
0x19d9   : > { %v4608_v13 = vpop.xlane.xlu1 %4607 }
0x19da   : > { %v4629_v33 = vadd.f32 1e-05, %v4621_v24  ;;  %v4622_v34 = vmul.f32 0.0078125, %v4608_v13 }
0x19dc   : > { %6365 = vrsqrt.f32 %v4629_v33  ;;  %v4630_v6 = vadd.f32 1e-05, %v4622_v34 }
0x19de   : > { %6367 = vrsqrt.f32 %v4630_v6 }
0x19df   : > { %v4610_v21 = vpop.xlane.xlu0 %4609 }
0x19e0   : > { %v4623_v48 = vmul.f32 0.0078125, %v4610_v21 }
0x19e1   : > { %v4612_v31 = vpop.xlane.xlu1 %4611 }
0x19e2   : > { %v4631_v49 = vadd.f32 1e-05, %v4623_v48  ;;  %v4624_v19 = vmul.f32 0.0078125, %v4612_v31 }
0x19e4   : > { %6369 = vrsqrt.f32 %v4631_v49  ;;  %v4632_v43 = vadd.f32 1e-05, %v4624_v19 }
0x19e6   : > { %v6366_v60 = vpop.eup %6365  ;;  %6371 = vrsqrt.f32 %v4632_v43 }
0x19e7   : > { %v4645_v44 = vmul.f32 %v6366_v60, %v4589_v41 }
0x19e8   : > { %v6368_v14 = vpop.eup %6367 }
0x19e9   : > { %v4657_v52 = vmul.f32 %v4656_v15, %v4645_v44  ;;  %v4646_v16 = vmul.f32 %v6368_v14, %v4590_v57 }
0x19eb   : > { %v4669_v42 = vadd.f32 %v4668_v30, %v4657_v52  ;;  %v4658_v36 = vmul.f32 %v4656_v15, %v4646_v16 }
0x19ec   : > { %v4614_v40 = vpop.xlane.xlu0 %4613 }
0x19ed   : > { %4677 = vst [vmem:[#allocation2] sm:$0xff] %v4669_v42  ;;  %v4670_v39 = vadd.f32 %v4668_v30, %v4658_v36  ;;  %v4625_v7 = vmul.f32 0.0078125, %v4614_v40  ;;  %4689 = vst [vmem:[%s7304_s5] sm:$0xff] (!%p5148_p5), %v4669_v42 }
0x19ee   : > { %v6370_v54 = vpop.eup %6369  ;;  %v4616_v8 = vpop.xlane.xlu1 %4615 }
0x19ef   : > { %4678 = vst [vmem:[#allocation2 + $0x8] sm:$0xff] %v4670_v39  ;;  %v4647_v61 = vmul.f32 %v6370_v54, %v4591_v38  ;;  %v4633_v37 = vadd.f32 1e-05, %v4625_v7  ;;  %v4626_v1 = vmul.f32 0.0078125, %v4616_v8  ;;  %4690 = vst [vmem:[%s7304_s5 + $0x8] sm:$0xff] (!%p5148_p5), %v4670_v39 }
0x19f0   : > { %v6372_v46 = vpop.eup %6371 }
0x19f1   : > { %v4659_v47 = vmul.f32 %v4656_v15, %v4647_v61  ;;  %v4648_v26 = vmul.f32 %v6372_v46, %v8766_v4  ;;  %6373 = vrsqrt.f32 %v4633_v37  ;;  %v4634_v11 = vadd.f32 1e-05, %v4626_v1 }
0x19f3   : > { %v4671_v10 = vadd.f32 %v4668_v30, %v4659_v47  ;;  %v4660_v41 = vmul.f32 %v4656_v15, %v4648_v26  ;;  %6375 = vrsqrt.f32 %v4634_v11 }
0x19f4   : > { %v4618_v58 = vpop.xlane.xlu0 %4617 }
0x19f5   : > { %4679 = vst [vmem:[#allocation2 + $0x10] sm:$0xff] %v4671_v10  ;;  %v4672_v57 = vadd.f32 %v4668_v30, %v4660_v41  ;;  %v4627_v63 = vmul.f32 0.0078125, %v4618_v58  ;;  %4691 = vst [vmem:[%s7304_s5 + $0x10] sm:$0xff] (!%p5148_p5), %v4671_v10 }
0x19f6   : > { %v4620_v12 = vpop.xlane.xlu1 %4619 }
0x19f7   : > { %4680 = vst [vmem:[#allocation2 + $0x18] sm:$0xff] %v4672_v57  ;;  %v4635_v9 = vadd.f32 1e-05, %v4627_v63  ;;  %v4628_v27 = vmul.f32 0.0078125, %v4620_v12  ;;  %4692 = vst [vmem:[%s7304_s5 + $0x18] sm:$0xff] (!%p5148_p5), %v4672_v57 }
0x19f9   : > { %6377 = vrsqrt.f32 %v4635_v9  ;;  %v4636_v35 = vadd.f32 1e-05, %v4628_v27 }
0x19fb   : > { %v6374_v38 = vpop.eup %6373  ;;  %6379 = vrsqrt.f32 %v4636_v35 }
0x19fc   : > { %v4649_v29 = vmul.f32 %v6374_v38, %v8770_v55 }
0x19fd   : > { %v6376_v4 = vpop.eup %6375 }
0x19fe   : > { %v4661_v28 = vmul.f32 %v4656_v15, %v4649_v29  ;;  %v4650_v53 = vmul.f32 %v6376_v4, %v8772_v51 }
0x1a00   : > { %v4673_v22 = vadd.f32 %v4668_v30, %v4661_v28  ;;  %v4662_v59 = vmul.f32 %v4656_v15, %v4650_v53 }
0x1a02   : > { %4681 = vst [vmem:[#allocation2 + $0x20] sm:$0xff] %v4673_v22  ;;  %v4674_v0 = vadd.f32 %v4668_v30, %v4662_v59  ;;  %4693 = vst [vmem:[%s7304_s5 + $0x20] sm:$0xff] (!%p5148_p5), %v4673_v22 }
0x1a03   : > { %v6378_v5 = vpop.eup %6377 }
0x1a04   : > { %4682 = vst [vmem:[#allocation2 + $0x28] sm:$0xff] %v4674_v0  ;;  %v4651_v45 = vmul.f32 %v6378_v5, %v8778_v56  ;;  %4694 = vst [vmem:[%s7304_s5 + $0x28] sm:$0xff] (!%p5148_p5), %v4674_v0 }
0x1a05   : > { %v6380_v2 = vpop.eup %6379 }
0x1a06   : > { %v4663_v20 = vmul.f32 %v4656_v15, %v4651_v45  ;;  %v4652_v50 = vmul.f32 %v6380_v2, %v8780_v17  ;;  %4688 = sbr.rel (%p5148_p5) target bundleno = 6669 (0x1a0d), region = 112 }
0x1a08   : > { %v4675_v23 = vadd.f32 %v4668_v30, %v4663_v20  ;;  %v4664_v3 = vmul.f32 %v4656_v15, %v4652_v50 }
0x1a0a   : > { %4683 = vst [vmem:[#allocation2 + $0x30] sm:$0xff] %v4675_v23  ;;  %v4676_v55 = vadd.f32 %v4668_v30, %v4664_v3  ;;  %4695 = vst [vmem:[%s7304_s5 + $0x30] sm:$0xff] (!%p5148_p5), %v4675_v23 }
0x1a0c   : > { %4684 = vst [vmem:[#allocation2 + $0x38] sm:$0xff] %v4676_v55  ;;  %4696 = vst [vmem:[%s7304_s5 + $0x38] sm:$0xff] (!%p5148_p5), %v4676_v55 }
0x1a0d PF: > { %s9088_s24 = sld [smem:[#allocation22_spill]]  ;;  %s9089_s19 = sld [smem:[#allocation30_spill]] }
0x1a0e   : > { %s9090_s29 = sld [smem:[#allocation68_spill]]  ;;  %s4711_s21 = sshll.u32 %s7304_s5, 4  ;;  %s8814_s21 = int_to_ptr.vmem [resolvable:$true] %s4711_s21 }
0x1a0f   : > { %s9092_s20 = sand.u32 1, %s6703_s17   ;;  %s6597_s9 = scalar_lea.vmem %s8814_s21, 1024 }
0x1a10   : > { %s8818_s15 = scalar_lea.sflag [#allocation5], %s9092_s20  ;;  %p6598_p3 = scmp.ne.s32.totalorder %s8814_s21, %s6597_s9 }
0x1a11   : > { %s6748_s13 = smov [#allocation13]  }
0x1a12   : > { %s6601_s8 = sshll.u32 %s6748_s13, 4  ;;  %s6602_s8 = int_to_ptr.vmem [resolvable:$false] %s6601_s8 }
0x1a13   : > { %s5160_s27 = sshll.u32 %s9088_s24, 10  ;;  %p9093_p1 = scmp.ne.s32.totalorder %s9089_s19, 0 }
0x1a14   : > { %s9091_s2 = smov %s9090_s29  ;;  %s8811_s18 = scalar_lea.hbm %s9090_s29, %s5160_s27 }
0x1a15   : > { %p6599_p0 = pnand %p6598_p3, %p9093_p1  ;;  %s6603_s0 = scalar_lea.vmem %s6602_s8, 2048 }
0x1a16   : > { %p6604_p7 = scmp.lt.s32.totalorder %s8814_s21, %s6602_s8  ;;  %p6605_p13 = scmp.lt.s32.totalorder %s6603_s0, %s6597_s9 }
0x1a17   : > { %p6600_p11 = pneg %p6599_p0 }
0x1a18   : > { %p6606_p10 = por %p6605_p13, %p6604_p7 }
0x1a1a   : > { %p6607_p12 = pnand %p6606_p10, %p6600_p11 }
0x1a1c   : > { %6610 = shalt.err (!%p6607_p12)
}
0x1a1d   : > { %s6611_s5 = scalar_lea.hbm %s8811_s18, 1024  ;;  %s6615_s25 = scalar_lea.hbm %s9091_s2, 2048 }
0x1a1e   : > { %p6612_p9 = scmp.ne.s32.totalorder %s8811_s18, %s6611_s5  ;;  %p6616_p6 = scmp.lt.u32.totalorder %s8811_s18, %s9091_s2 }
0x1a1f   : > { %p6617_p4 = scmp.lt.u32.totalorder %s6615_s25, %s6611_s5  ;;  %p6619_p3 = scmp.lt.u32.totalorder %s6611_s5, %s8811_s18 }
0x1a20   : > { %p6613_p2 = pnand %p6612_p9, %p9093_p1 }
0x1a21   : > { %p6618_p5 = por %p6617_p4, %p6616_p6 }
0x1a22   : > { %p6614_p8 = pneg %p6613_p2 }
0x1a23   : > { %p6620_p0 = por %p6619_p3, %p6618_p5 }
0x1a25   : > { %p6621_p11 = pnand %p6620_p0, %p6614_p8 }
0x1a27   : > { %6624 = shalt.err (!%p6621_p11)
}
0x1a28   : > { %s6749_s26 = smov 128   ;;  %s6750_s12 = smov 8  }
0x1a29   : > { %5705 = dma.vmem_to_hbm [thread:$0]  (%p9093_p1), %s8814_s21, 1024, %s8811_s18, %s8818_s15, %s6749_s26, %s6749_s26, %s6750_s12  }
0x1a2a PF: > { %s9094_s10 = sld [smem:[#allocation25_spill]]  ;;  %s9095_s1 = sld [smem:[#allocation20_spill]] }
0x1a2b   : > { %s9096_s4 = sld [smem:[#allocation31_spill]] }
0x1a30   : > { %p5737_p7 = scmp.ge.s32.totalorder %s9094_s10, 2  ;;  %s4726_s30 = sand.u32 1, %s9095_s1  }
0x1a31   : > { %p9097_p13 = scmp.ne.s32.totalorder %s9096_s4, 0  ;;  %s4727_s7 = scalar_lea.sflag [#allocation5], %s4726_s30 }
0x1a33   : > { %p5731_p10 = pnand %p5737_p7, %p9097_p13 }
0x1a35   : > { %6682 = dma.done.wait (!%p5731_p10), %s4727_s7, 1024  }
0x1a36   : > { %6684 = vsyncadd (!%p5731_p10), %s4727_s7, 4294966272  ;;  %s31_s23 = sadd.s32 1, %s9094_s10   ;;  %s9098_s29 = sld [smem:[#allocation18_spill]] }
0x1a37   : > { %p28_p12 = scmp.ge.s32.totalorder %s31_s23, 6   ;;  %s9099_s30 = sld [smem:[#allocation19_spill]] }
0x1a38   : > { %s9100_s15 = sld [smem:[#allocation29_spill]]  ;;  %s9101_s3 = sld [smem:[#allocation21_spill]] }
0x1a39   : > { %s9102_s18 = sld [smem:[#allocation28_spill]]  ;;  %s9103_s19 = sld [smem:[#allocation23_spill]] }
0x1a3a   : > { %s9104_s20 = sld [smem:[#allocation24_spill]]  ;;  %s9105_s21 = sld [smem:[#allocation26_spill]] }
0x1a3b   : > { %s9106_s22 = sld [smem:[#allocation27_spill]]  ;;  %s9107_s16 = smov %s6703_s17 }
0x1a3c   :  { %30 = sbr.rel (!%p28_p12) target bundleno = 26 (0x1a), region = 209 }
0x1a3e   : > { %s9108_s17 = smov %s9101_s3 }
0x1a43   :  { %4732 = vsyncpa [#allocation4], 1 }
0x1a44   :  { %4734 = vsyncpa [#allocation4 + $0x1], 1 }
0x1a45   :  { %4735 = vsyncpa [#allocation7], 1 }
0x1a46   :  { %4736 = vsyncpa [#allocation5], 1 }
0x1a47   :  { %4738 = vsyncpa [#allocation5 + $0x1], 1 }

</bundles_post_ra>
